<compile_context>
chip_gen: v7x
topology: tpu7x:2x2x1
jax: 0.10.0
libtpu: 0.0.40
codegen_flags: <defaults>
</compile_context>

<pallas_src>
import functools

import jax
import jax.numpy as jnp
from jax.experimental import pallas as pl
from jax.experimental.pallas import tpu as pltpu


# ------------------------------ Fused kernel ------------------------------- #

def _ap_fused_kernel(x_ref, mask_ref,
                     wqkv_ref, bqkv_ref, wo_ref, bo_ref,
                     w1_ref, b1_ref, w2_ref, b2_ref,
                     ln1g_ref, ln1b_ref, ln2g_ref, ln2b_ref,
                     fw1_ref, fb1_ref, fw2_ref, fb2_ref,
                     ap_ref, change_ref,
                     *, num_layers, S, H, Dh, eps):
    """One grid step == one batch element.  Everything lives in VMEM."""
    D = H * Dh
    scale = 1.0 / float(Dh) ** 0.5

    # ---- Change = x[:, :frame_in] - cat([x[:, 0:1], x[:, :frame_in-1]]) ----
    x = x_ref[0]                                           # [S, D]
    prev = pltpu.roll(x, shift=1, axis=1)                  # prev[t] = x[t-1] (t>0)
    t = jax.lax.broadcasted_iota(jnp.int32, x.shape, 1)
    change = jnp.where(t == 0, jnp.zeros_like(x), x - prev)
    change_ref[0] = change

    mask = mask_ref[...]                                   # [H*S, D] head-block mask

    def layernorm(y, g, b):
        mu = jnp.mean(y, axis=-1, keepdims=True)
        var = jnp.mean((y - mu) * (y - mu), axis=-1, keepdims=True)
        return (y - mu) * jax.lax.rsqrt(var + eps) * g + b

    # ---- 5-layer post-norm transformer encoder (sequence axis = C) ----
    feat = change                                          # [S, D]
    for l in range(num_layers):
        # Fused QKV projection: one [S,D] x [D,3D] matmul.
        qkv = jnp.dot(feat, wqkv_ref[l],
                      preferred_element_type=jnp.float32) + bqkv_ref[l]
        q = qkv[:, :D]
        k = qkv[:, D:2 * D]
        v = qkv[:, 2 * D:3 * D]

        # All heads at once: replicate Q along sublanes, mask off non-head
        # feature columns, then a single [H*S, D] x [D, S] contraction gives
        # every head's score block (cross-head terms are zeroed by the mask).
        q_rep = jnp.concatenate([q] * H, axis=0) * mask    # [H*S, D]
        s = jax.lax.dot_general(q_rep, k, (((1,), (1,)), ((), ())),
                                preferred_element_type=jnp.float32) * scale
        s = s - jnp.max(s, axis=-1, keepdims=True)
        e = jnp.exp(s)
        p = e / jnp.sum(e, axis=-1, keepdims=True)         # [H*S, S]

        # Context for all heads, then fold the H row-blocks back into [S, D]
        # (mask keeps only each head's own feature columns).
        ctx = jnp.dot(p, v, preferred_element_type=jnp.float32) * mask  # [H*S, D]
        attn = ctx[0:S, :]
        for h in range(1, H):
            attn = attn + ctx[h * S:(h + 1) * S, :]

        attn = jnp.dot(attn, wo_ref[l],
                       preferred_element_type=jnp.float32) + bo_ref[l]
        feat = layernorm(feat + attn, ln1g_ref[l], ln1b_ref[l])

        ff = jnp.dot(feat, w1_ref[l],
                     preferred_element_type=jnp.float32) + b1_ref[l]
        ff = jnp.maximum(ff, 0.0)
        ff = jnp.dot(ff, w2_ref[l],
                     preferred_element_type=jnp.float32) + b2_ref[l]
        feat = layernorm(feat + ff, ln2g_ref[l], ln2b_ref[l])

    # ---- AP_FC: Linear -> ReLU -> (Dropout) -> Linear -> (Dropout) ----
    h1 = jnp.dot(feat, fw1_ref[...],
                 preferred_element_type=jnp.float32) + fb1_ref[...]
    h1 = jnp.maximum(h1, 0.0)
    ap = jnp.dot(h1, fw2_ref[...],
                 preferred_element_type=jnp.float32) + fb2_ref[...]
    ap_ref[0] = ap


# ------------------------------- Parameters -------------------------------- #

def _init_linear(key, fan_in, fan_out):
    kw, kb = jax.random.split(key)
    w = jax.random.normal(kw, (fan_in, fan_out), jnp.float32) / jnp.sqrt(
        jnp.float32(fan_in))
    b = jax.random.normal(kb, (fan_out,), jnp.float32) * 0.01
    return w, b


def init_params(key, in_features, hidden_features, out_features,
                num_layers, d_ff):
    D = in_features
    keys = jax.random.split(key, num_layers + 1)
    wqkv, bqkv, wo, bo, w1, b1, w2, b2 = ([] for _ in range(8))
    for l in range(num_layers):
        ks = jax.random.split(keys[l], 6)
        wq, bq_ = _init_linear(ks[0], D, D)
        wk, bk_ = _init_linear(ks[1], D, D)
        wv, bv_ = _init_linear(ks[2], D, D)
        wo_l, bo_l = _init_linear(ks[3], D, D)
        w1_l, b1_l = _init_linear(ks[4], D, d_ff)
        w2_l, b2_l = _init_linear(ks[5], d_ff, D)
        wqkv.append(jnp.concatenate([wq, wk, wv], axis=1))             # [D, 3D]
        bqkv.append(jnp.concatenate([bq_, bk_, bv_]).reshape(1, 3 * D))
        wo.append(wo_l)
        bo.append(bo_l.reshape(1, D))
        w1.append(w1_l)
        b1.append(b1_l.reshape(1, d_ff))
        w2.append(w2_l)
        b2.append(b2_l.reshape(1, D))
    kf = jax.random.split(keys[-1], 2)
    fw1, fb1 = _init_linear(kf[0], D, hidden_features)
    fw2, fb2 = _init_linear(kf[1], hidden_features, out_features)
    L = num_layers
    return dict(
        wqkv=jnp.stack(wqkv), bqkv=jnp.stack(bqkv),
        wo=jnp.stack(wo), bo=jnp.stack(bo),
        w1=jnp.stack(w1), b1=jnp.stack(b1),
        w2=jnp.stack(w2), b2=jnp.stack(b2),
        ln1_g=jnp.ones((L, 1, D), jnp.float32),
        ln1_b=jnp.zeros((L, 1, D), jnp.float32),
        ln2_g=jnp.ones((L, 1, D), jnp.float32),
        ln2_b=jnp.zeros((L, 1, D), jnp.float32),
        fc_w1=fw1, fc_b1=fb1.reshape(1, hidden_features),
        fc_w2=fw2, fc_b2=fb2.reshape(1, out_features),
    )


# ------------------------------ Forward pass ------------------------------- #

def ap_forward(params, x, frame_in, num_heads):
    """x: [B, C, T] -> (AP_score [B, C, out_features], Change [B, C, frame_in])."""
    B, C, _ = x.shape
    D = frame_in                      # == in_features (transformer feature dim)
    H = num_heads
    Dh = D // H
    L = params["wqkv"].shape[0]
    O = params["fc_w2"].shape[1]

    x_in = x[:, :, :frame_in]                                        # [B, C, D]

    # Head-block mask: mask[h*C + i, d] = 1 iff feature column d belongs to head h.
    row_head = jnp.arange(H * C, dtype=jnp.int32)[:, None] // C
    col_head = jnp.arange(D, dtype=jnp.int32)[None, :] // Dh
    head_mask = (row_head == col_head).astype(jnp.float32)           # [H*C, D]

    weight_order = ("wqkv", "bqkv", "wo", "bo", "w1", "b1", "w2", "b2",
                    "ln1_g", "ln1_b", "ln2_g", "ln2_b",
                    "fc_w1", "fc_b1", "fc_w2", "fc_b2")
    weights = [params[k] for k in weight_order]

    def resident(arr):
        # Whole array in VMEM, same block for every grid step (fetched once).
        nd = arr.ndim
        return pl.BlockSpec(arr.shape, lambda b, _nd=nd: (0,) * _nd)

    kernel = functools.partial(_ap_fused_kernel, num_layers=L, S=C, H=H, Dh=Dh,
                               eps=1e-5)

    ap, change = pl.pallas_call(
        kernel,
        grid=(B,),
        in_specs=[pl.BlockSpec((1, C, D), lambda b: (b, 0, 0)),      # x (per batch)
                  resident(head_mask)] + [resident(w) for w in weights],
        out_specs=[pl.BlockSpec((1, C, O), lambda b: (b, 0, 0)),
                   pl.BlockSpec((1, C, D), lambda b: (b, 0, 0))],
        out_shape=(jax.ShapeDtypeStruct((B, C, O), jnp.float32),
                   jax.ShapeDtypeStruct((B, C, D), jnp.float32)),
        compiler_params=pltpu.CompilerParams(
            dimension_semantics=("parallel",)),                      # v7x: 2 TCs
    )(x_in, head_mask, *weights)
    return ap, change


# ---------------------------------- Main ----------------------------------- #

if __name__ == "__main__":
    # opt.dataset == '3dpw' -> num_heads = 4; opt.frame_in = in_features = 32
    B, C, T_total = 2, 16, 40
    frame_in = 32            # in_features
    hidden_features = 64
    out_features = 8
    num_heads = 4
    num_layers = 5
    d_ff = 2 * frame_in      # TODO(synk): FFN width of Att.TransformerEncoder unknown

    key = jax.random.PRNGKey(0)
    kx, kp = jax.random.split(key)
    x = jax.random.normal(kx, (B, C, T_total), jnp.float32)
    params = init_params(kp, frame_in, hidden_features, out_features,
                         num_layers, d_ff)

    ap_score, change = ap_forward(params, x, frame_in, num_heads)
    jax.block_until_ready((ap_score, change))

    assert ap_score.shape == (B, C, out_features)
    assert change.shape == (B, C, frame_in)
    print("KERNEL_OK")
</pallas_src>

<mosaic_0001>
module attributes {stable_mosaic.version = 11 : i64} {
  func.func @_ap_fused_kernel(%arg0: i32, %arg1: memref<1x16x32xf32, #tpu.memory_space<vmem>>, %arg2: memref<64x32xf32, #tpu.memory_space<vmem>>, %arg3: memref<5x32x96xf32, #tpu.memory_space<vmem>>, %arg4: memref<5x1x96xf32, #tpu.memory_space<vmem>>, %arg5: memref<5x32x32xf32, #tpu.memory_space<vmem>>, %arg6: memref<5x1x32xf32, #tpu.memory_space<vmem>>, %arg7: memref<5x32x64xf32, #tpu.memory_space<vmem>>, %arg8: memref<5x1x64xf32, #tpu.memory_space<vmem>>, %arg9: memref<5x64x32xf32, #tpu.memory_space<vmem>>, %arg10: memref<5x1x32xf32, #tpu.memory_space<vmem>>, %arg11: memref<5x1x32xf32, #tpu.memory_space<vmem>>, %arg12: memref<5x1x32xf32, #tpu.memory_space<vmem>>, %arg13: memref<5x1x32xf32, #tpu.memory_space<vmem>>, %arg14: memref<5x1x32xf32, #tpu.memory_space<vmem>>, %arg15: memref<32x64xf32, #tpu.memory_space<vmem>>, %arg16: memref<1x64xf32, #tpu.memory_space<vmem>>, %arg17: memref<64x8xf32, #tpu.memory_space<vmem>>, %arg18: memref<1x8xf32, #tpu.memory_space<vmem>>, %arg19: memref<1x16x8xf32, #tpu.memory_space<vmem>>, %arg20: memref<1x16x32xf32, #tpu.memory_space<vmem>>) attributes {dimension_semantics = [#tpu.dimension_semantics<parallel>], iteration_bounds = array<i64: 2>, scalar_prefetch = 0 : i64, scratch_operands = 0 : i64, tpu.core_type = #tpu.core_type<tc>, window_params = [{transform_indices = @transform_0, window_bounds = array<i64: 1, 16, 32>}, {pipeline_mode = #tpu.pipeline_mode<synchronous>, transform_indices = @transform_1, window_bounds = array<i64: 64, 32>}, {pipeline_mode = #tpu.pipeline_mode<synchronous>, transform_indices = @transform_2, window_bounds = array<i64: 5, 32, 96>}, {pipeline_mode = #tpu.pipeline_mode<synchronous>, transform_indices = @transform_3, window_bounds = array<i64: 5, 1, 96>}, {pipeline_mode = #tpu.pipeline_mode<synchronous>, transform_indices = @transform_4, window_bounds = array<i64: 5, 32, 32>}, {pipeline_mode = #tpu.pipeline_mode<synchronous>, transform_indices = @transform_5, window_bounds = array<i64: 5, 1, 32>}, {pipeline_mode = #tpu.pipeline_mode<synchronous>, transform_indices = @transform_6, window_bounds = array<i64: 5, 32, 64>}, {pipeline_mode = #tpu.pipeline_mode<synchronous>, transform_indices = @transform_7, window_bounds = array<i64: 5, 1, 64>}, {pipeline_mode = #tpu.pipeline_mode<synchronous>, transform_indices = @transform_8, window_bounds = array<i64: 5, 64, 32>}, {pipeline_mode = #tpu.pipeline_mode<synchronous>, transform_indices = @transform_9, window_bounds = array<i64: 5, 1, 32>}, {pipeline_mode = #tpu.pipeline_mode<synchronous>, transform_indices = @transform_10, window_bounds = array<i64: 5, 1, 32>}, {pipeline_mode = #tpu.pipeline_mode<synchronous>, transform_indices = @transform_11, window_bounds = array<i64: 5, 1, 32>}, {pipeline_mode = #tpu.pipeline_mode<synchronous>, transform_indices = @transform_12, window_bounds = array<i64: 5, 1, 32>}, {pipeline_mode = #tpu.pipeline_mode<synchronous>, transform_indices = @transform_13, window_bounds = array<i64: 5, 1, 32>}, {pipeline_mode = #tpu.pipeline_mode<synchronous>, transform_indices = @transform_14, window_bounds = array<i64: 32, 64>}, {pipeline_mode = #tpu.pipeline_mode<synchronous>, transform_indices = @transform_15, window_bounds = array<i64: 1, 64>}, {pipeline_mode = #tpu.pipeline_mode<synchronous>, transform_indices = @transform_16, window_bounds = array<i64: 64, 8>}, {pipeline_mode = #tpu.pipeline_mode<synchronous>, transform_indices = @transform_17, window_bounds = array<i64: 1, 8>}, {transform_indices = @transform_18, window_bounds = array<i64: 1, 16, 8>}, {transform_indices = @transform_19, window_bounds = array<i64: 1, 16, 32>}]} {
    %c0 = arith.constant 0 : index
    %c0_0 = arith.constant 0 : index
    %c0_1 = arith.constant 0 : index
    %0 = vector.load %arg1[%c0, %c0_0, %c0_1] : memref<1x16x32xf32, #tpu.memory_space<vmem>>, vector<1x16x32xf32>
    %1 = vector.shape_cast %0 : vector<1x16x32xf32> to vector<16x32xf32>
    %c1_i32 = arith.constant 1 : i32
    %2 = tpu.dynamic_rotate %1 by %c1_i32 dim 1 : vector<16x32xf32>, i32 -> vector<16x32xf32>
    %3 = tpu.iota {dimensions = array<i32: 1>} : vector<16x32xi32>
    %c0_i32 = arith.constant 0 : i32
    %4 = vector.broadcast %c0_i32 : i32 to vector<16x32xi32>
    %5 = arith.cmpi eq, %3, %4 : vector<16x32xi32>
    %cst = arith.constant 0.000000e+00 : f32
    %6 = vector.broadcast %cst : f32 to vector<16x32xf32>
    %7 = arith.subf %1, %2 : vector<16x32xf32>
    %8 = arith.select %5, %6, %7 : vector<16x32xi1>, vector<16x32xf32>
    %c0_2 = arith.constant 0 : index
    %c0_3 = arith.constant 0 : index
    %c0_4 = arith.constant 0 : index
    %9 = vector.load %arg20[%c0_2, %c0_3, %c0_4] : memref<1x16x32xf32, #tpu.memory_space<vmem>>, vector<1x16x32xf32>
    %10 = vector.shape_cast %9 : vector<1x16x32xf32> to vector<16x32xf32>
    %11 = vector.shape_cast %8 : vector<16x32xf32> to vector<1x16x32xf32>
    tpu.vector_store %arg20[%c0_2, %c0_3, %c0_4], %11 {strides = array<i32>} : memref<1x16x32xf32, #tpu.memory_space<vmem>>, vector<1x16x32xf32>,
    %c0_5 = arith.constant 0 : index
    %c0_6 = arith.constant 0 : index
    %12 = vector.load %arg2[%c0_5, %c0_6] : memref<64x32xf32, #tpu.memory_space<vmem>>, vector<64x32xf32>
    %c0_7 = arith.constant 0 : index
    %c0_8 = arith.constant 0 : index
    %c0_9 = arith.constant 0 : index
    %13 = vector.load %arg3[%c0_7, %c0_8, %c0_9] : memref<5x32x96xf32, #tpu.memory_space<vmem>>, vector<1x32x96xf32>
    %14 = vector.shape_cast %13 : vector<1x32x96xf32> to vector<32x96xf32>
    %cst_10 = arith.constant dense<0.000000e+00> : vector<16x96xf32>
    %15 = tpu.matmul %8, %14, %cst_10 {dimension_numbers = #tpu.dot_dimension_numbers<[1], [0], [0], [1], [0, 0, 1, 1], [], []>} : vector<16x32xf32>, vector<32x96xf32>, vector<16x96xf32> -> vector<16x96xf32>
    %c0_11 = arith.constant 0 : index
    %c0_12 = arith.constant 0 : index
    %c0_13 = arith.constant 0 : index
    %16 = vector.load %arg4[%c0_11, %c0_12, %c0_13] : memref<5x1x96xf32, #tpu.memory_space<vmem>>, vector<1x1x96xf32>
    %17 = vector.shape_cast %16 : vector<1x1x96xf32> to vector<1x96xf32>
    %18 = vector.broadcast %17 : vector<1x96xf32> to vector<16x96xf32>
    %19 = arith.addf %15, %18 : vector<16x96xf32>
    %20 = vector.extract_strided_slice %19 {offsets = [0, 0], sizes = [16, 32], strides = [1, 1]} : vector<16x96xf32> to vector<16x32xf32>
    %21 = vector.extract_strided_slice %19 {offsets = [0, 32], sizes = [16, 32], strides = [1, 1]} : vector<16x96xf32> to vector<16x32xf32>
    %22 = vector.extract_strided_slice %19 {offsets = [0, 64], sizes = [16, 32], strides = [1, 1]} : vector<16x96xf32> to vector<16x32xf32>
    %23 = tpu.concatenate %20, %20, %20, %20 in 0 : vector<16x32xf32>, vector<16x32xf32>, vector<16x32xf32>, vector<16x32xf32> -> vector<64x32xf32>
    %24 = arith.mulf %23, %12 : vector<64x32xf32>
    %cst_14 = arith.constant dense<0.000000e+00> : vector<64x16xf32>
    %25 = tpu.matmul %24, %21, %cst_14 {dimension_numbers = #tpu.dot_dimension_numbers<[1], [1], [0], [0], [0, 0, 1, 0], [], []>} : vector<64x32xf32>, vector<16x32xf32>, vector<64x16xf32> -> vector<64x16xf32>
    %cst_15 = arith.constant 0.353553385 : f32
    %26 = vector.broadcast %cst_15 : f32 to vector<64x16xf32>
    %27 = arith.mulf %25, %26 : vector<64x16xf32>
    %cst_16 = arith.constant dense<0xFF800000> : vector<64xf32>
    %28 = vector.multi_reduction <maximumf>, %27, %cst_16 [1] : vector<64x16xf32> to vector<64xf32>
    %29 = vector.shape_cast %28 : vector<64xf32> to vector<64x1xf32>
    %30 = vector.broadcast %29 : vector<64x1xf32> to vector<64x16xf32>
    %31 = arith.subf %27, %30 : vector<64x16xf32>
    %32 = math.exp %31 : vector<64x16xf32>
    %cst_17 = arith.constant dense<0.000000e+00> : vector<64xf32>
    %33 = vector.multi_reduction <add>, %32, %cst_17 [1] : vector<64x16xf32> to vector<64xf32>
    %34 = vector.shape_cast %33 : vector<64xf32> to vector<64x1xf32>
    %35 = vector.broadcast %34 : vector<64x1xf32> to vector<64x16xf32>
    %36 = arith.divf %32, %35 : vector<64x16xf32>
    %cst_18 = arith.constant dense<0.000000e+00> : vector<64x32xf32>
    %37 = tpu.matmul %36, %22, %cst_18 {dimension_numbers = #tpu.dot_dimension_numbers<[1], [0], [0], [1], [0, 0, 1, 1], [], []>} : vector<64x16xf32>, vector<16x32xf32>, vector<64x32xf32> -> vector<64x32xf32>
    %38 = arith.mulf %37, %12 : vector<64x32xf32>
    %39 = vector.extract_strided_slice %38 {offsets = [0, 0], sizes = [16, 32], strides = [1, 1]} : vector<64x32xf32> to vector<16x32xf32>
    %40 = vector.extract_strided_slice %38 {offsets = [16, 0], sizes = [16, 32], strides = [1, 1]} : vector<64x32xf32> to vector<16x32xf32>
    %41 = arith.addf %39, %40 : vector<16x32xf32>
    %42 = vector.extract_strided_slice %38 {offsets = [32, 0], sizes = [16, 32], strides = [1, 1]} : vector<64x32xf32> to vector<16x32xf32>
    %43 = arith.addf %41, %42 : vector<16x32xf32>
    %44 = vector.extract_strided_slice %38 {offsets = [48, 0], sizes = [16, 32], strides = [1, 1]} : vector<64x32xf32> to vector<16x32xf32>
    %45 = arith.addf %43, %44 : vector<16x32xf32>
    %c0_19 = arith.constant 0 : index
    %c0_20 = arith.constant 0 : index
    %c0_21 = arith.constant 0 : index
    %46 = vector.load %arg5[%c0_19, %c0_20, %c0_21] : memref<5x32x32xf32, #tpu.memory_space<vmem>>, vector<1x32x32xf32>
    %47 = vector.shape_cast %46 : vector<1x32x32xf32> to vector<32x32xf32>
    %cst_22 = arith.constant dense<0.000000e+00> : vector<16x32xf32>
    %48 = tpu.matmul %45, %47, %cst_22 {dimension_numbers = #tpu.dot_dimension_numbers<[1], [0], [0], [1], [0, 0, 1, 1], [], []>} : vector<16x32xf32>, vector<32x32xf32>, vector<16x32xf32> -> vector<16x32xf32>
    %c0_23 = arith.constant 0 : index
    %c0_24 = arith.constant 0 : index
    %c0_25 = arith.constant 0 : index
    %49 = vector.load %arg6[%c0_23, %c0_24, %c0_25] : memref<5x1x32xf32, #tpu.memory_space<vmem>>, vector<1x1x32xf32>
    %50 = vector.shape_cast %49 : vector<1x1x32xf32> to vector<1x32xf32>
    %51 = vector.broadcast %50 : vector<1x32xf32> to vector<16x32xf32>
    %52 = arith.addf %48, %51 : vector<16x32xf32>
    %53 = arith.addf %8, %52 : vector<16x32xf32>
    %c0_26 = arith.constant 0 : index
    %c0_27 = arith.constant 0 : index
    %c0_28 = arith.constant 0 : index
    %54 = vector.load %arg11[%c0_26, %c0_27, %c0_28] : memref<5x1x32xf32, #tpu.memory_space<vmem>>, vector<1x1x32xf32>
    %55 = vector.shape_cast %54 : vector<1x1x32xf32> to vector<1x32xf32>
    %c0_29 = arith.constant 0 : index
    %c0_30 = arith.constant 0 : index
    %c0_31 = arith.constant 0 : index
    %56 = vector.load %arg12[%c0_29, %c0_30, %c0_31] : memref<5x1x32xf32, #tpu.memory_space<vmem>>, vector<1x1x32xf32>
    %57 = vector.shape_cast %56 : vector<1x1x32xf32> to vector<1x32xf32>
    %cst_32 = arith.constant dense<0.000000e+00> : vector<16xf32>
    %58 = vector.multi_reduction <add>, %53, %cst_32 [1] : vector<16x32xf32> to vector<16xf32>
    %59 = vector.shape_cast %58 : vector<16xf32> to vector<16x1xf32>
    %cst_33 = arith.constant 3.200000e+01 : f32
    %60 = vector.broadcast %cst_33 : f32 to vector<16x1xf32>
    %61 = arith.divf %59, %60 : vector<16x1xf32>
    %62 = vector.broadcast %61 : vector<16x1xf32> to vector<16x32xf32>
    %63 = arith.subf %53, %62 : vector<16x32xf32>
    %64 = vector.broadcast %61 : vector<16x1xf32> to vector<16x32xf32>
    %65 = arith.subf %53, %64 : vector<16x32xf32>
    %66 = arith.mulf %63, %65 : vector<16x32xf32>
    %cst_34 = arith.constant dense<0.000000e+00> : vector<16xf32>
    %67 = vector.multi_reduction <add>, %66, %cst_34 [1] : vector<16x32xf32> to vector<16xf32>
    %68 = vector.shape_cast %67 : vector<16xf32> to vector<16x1xf32>
    %cst_35 = arith.constant 3.200000e+01 : f32
    %69 = vector.broadcast %cst_35 : f32 to vector<16x1xf32>
    %70 = arith.divf %68, %69 : vector<16x1xf32>
    %71 = vector.broadcast %61 : vector<16x1xf32> to vector<16x32xf32>
    %72 = arith.subf %53, %71 : vector<16x32xf32>
    %cst_36 = arith.constant 9.99999974E-6 : f32
    %73 = vector.broadcast %cst_36 : f32 to vector<16x1xf32>
    %74 = arith.addf %70, %73 : vector<16x1xf32>
    %75 = math.rsqrt %74 : vector<16x1xf32>
    %76 = vector.broadcast %75 : vector<16x1xf32> to vector<16x32xf32>
    %77 = arith.mulf %72, %76 : vector<16x32xf32>
    %78 = vector.broadcast %55 : vector<1x32xf32> to vector<16x32xf32>
    %79 = arith.mulf %77, %78 : vector<16x32xf32>
    %80 = vector.broadcast %57 : vector<1x32xf32> to vector<16x32xf32>
    %81 = arith.addf %79, %80 : vector<16x32xf32>
    %c0_37 = arith.constant 0 : index
    %c0_38 = arith.constant 0 : index
    %c0_39 = arith.constant 0 : index
    %82 = vector.load %arg7[%c0_37, %c0_38, %c0_39] : memref<5x32x64xf32, #tpu.memory_space<vmem>>, vector<1x32x64xf32>
    %83 = vector.shape_cast %82 : vector<1x32x64xf32> to vector<32x64xf32>
    %cst_40 = arith.constant dense<0.000000e+00> : vector<16x64xf32>
    %84 = tpu.matmul %81, %83, %cst_40 {dimension_numbers = #tpu.dot_dimension_numbers<[1], [0], [0], [1], [0, 0, 1, 1], [], []>} : vector<16x32xf32>, vector<32x64xf32>, vector<16x64xf32> -> vector<16x64xf32>
    %c0_41 = arith.constant 0 : index
    %c0_42 = arith.constant 0 : index
    %c0_43 = arith.constant 0 : index
    %85 = vector.load %arg8[%c0_41, %c0_42, %c0_43] : memref<5x1x64xf32, #tpu.memory_space<vmem>>, vector<1x1x64xf32>
    %86 = vector.shape_cast %85 : vector<1x1x64xf32> to vector<1x64xf32>
    %87 = vector.broadcast %86 : vector<1x64xf32> to vector<16x64xf32>
    %88 = arith.addf %84, %87 : vector<16x64xf32>
    %cst_44 = arith.constant 0.000000e+00 : f32
    %89 = vector.broadcast %cst_44 : f32 to vector<16x64xf32>
    %90 = arith.maximumf %88, %89 : vector<16x64xf32>
    %c0_45 = arith.constant 0 : index
    %c0_46 = arith.constant 0 : index
    %c0_47 = arith.constant 0 : index
    %91 = vector.load %arg9[%c0_45, %c0_46, %c0_47] : memref<5x64x32xf32, #tpu.memory_space<vmem>>, vector<1x64x32xf32>
    %92 = vector.shape_cast %91 : vector<1x64x32xf32> to vector<64x32xf32>
    %cst_48 = arith.constant dense<0.000000e+00> : vector<16x32xf32>
    %93 = tpu.matmul %90, %92, %cst_48 {dimension_numbers = #tpu.dot_dimension_numbers<[1], [0], [0], [1], [0, 0, 1, 1], [], []>} : vector<16x64xf32>, vector<64x32xf32>, vector<16x32xf32> -> vector<16x32xf32>
    %c0_49 = arith.constant 0 : index
    %c0_50 = arith.constant 0 : index
    %c0_51 = arith.constant 0 : index
    %94 = vector.load %arg10[%c0_49, %c0_50, %c0_51] : memref<5x1x32xf32, #tpu.memory_space<vmem>>, vector<1x1x32xf32>
    %95 = vector.shape_cast %94 : vector<1x1x32xf32> to vector<1x32xf32>
    %96 = vector.broadcast %95 : vector<1x32xf32> to vector<16x32xf32>
    %97 = arith.addf %93, %96 : vector<16x32xf32>
    %98 = arith.addf %81, %97 : vector<16x32xf32>
    %c0_52 = arith.constant 0 : index
    %c0_53 = arith.constant 0 : index
    %c0_54 = arith.constant 0 : index
    %99 = vector.load %arg13[%c0_52, %c0_53, %c0_54] : memref<5x1x32xf32, #tpu.memory_space<vmem>>, vector<1x1x32xf32>
    %100 = vector.shape_cast %99 : vector<1x1x32xf32> to vector<1x32xf32>
    %c0_55 = arith.constant 0 : index
    %c0_56 = arith.constant 0 : index
    %c0_57 = arith.constant 0 : index
    %101 = vector.load %arg14[%c0_55, %c0_56, %c0_57] : memref<5x1x32xf32, #tpu.memory_space<vmem>>, vector<1x1x32xf32>
    %102 = vector.shape_cast %101 : vector<1x1x32xf32> to vector<1x32xf32>
    %cst_58 = arith.constant dense<0.000000e+00> : vector<16xf32>
    %103 = vector.multi_reduction <add>, %98, %cst_58 [1] : vector<16x32xf32> to vector<16xf32>
    %104 = vector.shape_cast %103 : vector<16xf32> to vector<16x1xf32>
    %cst_59 = arith.constant 3.200000e+01 : f32
    %105 = vector.broadcast %cst_59 : f32 to vector<16x1xf32>
    %106 = arith.divf %104, %105 : vector<16x1xf32>
    %107 = vector.broadcast %106 : vector<16x1xf32> to vector<16x32xf32>
    %108 = arith.subf %98, %107 : vector<16x32xf32>
    %109 = vector.broadcast %106 : vector<16x1xf32> to vector<16x32xf32>
    %110 = arith.subf %98, %109 : vector<16x32xf32>
    %111 = arith.mulf %108, %110 : vector<16x32xf32>
    %cst_60 = arith.constant dense<0.000000e+00> : vector<16xf32>
    %112 = vector.multi_reduction <add>, %111, %cst_60 [1] : vector<16x32xf32> to vector<16xf32>
    %113 = vector.shape_cast %112 : vector<16xf32> to vector<16x1xf32>
    %cst_61 = arith.constant 3.200000e+01 : f32
    %114 = vector.broadcast %cst_61 : f32 to vector<16x1xf32>
    %115 = arith.divf %113, %114 : vector<16x1xf32>
    %116 = vector.broadcast %106 : vector<16x1xf32> to vector<16x32xf32>
    %117 = arith.subf %98, %116 : vector<16x32xf32>
    %cst_62 = arith.constant 9.99999974E-6 : f32
    %118 = vector.broadcast %cst_62 : f32 to vector<16x1xf32>
    %119 = arith.addf %115, %118 : vector<16x1xf32>
    %120 = math.rsqrt %119 : vector<16x1xf32>
    %121 = vector.broadcast %120 : vector<16x1xf32> to vector<16x32xf32>
    %122 = arith.mulf %117, %121 : vector<16x32xf32>
    %123 = vector.broadcast %100 : vector<1x32xf32> to vector<16x32xf32>
    %124 = arith.mulf %122, %123 : vector<16x32xf32>
    %125 = vector.broadcast %102 : vector<1x32xf32> to vector<16x32xf32>
    %126 = arith.addf %124, %125 : vector<16x32xf32>
    %c1 = arith.constant 1 : index
    %c0_63 = arith.constant 0 : index
    %c0_64 = arith.constant 0 : index
    %127 = vector.load %arg3[%c1, %c0_63, %c0_64] : memref<5x32x96xf32, #tpu.memory_space<vmem>>, vector<1x32x96xf32>
    %128 = vector.shape_cast %127 : vector<1x32x96xf32> to vector<32x96xf32>
    %cst_65 = arith.constant dense<0.000000e+00> : vector<16x96xf32>
    %129 = tpu.matmul %126, %128, %cst_65 {dimension_numbers = #tpu.dot_dimension_numbers<[1], [0], [0], [1], [0, 0, 1, 1], [], []>} : vector<16x32xf32>, vector<32x96xf32>, vector<16x96xf32> -> vector<16x96xf32>
    %c1_66 = arith.constant 1 : index
    %c0_67 = arith.constant 0 : index
    %c0_68 = arith.constant 0 : index
    %130 = vector.load %arg4[%c1_66, %c0_67, %c0_68] : memref<5x1x96xf32, #tpu.memory_space<vmem>>, vector<1x1x96xf32>
    %131 = vector.shape_cast %130 : vector<1x1x96xf32> to vector<1x96xf32>
    %132 = vector.broadcast %131 : vector<1x96xf32> to vector<16x96xf32>
    %133 = arith.addf %129, %132 : vector<16x96xf32>
    %134 = vector.extract_strided_slice %133 {offsets = [0, 0], sizes = [16, 32], strides = [1, 1]} : vector<16x96xf32> to vector<16x32xf32>
    %135 = vector.extract_strided_slice %133 {offsets = [0, 32], sizes = [16, 32], strides = [1, 1]} : vector<16x96xf32> to vector<16x32xf32>
    %136 = vector.extract_strided_slice %133 {offsets = [0, 64], sizes = [16, 32], strides = [1, 1]} : vector<16x96xf32> to vector<16x32xf32>
    %137 = tpu.concatenate %134, %134, %134, %134 in 0 : vector<16x32xf32>, vector<16x32xf32>, vector<16x32xf32>, vector<16x32xf32> -> vector<64x32xf32>
    %138 = arith.mulf %137, %12 : vector<64x32xf32>
    %cst_69 = arith.constant dense<0.000000e+00> : vector<64x16xf32>
    %139 = tpu.matmul %138, %135, %cst_69 {dimension_numbers = #tpu.dot_dimension_numbers<[1], [1], [0], [0], [0, 0, 1, 0], [], []>} : vector<64x32xf32>, vector<16x32xf32>, vector<64x16xf32> -> vector<64x16xf32>
    %cst_70 = arith.constant 0.353553385 : f32
    %140 = vector.broadcast %cst_70 : f32 to vector<64x16xf32>
    %141 = arith.mulf %139, %140 : vector<64x16xf32>
    %cst_71 = arith.constant dense<0xFF800000> : vector<64xf32>
    %142 = vector.multi_reduction <maximumf>, %141, %cst_71 [1] : vector<64x16xf32> to vector<64xf32>
    %143 = vector.shape_cast %142 : vector<64xf32> to vector<64x1xf32>
    %144 = vector.broadcast %143 : vector<64x1xf32> to vector<64x16xf32>
    %145 = arith.subf %141, %144 : vector<64x16xf32>
    %146 = math.exp %145 : vector<64x16xf32>
    %cst_72 = arith.constant dense<0.000000e+00> : vector<64xf32>
    %147 = vector.multi_reduction <add>, %146, %cst_72 [1] : vector<64x16xf32> to vector<64xf32>
    %148 = vector.shape_cast %147 : vector<64xf32> to vector<64x1xf32>
    %149 = vector.broadcast %148 : vector<64x1xf32> to vector<64x16xf32>
    %150 = arith.divf %146, %149 : vector<64x16xf32>
    %cst_73 = arith.constant dense<0.000000e+00> : vector<64x32xf32>
    %151 = tpu.matmul %150, %136, %cst_73 {dimension_numbers = #tpu.dot_dimension_numbers<[1], [0], [0], [1], [0, 0, 1, 1], [], []>} : vector<64x16xf32>, vector<16x32xf32>, vector<64x32xf32> -> vector<64x32xf32>
    %152 = arith.mulf %151, %12 : vector<64x32xf32>
    %153 = vector.extract_strided_slice %152 {offsets = [0, 0], sizes = [16, 32], strides = [1, 1]} : vector<64x32xf32> to vector<16x32xf32>
    %154 = vector.extract_strided_slice %152 {offsets = [16, 0], sizes = [16, 32], strides = [1, 1]} : vector<64x32xf32> to vector<16x32xf32>
    %155 = arith.addf %153, %154 : vector<16x32xf32>
    %156 = vector.extract_strided_slice %152 {offsets = [32, 0], sizes = [16, 32], strides = [1, 1]} : vector<64x32xf32> to vector<16x32xf32>
    %157 = arith.addf %155, %156 : vector<16x32xf32>
    %158 = vector.extract_strided_slice %152 {offsets = [48, 0], sizes = [16, 32], strides = [1, 1]} : vector<64x32xf32> to vector<16x32xf32>
    %159 = arith.addf %157, %158 : vector<16x32xf32>
    %c1_74 = arith.constant 1 : index
    %c0_75 = arith.constant 0 : index
    %c0_76 = arith.constant 0 : index
    %160 = vector.load %arg5[%c1_74, %c0_75, %c0_76] : memref<5x32x32xf32, #tpu.memory_space<vmem>>, vector<1x32x32xf32>
    %161 = vector.shape_cast %160 : vector<1x32x32xf32> to vector<32x32xf32>
    %cst_77 = arith.constant dense<0.000000e+00> : vector<16x32xf32>
    %162 = tpu.matmul %159, %161, %cst_77 {dimension_numbers = #tpu.dot_dimension_numbers<[1], [0], [0], [1], [0, 0, 1, 1], [], []>} : vector<16x32xf32>, vector<32x32xf32>, vector<16x32xf32> -> vector<16x32xf32>
    %c1_78 = arith.constant 1 : index
    %c0_79 = arith.constant 0 : index
    %c0_80 = arith.constant 0 : index
    %163 = vector.load %arg6[%c1_78, %c0_79, %c0_80] : memref<5x1x32xf32, #tpu.memory_space<vmem>>, vector<1x1x32xf32>
    %164 = vector.shape_cast %163 : vector<1x1x32xf32> to vector<1x32xf32>
    %165 = vector.broadcast %164 : vector<1x32xf32> to vector<16x32xf32>
    %166 = arith.addf %162, %165 : vector<16x32xf32>
    %167 = arith.addf %126, %166 : vector<16x32xf32>
    %c1_81 = arith.constant 1 : index
    %c0_82 = arith.constant 0 : index
    %c0_83 = arith.constant 0 : index
    %168 = vector.load %arg11[%c1_81, %c0_82, %c0_83] : memref<5x1x32xf32, #tpu.memory_space<vmem>>, vector<1x1x32xf32>
    %169 = vector.shape_cast %168 : vector<1x1x32xf32> to vector<1x32xf32>
    %c1_84 = arith.constant 1 : index
    %c0_85 = arith.constant 0 : index
    %c0_86 = arith.constant 0 : index
    %170 = vector.load %arg12[%c1_84, %c0_85, %c0_86] : memref<5x1x32xf32, #tpu.memory_space<vmem>>, vector<1x1x32xf32>
    %171 = vector.shape_cast %170 : vector<1x1x32xf32> to vector<1x32xf32>
    %cst_87 = arith.constant dense<0.000000e+00> : vector<16xf32>
    %172 = vector.multi_reduction <add>, %167, %cst_87 [1] : vector<16x32xf32> to vector<16xf32>
    %173 = vector.shape_cast %172 : vector<16xf32> to vector<16x1xf32>
    %cst_88 = arith.constant 3.200000e+01 : f32
    %174 = vector.broadcast %cst_88 : f32 to vector<16x1xf32>
    %175 = arith.divf %173, %174 : vector<16x1xf32>
    %176 = vector.broadcast %175 : vector<16x1xf32> to vector<16x32xf32>
    %177 = arith.subf %167, %176 : vector<16x32xf32>
    %178 = vector.broadcast %175 : vector<16x1xf32> to vector<16x32xf32>
    %179 = arith.subf %167, %178 : vector<16x32xf32>
    %180 = arith.mulf %177, %179 : vector<16x32xf32>
    %cst_89 = arith.constant dense<0.000000e+00> : vector<16xf32>
    %181 = vector.multi_reduction <add>, %180, %cst_89 [1] : vector<16x32xf32> to vector<16xf32>
    %182 = vector.shape_cast %181 : vector<16xf32> to vector<16x1xf32>
    %cst_90 = arith.constant 3.200000e+01 : f32
    %183 = vector.broadcast %cst_90 : f32 to vector<16x1xf32>
    %184 = arith.divf %182, %183 : vector<16x1xf32>
    %185 = vector.broadcast %175 : vector<16x1xf32> to vector<16x32xf32>
    %186 = arith.subf %167, %185 : vector<16x32xf32>
    %cst_91 = arith.constant 9.99999974E-6 : f32
    %187 = vector.broadcast %cst_91 : f32 to vector<16x1xf32>
    %188 = arith.addf %184, %187 : vector<16x1xf32>
    %189 = math.rsqrt %188 : vector<16x1xf32>
    %190 = vector.broadcast %189 : vector<16x1xf32> to vector<16x32xf32>
    %191 = arith.mulf %186, %190 : vector<16x32xf32>
    %192 = vector.broadcast %169 : vector<1x32xf32> to vector<16x32xf32>
    %193 = arith.mulf %191, %192 : vector<16x32xf32>
    %194 = vector.broadcast %171 : vector<1x32xf32> to vector<16x32xf32>
    %195 = arith.addf %193, %194 : vector<16x32xf32>
    %c1_92 = arith.constant 1 : index
    %c0_93 = arith.constant 0 : index
    %c0_94 = arith.constant 0 : index
    %196 = vector.load %arg7[%c1_92, %c0_93, %c0_94] : memref<5x32x64xf32, #tpu.memory_space<vmem>>, vector<1x32x64xf32>
    %197 = vector.shape_cast %196 : vector<1x32x64xf32> to vector<32x64xf32>
    %cst_95 = arith.constant dense<0.000000e+00> : vector<16x64xf32>
    %198 = tpu.matmul %195, %197, %cst_95 {dimension_numbers = #tpu.dot_dimension_numbers<[1], [0], [0], [1], [0, 0, 1, 1], [], []>} : vector<16x32xf32>, vector<32x64xf32>, vector<16x64xf32> -> vector<16x64xf32>
    %c1_96 = arith.constant 1 : index
    %c0_97 = arith.constant 0 : index
    %c0_98 = arith.constant 0 : index
    %199 = vector.load %arg8[%c1_96, %c0_97, %c0_98] : memref<5x1x64xf32, #tpu.memory_space<vmem>>, vector<1x1x64xf32>
    %200 = vector.shape_cast %199 : vector<1x1x64xf32> to vector<1x64xf32>
    %201 = vector.broadcast %200 : vector<1x64xf32> to vector<16x64xf32>
    %202 = arith.addf %198, %201 : vector<16x64xf32>
    %cst_99 = arith.constant 0.000000e+00 : f32
    %203 = vector.broadcast %cst_99 : f32 to vector<16x64xf32>
    %204 = arith.maximumf %202, %203 : vector<16x64xf32>
    %c1_100 = arith.constant 1 : index
    %c0_101 = arith.constant 0 : index
    %c0_102 = arith.constant 0 : index
    %205 = vector.load %arg9[%c1_100, %c0_101, %c0_102] : memref<5x64x32xf32, #tpu.memory_space<vmem>>, vector<1x64x32xf32>
    %206 = vector.shape_cast %205 : vector<1x64x32xf32> to vector<64x32xf32>
    %cst_103 = arith.constant dense<0.000000e+00> : vector<16x32xf32>
    %207 = tpu.matmul %204, %206, %cst_103 {dimension_numbers = #tpu.dot_dimension_numbers<[1], [0], [0], [1], [0, 0, 1, 1], [], []>} : vector<16x64xf32>, vector<64x32xf32>, vector<16x32xf32> -> vector<16x32xf32>
    %c1_104 = arith.constant 1 : index
    %c0_105 = arith.constant 0 : index
    %c0_106 = arith.constant 0 : index
    %208 = vector.load %arg10[%c1_104, %c0_105, %c0_106] : memref<5x1x32xf32, #tpu.memory_space<vmem>>, vector<1x1x32xf32>
    %209 = vector.shape_cast %208 : vector<1x1x32xf32> to vector<1x32xf32>
    %210 = vector.broadcast %209 : vector<1x32xf32> to vector<16x32xf32>
    %211 = arith.addf %207, %210 : vector<16x32xf32>
    %212 = arith.addf %195, %211 : vector<16x32xf32>
    %c1_107 = arith.constant 1 : index
    %c0_108 = arith.constant 0 : index
    %c0_109 = arith.constant 0 : index
    %213 = vector.load %arg13[%c1_107, %c0_108, %c0_109] : memref<5x1x32xf32, #tpu.memory_space<vmem>>, vector<1x1x32xf32>
    %214 = vector.shape_cast %213 : vector<1x1x32xf32> to vector<1x32xf32>
    %c1_110 = arith.constant 1 : index
    %c0_111 = arith.constant 0 : index
    %c0_112 = arith.constant 0 : index
    %215 = vector.load %arg14[%c1_110, %c0_111, %c0_112] : memref<5x1x32xf32, #tpu.memory_space<vmem>>, vector<1x1x32xf32>
    %216 = vector.shape_cast %215 : vector<1x1x32xf32> to vector<1x32xf32>
    %cst_113 = arith.constant dense<0.000000e+00> : vector<16xf32>
    %217 = vector.multi_reduction <add>, %212, %cst_113 [1] : vector<16x32xf32> to vector<16xf32>
    %218 = vector.shape_cast %217 : vector<16xf32> to vector<16x1xf32>
    %cst_114 = arith.constant 3.200000e+01 : f32
    %219 = vector.broadcast %cst_114 : f32 to vector<16x1xf32>
    %220 = arith.divf %218, %219 : vector<16x1xf32>
    %221 = vector.broadcast %220 : vector<16x1xf32> to vector<16x32xf32>
    %222 = arith.subf %212, %221 : vector<16x32xf32>
    %223 = vector.broadcast %220 : vector<16x1xf32> to vector<16x32xf32>
    %224 = arith.subf %212, %223 : vector<16x32xf32>
    %225 = arith.mulf %222, %224 : vector<16x32xf32>
    %cst_115 = arith.constant dense<0.000000e+00> : vector<16xf32>
    %226 = vector.multi_reduction <add>, %225, %cst_115 [1] : vector<16x32xf32> to vector<16xf32>
    %227 = vector.shape_cast %226 : vector<16xf32> to vector<16x1xf32>
    %cst_116 = arith.constant 3.200000e+01 : f32
    %228 = vector.broadcast %cst_116 : f32 to vector<16x1xf32>
    %229 = arith.divf %227, %228 : vector<16x1xf32>
    %230 = vector.broadcast %220 : vector<16x1xf32> to vector<16x32xf32>
    %231 = arith.subf %212, %230 : vector<16x32xf32>
    %cst_117 = arith.constant 9.99999974E-6 : f32
    %232 = vector.broadcast %cst_117 : f32 to vector<16x1xf32>
    %233 = arith.addf %229, %232 : vector<16x1xf32>
    %234 = math.rsqrt %233 : vector<16x1xf32>
    %235 = vector.broadcast %234 : vector<16x1xf32> to vector<16x32xf32>
    %236 = arith.mulf %231, %235 : vector<16x32xf32>
    %237 = vector.broadcast %214 : vector<1x32xf32> to vector<16x32xf32>
    %238 = arith.mulf %236, %237 : vector<16x32xf32>
    %239 = vector.broadcast %216 : vector<1x32xf32> to vector<16x32xf32>
    %240 = arith.addf %238, %239 : vector<16x32xf32>
    %c2 = arith.constant 2 : index
    %c0_118 = arith.constant 0 : index
    %c0_119 = arith.constant 0 : index
    %241 = vector.load %arg3[%c2, %c0_118, %c0_119] : memref<5x32x96xf32, #tpu.memory_space<vmem>>, vector<1x32x96xf32>
    %242 = vector.shape_cast %241 : vector<1x32x96xf32> to vector<32x96xf32>
    %cst_120 = arith.constant dense<0.000000e+00> : vector<16x96xf32>
    %243 = tpu.matmul %240, %242, %cst_120 {dimension_numbers = #tpu.dot_dimension_numbers<[1], [0], [0], [1], [0, 0, 1, 1], [], []>} : vector<16x32xf32>, vector<32x96xf32>, vector<16x96xf32> -> vector<16x96xf32>
    %c2_121 = arith.constant 2 : index
    %c0_122 = arith.constant 0 : index
    %c0_123 = arith.constant 0 : index
    %244 = vector.load %arg4[%c2_121, %c0_122, %c0_123] : memref<5x1x96xf32, #tpu.memory_space<vmem>>, vector<1x1x96xf32>
    %245 = vector.shape_cast %244 : vector<1x1x96xf32> to vector<1x96xf32>
    %246 = vector.broadcast %245 : vector<1x96xf32> to vector<16x96xf32>
    %247 = arith.addf %243, %246 : vector<16x96xf32>
    %248 = vector.extract_strided_slice %247 {offsets = [0, 0], sizes = [16, 32], strides = [1, 1]} : vector<16x96xf32> to vector<16x32xf32>
    %249 = vector.extract_strided_slice %247 {offsets = [0, 32], sizes = [16, 32], strides = [1, 1]} : vector<16x96xf32> to vector<16x32xf32>
    %250 = vector.extract_strided_slice %247 {offsets = [0, 64], sizes = [16, 32], strides = [1, 1]} : vector<16x96xf32> to vector<16x32xf32>
    %251 = tpu.concatenate %248, %248, %248, %248 in 0 : vector<16x32xf32>, vector<16x32xf32>, vector<16x32xf32>, vector<16x32xf32> -> vector<64x32xf32>
    %252 = arith.mulf %251, %12 : vector<64x32xf32>
    %cst_124 = arith.constant dense<0.000000e+00> : vector<64x16xf32>
    %253 = tpu.matmul %252, %249, %cst_124 {dimension_numbers = #tpu.dot_dimension_numbers<[1], [1], [0], [0], [0, 0, 1, 0], [], []>} : vector<64x32xf32>, vector<16x32xf32>, vector<64x16xf32> -> vector<64x16xf32>
    %cst_125 = arith.constant 0.353553385 : f32
    %254 = vector.broadcast %cst_125 : f32 to vector<64x16xf32>
    %255 = arith.mulf %253, %254 : vector<64x16xf32>
    %cst_126 = arith.constant dense<0xFF800000> : vector<64xf32>
    %256 = vector.multi_reduction <maximumf>, %255, %cst_126 [1] : vector<64x16xf32> to vector<64xf32>
    %257 = vector.shape_cast %256 : vector<64xf32> to vector<64x1xf32>
    %258 = vector.broadcast %257 : vector<64x1xf32> to vector<64x16xf32>
    %259 = arith.subf %255, %258 : vector<64x16xf32>
    %260 = math.exp %259 : vector<64x16xf32>
    %cst_127 = arith.constant dense<0.000000e+00> : vector<64xf32>
    %261 = vector.multi_reduction <add>, %260, %cst_127 [1] : vector<64x16xf32> to vector<64xf32>
    %262 = vector.shape_cast %261 : vector<64xf32> to vector<64x1xf32>
    %263 = vector.broadcast %262 : vector<64x1xf32> to vector<64x16xf32>
    %264 = arith.divf %260, %263 : vector<64x16xf32>
    %cst_128 = arith.constant dense<0.000000e+00> : vector<64x32xf32>
    %265 = tpu.matmul %264, %250, %cst_128 {dimension_numbers = #tpu.dot_dimension_numbers<[1], [0], [0], [1], [0, 0, 1, 1], [], []>} : vector<64x16xf32>, vector<16x32xf32>, vector<64x32xf32> -> vector<64x32xf32>
    %266 = arith.mulf %265, %12 : vector<64x32xf32>
    %267 = vector.extract_strided_slice %266 {offsets = [0, 0], sizes = [16, 32], strides = [1, 1]} : vector<64x32xf32> to vector<16x32xf32>
    %268 = vector.extract_strided_slice %266 {offsets = [16, 0], sizes = [16, 32], strides = [1, 1]} : vector<64x32xf32> to vector<16x32xf32>
    %269 = arith.addf %267, %268 : vector<16x32xf32>
    %270 = vector.extract_strided_slice %266 {offsets = [32, 0], sizes = [16, 32], strides = [1, 1]} : vector<64x32xf32> to vector<16x32xf32>
    %271 = arith.addf %269, %270 : vector<16x32xf32>
    %272 = vector.extract_strided_slice %266 {offsets = [48, 0], sizes = [16, 32], strides = [1, 1]} : vector<64x32xf32> to vector<16x32xf32>
    %273 = arith.addf %271, %272 : vector<16x32xf32>
    %c2_129 = arith.constant 2 : index
    %c0_130 = arith.constant 0 : index
    %c0_131 = arith.constant 0 : index
    %274 = vector.load %arg5[%c2_129, %c0_130, %c0_131] : memref<5x32x32xf32, #tpu.memory_space<vmem>>, vector<1x32x32xf32>
    %275 = vector.shape_cast %274 : vector<1x32x32xf32> to vector<32x32xf32>
    %cst_132 = arith.constant dense<0.000000e+00> : vector<16x32xf32>
    %276 = tpu.matmul %273, %275, %cst_132 {dimension_numbers = #tpu.dot_dimension_numbers<[1], [0], [0], [1], [0, 0, 1, 1], [], []>} : vector<16x32xf32>, vector<32x32xf32>, vector<16x32xf32> -> vector<16x32xf32>
    %c2_133 = arith.constant 2 : index
    %c0_134 = arith.constant 0 : index
    %c0_135 = arith.constant 0 : index
    %277 = vector.load %arg6[%c2_133, %c0_134, %c0_135] : memref<5x1x32xf32, #tpu.memory_space<vmem>>, vector<1x1x32xf32>
    %278 = vector.shape_cast %277 : vector<1x1x32xf32> to vector<1x32xf32>
    %279 = vector.broadcast %278 : vector<1x32xf32> to vector<16x32xf32>
    %280 = arith.addf %276, %279 : vector<16x32xf32>
    %281 = arith.addf %240, %280 : vector<16x32xf32>
    %c2_136 = arith.constant 2 : index
    %c0_137 = arith.constant 0 : index
    %c0_138 = arith.constant 0 : index
    %282 = vector.load %arg11[%c2_136, %c0_137, %c0_138] : memref<5x1x32xf32, #tpu.memory_space<vmem>>, vector<1x1x32xf32>
    %283 = vector.shape_cast %282 : vector<1x1x32xf32> to vector<1x32xf32>
    %c2_139 = arith.constant 2 : index
    %c0_140 = arith.constant 0 : index
    %c0_141 = arith.constant 0 : index
    %284 = vector.load %arg12[%c2_139, %c0_140, %c0_141] : memref<5x1x32xf32, #tpu.memory_space<vmem>>, vector<1x1x32xf32>
    %285 = vector.shape_cast %284 : vector<1x1x32xf32> to vector<1x32xf32>
    %cst_142 = arith.constant dense<0.000000e+00> : vector<16xf32>
    %286 = vector.multi_reduction <add>, %281, %cst_142 [1] : vector<16x32xf32> to vector<16xf32>
    %287 = vector.shape_cast %286 : vector<16xf32> to vector<16x1xf32>
    %cst_143 = arith.constant 3.200000e+01 : f32
    %288 = vector.broadcast %cst_143 : f32 to vector<16x1xf32>
    %289 = arith.divf %287, %288 : vector<16x1xf32>
    %290 = vector.broadcast %289 : vector<16x1xf32> to vector<16x32xf32>
    %291 = arith.subf %281, %290 : vector<16x32xf32>
    %292 = vector.broadcast %289 : vector<16x1xf32> to vector<16x32xf32>
    %293 = arith.subf %281, %292 : vector<16x32xf32>
    %294 = arith.mulf %291, %293 : vector<16x32xf32>
    %cst_144 = arith.constant dense<0.000000e+00> : vector<16xf32>
    %295 = vector.multi_reduction <add>, %294, %cst_144 [1] : vector<16x32xf32> to vector<16xf32>
    %296 = vector.shape_cast %295 : vector<16xf32> to vector<16x1xf32>
    %cst_145 = arith.constant 3.200000e+01 : f32
    %297 = vector.broadcast %cst_145 : f32 to vector<16x1xf32>
    %298 = arith.divf %296, %297 : vector<16x1xf32>
    %299 = vector.broadcast %289 : vector<16x1xf32> to vector<16x32xf32>
    %300 = arith.subf %281, %299 : vector<16x32xf32>
    %cst_146 = arith.constant 9.99999974E-6 : f32
    %301 = vector.broadcast %cst_146 : f32 to vector<16x1xf32>
    %302 = arith.addf %298, %301 : vector<16x1xf32>
    %303 = math.rsqrt %302 : vector<16x1xf32>
    %304 = vector.broadcast %303 : vector<16x1xf32> to vector<16x32xf32>
    %305 = arith.mulf %300, %304 : vector<16x32xf32>
    %306 = vector.broadcast %283 : vector<1x32xf32> to vector<16x32xf32>
    %307 = arith.mulf %305, %306 : vector<16x32xf32>
    %308 = vector.broadcast %285 : vector<1x32xf32> to vector<16x32xf32>
    %309 = arith.addf %307, %308 : vector<16x32xf32>
    %c2_147 = arith.constant 2 : index
    %c0_148 = arith.constant 0 : index
    %c0_149 = arith.constant 0 : index
    %310 = vector.load %arg7[%c2_147, %c0_148, %c0_149] : memref<5x32x64xf32, #tpu.memory_space<vmem>>, vector<1x32x64xf32>
    %311 = vector.shape_cast %310 : vector<1x32x64xf32> to vector<32x64xf32>
    %cst_150 = arith.constant dense<0.000000e+00> : vector<16x64xf32>
    %312 = tpu.matmul %309, %311, %cst_150 {dimension_numbers = #tpu.dot_dimension_numbers<[1], [0], [0], [1], [0, 0, 1, 1], [], []>} : vector<16x32xf32>, vector<32x64xf32>, vector<16x64xf32> -> vector<16x64xf32>
    %c2_151 = arith.constant 2 : index
    %c0_152 = arith.constant 0 : index
    %c0_153 = arith.constant 0 : index
    %313 = vector.load %arg8[%c2_151, %c0_152, %c0_153] : memref<5x1x64xf32, #tpu.memory_space<vmem>>, vector<1x1x64xf32>
    %314 = vector.shape_cast %313 : vector<1x1x64xf32> to vector<1x64xf32>
    %315 = vector.broadcast %314 : vector<1x64xf32> to vector<16x64xf32>
    %316 = arith.addf %312, %315 : vector<16x64xf32>
    %cst_154 = arith.constant 0.000000e+00 : f32
    %317 = vector.broadcast %cst_154 : f32 to vector<16x64xf32>
    %318 = arith.maximumf %316, %317 : vector<16x64xf32>
    %c2_155 = arith.constant 2 : index
    %c0_156 = arith.constant 0 : index
    %c0_157 = arith.constant 0 : index
    %319 = vector.load %arg9[%c2_155, %c0_156, %c0_157] : memref<5x64x32xf32, #tpu.memory_space<vmem>>, vector<1x64x32xf32>
    %320 = vector.shape_cast %319 : vector<1x64x32xf32> to vector<64x32xf32>
    %cst_158 = arith.constant dense<0.000000e+00> : vector<16x32xf32>
    %321 = tpu.matmul %318, %320, %cst_158 {dimension_numbers = #tpu.dot_dimension_numbers<[1], [0], [0], [1], [0, 0, 1, 1], [], []>} : vector<16x64xf32>, vector<64x32xf32>, vector<16x32xf32> -> vector<16x32xf32>
    %c2_159 = arith.constant 2 : index
    %c0_160 = arith.constant 0 : index
    %c0_161 = arith.constant 0 : index
    %322 = vector.load %arg10[%c2_159, %c0_160, %c0_161] : memref<5x1x32xf32, #tpu.memory_space<vmem>>, vector<1x1x32xf32>
    %323 = vector.shape_cast %322 : vector<1x1x32xf32> to vector<1x32xf32>
    %324 = vector.broadcast %323 : vector<1x32xf32> to vector<16x32xf32>
    %325 = arith.addf %321, %324 : vector<16x32xf32>
    %326 = arith.addf %309, %325 : vector<16x32xf32>
    %c2_162 = arith.constant 2 : index
    %c0_163 = arith.constant 0 : index
    %c0_164 = arith.constant 0 : index
    %327 = vector.load %arg13[%c2_162, %c0_163, %c0_164] : memref<5x1x32xf32, #tpu.memory_space<vmem>>, vector<1x1x32xf32>
    %328 = vector.shape_cast %327 : vector<1x1x32xf32> to vector<1x32xf32>
    %c2_165 = arith.constant 2 : index
    %c0_166 = arith.constant 0 : index
    %c0_167 = arith.constant 0 : index
    %329 = vector.load %arg14[%c2_165, %c0_166, %c0_167] : memref<5x1x32xf32, #tpu.memory_space<vmem>>, vector<1x1x32xf32>
    %330 = vector.shape_cast %329 : vector<1x1x32xf32> to vector<1x32xf32>
    %cst_168 = arith.constant dense<0.000000e+00> : vector<16xf32>
    %331 = vector.multi_reduction <add>, %326, %cst_168 [1] : vector<16x32xf32> to vector<16xf32>
    %332 = vector.shape_cast %331 : vector<16xf32> to vector<16x1xf32>
    %cst_169 = arith.constant 3.200000e+01 : f32
    %333 = vector.broadcast %cst_169 : f32 to vector<16x1xf32>
    %334 = arith.divf %332, %333 : vector<16x1xf32>
    %335 = vector.broadcast %334 : vector<16x1xf32> to vector<16x32xf32>
    %336 = arith.subf %326, %335 : vector<16x32xf32>
    %337 = vector.broadcast %334 : vector<16x1xf32> to vector<16x32xf32>
    %338 = arith.subf %326, %337 : vector<16x32xf32>
    %339 = arith.mulf %336, %338 : vector<16x32xf32>
    %cst_170 = arith.constant dense<0.000000e+00> : vector<16xf32>
    %340 = vector.multi_reduction <add>, %339, %cst_170 [1] : vector<16x32xf32> to vector<16xf32>
    %341 = vector.shape_cast %340 : vector<16xf32> to vector<16x1xf32>
    %cst_171 = arith.constant 3.200000e+01 : f32
    %342 = vector.broadcast %cst_171 : f32 to vector<16x1xf32>
    %343 = arith.divf %341, %342 : vector<16x1xf32>
    %344 = vector.broadcast %334 : vector<16x1xf32> to vector<16x32xf32>
    %345 = arith.subf %326, %344 : vector<16x32xf32>
    %cst_172 = arith.constant 9.99999974E-6 : f32
    %346 = vector.broadcast %cst_172 : f32 to vector<16x1xf32>
    %347 = arith.addf %343, %346 : vector<16x1xf32>
    %348 = math.rsqrt %347 : vector<16x1xf32>
    %349 = vector.broadcast %348 : vector<16x1xf32> to vector<16x32xf32>
    %350 = arith.mulf %345, %349 : vector<16x32xf32>
    %351 = vector.broadcast %328 : vector<1x32xf32> to vector<16x32xf32>
    %352 = arith.mulf %350, %351 : vector<16x32xf32>
    %353 = vector.broadcast %330 : vector<1x32xf32> to vector<16x32xf32>
    %354 = arith.addf %352, %353 : vector<16x32xf32>
    %c3 = arith.constant 3 : index
    %c0_173 = arith.constant 0 : index
    %c0_174 = arith.constant 0 : index
    %355 = vector.load %arg3[%c3, %c0_173, %c0_174] : memref<5x32x96xf32, #tpu.memory_space<vmem>>, vector<1x32x96xf32>
    %356 = vector.shape_cast %355 : vector<1x32x96xf32> to vector<32x96xf32>
    %cst_175 = arith.constant dense<0.000000e+00> : vector<16x96xf32>
    %357 = tpu.matmul %354, %356, %cst_175 {dimension_numbers = #tpu.dot_dimension_numbers<[1], [0], [0], [1], [0, 0, 1, 1], [], []>} : vector<16x32xf32>, vector<32x96xf32>, vector<16x96xf32> -> vector<16x96xf32>
    %c3_176 = arith.constant 3 : index
    %c0_177 = arith.constant 0 : index
    %c0_178 = arith.constant 0 : index
    %358 = vector.load %arg4[%c3_176, %c0_177, %c0_178] : memref<5x1x96xf32, #tpu.memory_space<vmem>>, vector<1x1x96xf32>
    %359 = vector.shape_cast %358 : vector<1x1x96xf32> to vector<1x96xf32>
    %360 = vector.broadcast %359 : vector<1x96xf32> to vector<16x96xf32>
    %361 = arith.addf %357, %360 : vector<16x96xf32>
    %362 = vector.extract_strided_slice %361 {offsets = [0, 0], sizes = [16, 32], strides = [1, 1]} : vector<16x96xf32> to vector<16x32xf32>
    %363 = vector.extract_strided_slice %361 {offsets = [0, 32], sizes = [16, 32], strides = [1, 1]} : vector<16x96xf32> to vector<16x32xf32>
    %364 = vector.extract_strided_slice %361 {offsets = [0, 64], sizes = [16, 32], strides = [1, 1]} : vector<16x96xf32> to vector<16x32xf32>
    %365 = tpu.concatenate %362, %362, %362, %362 in 0 : vector<16x32xf32>, vector<16x32xf32>, vector<16x32xf32>, vector<16x32xf32> -> vector<64x32xf32>
    %366 = arith.mulf %365, %12 : vector<64x32xf32>
    %cst_179 = arith.constant dense<0.000000e+00> : vector<64x16xf32>
    %367 = tpu.matmul %366, %363, %cst_179 {dimension_numbers = #tpu.dot_dimension_numbers<[1], [1], [0], [0], [0, 0, 1, 0], [], []>} : vector<64x32xf32>, vector<16x32xf32>, vector<64x16xf32> -> vector<64x16xf32>
    %cst_180 = arith.constant 0.353553385 : f32
    %368 = vector.broadcast %cst_180 : f32 to vector<64x16xf32>
    %369 = arith.mulf %367, %368 : vector<64x16xf32>
    %cst_181 = arith.constant dense<0xFF800000> : vector<64xf32>
    %370 = vector.multi_reduction <maximumf>, %369, %cst_181 [1] : vector<64x16xf32> to vector<64xf32>
    %371 = vector.shape_cast %370 : vector<64xf32> to vector<64x1xf32>
    %372 = vector.broadcast %371 : vector<64x1xf32> to vector<64x16xf32>
    %373 = arith.subf %369, %372 : vector<64x16xf32>
    %374 = math.exp %373 : vector<64x16xf32>
    %cst_182 = arith.constant dense<0.000000e+00> : vector<64xf32>
    %375 = vector.multi_reduction <add>, %374, %cst_182 [1] : vector<64x16xf32> to vector<64xf32>
    %376 = vector.shape_cast %375 : vector<64xf32> to vector<64x1xf32>
    %377 = vector.broadcast %376 : vector<64x1xf32> to vector<64x16xf32>
    %378 = arith.divf %374, %377 : vector<64x16xf32>
    %cst_183 = arith.constant dense<0.000000e+00> : vector<64x32xf32>
    %379 = tpu.matmul %378, %364, %cst_183 {dimension_numbers = #tpu.dot_dimension_numbers<[1], [0], [0], [1], [0, 0, 1, 1], [], []>} : vector<64x16xf32>, vector<16x32xf32>, vector<64x32xf32> -> vector<64x32xf32>
    %380 = arith.mulf %379, %12 : vector<64x32xf32>
    %381 = vector.extract_strided_slice %380 {offsets = [0, 0], sizes = [16, 32], strides = [1, 1]} : vector<64x32xf32> to vector<16x32xf32>
    %382 = vector.extract_strided_slice %380 {offsets = [16, 0], sizes = [16, 32], strides = [1, 1]} : vector<64x32xf32> to vector<16x32xf32>
    %383 = arith.addf %381, %382 : vector<16x32xf32>
    %384 = vector.extract_strided_slice %380 {offsets = [32, 0], sizes = [16, 32], strides = [1, 1]} : vector<64x32xf32> to vector<16x32xf32>
    %385 = arith.addf %383, %384 : vector<16x32xf32>
    %386 = vector.extract_strided_slice %380 {offsets = [48, 0], sizes = [16, 32], strides = [1, 1]} : vector<64x32xf32> to vector<16x32xf32>
    %387 = arith.addf %385, %386 : vector<16x32xf32>
    %c3_184 = arith.constant 3 : index
    %c0_185 = arith.constant 0 : index
    %c0_186 = arith.constant 0 : index
    %388 = vector.load %arg5[%c3_184, %c0_185, %c0_186] : memref<5x32x32xf32, #tpu.memory_space<vmem>>, vector<1x32x32xf32>
    %389 = vector.shape_cast %388 : vector<1x32x32xf32> to vector<32x32xf32>
    %cst_187 = arith.constant dense<0.000000e+00> : vector<16x32xf32>
    %390 = tpu.matmul %387, %389, %cst_187 {dimension_numbers = #tpu.dot_dimension_numbers<[1], [0], [0], [1], [0, 0, 1, 1], [], []>} : vector<16x32xf32>, vector<32x32xf32>, vector<16x32xf32> -> vector<16x32xf32>
    %c3_188 = arith.constant 3 : index
    %c0_189 = arith.constant 0 : index
    %c0_190 = arith.constant 0 : index
    %391 = vector.load %arg6[%c3_188, %c0_189, %c0_190] : memref<5x1x32xf32, #tpu.memory_space<vmem>>, vector<1x1x32xf32>
    %392 = vector.shape_cast %391 : vector<1x1x32xf32> to vector<1x32xf32>
    %393 = vector.broadcast %392 : vector<1x32xf32> to vector<16x32xf32>
    %394 = arith.addf %390, %393 : vector<16x32xf32>
    %395 = arith.addf %354, %394 : vector<16x32xf32>
    %c3_191 = arith.constant 3 : index
    %c0_192 = arith.constant 0 : index
    %c0_193 = arith.constant 0 : index
    %396 = vector.load %arg11[%c3_191, %c0_192, %c0_193] : memref<5x1x32xf32, #tpu.memory_space<vmem>>, vector<1x1x32xf32>
    %397 = vector.shape_cast %396 : vector<1x1x32xf32> to vector<1x32xf32>
    %c3_194 = arith.constant 3 : index
    %c0_195 = arith.constant 0 : index
    %c0_196 = arith.constant 0 : index
    %398 = vector.load %arg12[%c3_194, %c0_195, %c0_196] : memref<5x1x32xf32, #tpu.memory_space<vmem>>, vector<1x1x32xf32>
    %399 = vector.shape_cast %398 : vector<1x1x32xf32> to vector<1x32xf32>
    %cst_197 = arith.constant dense<0.000000e+00> : vector<16xf32>
    %400 = vector.multi_reduction <add>, %395, %cst_197 [1] : vector<16x32xf32> to vector<16xf32>
    %401 = vector.shape_cast %400 : vector<16xf32> to vector<16x1xf32>
    %cst_198 = arith.constant 3.200000e+01 : f32
    %402 = vector.broadcast %cst_198 : f32 to vector<16x1xf32>
    %403 = arith.divf %401, %402 : vector<16x1xf32>
    %404 = vector.broadcast %403 : vector<16x1xf32> to vector<16x32xf32>
    %405 = arith.subf %395, %404 : vector<16x32xf32>
    %406 = vector.broadcast %403 : vector<16x1xf32> to vector<16x32xf32>
    %407 = arith.subf %395, %406 : vector<16x32xf32>
    %408 = arith.mulf %405, %407 : vector<16x32xf32>
    %cst_199 = arith.constant dense<0.000000e+00> : vector<16xf32>
    %409 = vector.multi_reduction <add>, %408, %cst_199 [1] : vector<16x32xf32> to vector<16xf32>
    %410 = vector.shape_cast %409 : vector<16xf32> to vector<16x1xf32>
    %cst_200 = arith.constant 3.200000e+01 : f32
    %411 = vector.broadcast %cst_200 : f32 to vector<16x1xf32>
    %412 = arith.divf %410, %411 : vector<16x1xf32>
    %413 = vector.broadcast %403 : vector<16x1xf32> to vector<16x32xf32>
    %414 = arith.subf %395, %413 : vector<16x32xf32>
    %cst_201 = arith.constant 9.99999974E-6 : f32
    %415 = vector.broadcast %cst_201 : f32 to vector<16x1xf32>
    %416 = arith.addf %412, %415 : vector<16x1xf32>
    %417 = math.rsqrt %416 : vector<16x1xf32>
    %418 = vector.broadcast %417 : vector<16x1xf32> to vector<16x32xf32>
    %419 = arith.mulf %414, %418 : vector<16x32xf32>
    %420 = vector.broadcast %397 : vector<1x32xf32> to vector<16x32xf32>
    %421 = arith.mulf %419, %420 : vector<16x32xf32>
    %422 = vector.broadcast %399 : vector<1x32xf32> to vector<16x32xf32>
    %423 = arith.addf %421, %422 : vector<16x32xf32>
    %c3_202 = arith.constant 3 : index
    %c0_203 = arith.constant 0 : index
    %c0_204 = arith.constant 0 : index
    %424 = vector.load %arg7[%c3_202, %c0_203, %c0_204] : memref<5x32x64xf32, #tpu.memory_space<vmem>>, vector<1x32x64xf32>
    %425 = vector.shape_cast %424 : vector<1x32x64xf32> to vector<32x64xf32>
    %cst_205 = arith.constant dense<0.000000e+00> : vector<16x64xf32>
    %426 = tpu.matmul %423, %425, %cst_205 {dimension_numbers = #tpu.dot_dimension_numbers<[1], [0], [0], [1], [0, 0, 1, 1], [], []>} : vector<16x32xf32>, vector<32x64xf32>, vector<16x64xf32> -> vector<16x64xf32>
    %c3_206 = arith.constant 3 : index
    %c0_207 = arith.constant 0 : index
    %c0_208 = arith.constant 0 : index
    %427 = vector.load %arg8[%c3_206, %c0_207, %c0_208] : memref<5x1x64xf32, #tpu.memory_space<vmem>>, vector<1x1x64xf32>
    %428 = vector.shape_cast %427 : vector<1x1x64xf32> to vector<1x64xf32>
    %429 = vector.broadcast %428 : vector<1x64xf32> to vector<16x64xf32>
    %430 = arith.addf %426, %429 : vector<16x64xf32>
    %cst_209 = arith.constant 0.000000e+00 : f32
    %431 = vector.broadcast %cst_209 : f32 to vector<16x64xf32>
    %432 = arith.maximumf %430, %431 : vector<16x64xf32>
    %c3_210 = arith.constant 3 : index
    %c0_211 = arith.constant 0 : index
    %c0_212 = arith.constant 0 : index
    %433 = vector.load %arg9[%c3_210, %c0_211, %c0_212] : memref<5x64x32xf32, #tpu.memory_space<vmem>>, vector<1x64x32xf32>
    %434 = vector.shape_cast %433 : vector<1x64x32xf32> to vector<64x32xf32>
    %cst_213 = arith.constant dense<0.000000e+00> : vector<16x32xf32>
    %435 = tpu.matmul %432, %434, %cst_213 {dimension_numbers = #tpu.dot_dimension_numbers<[1], [0], [0], [1], [0, 0, 1, 1], [], []>} : vector<16x64xf32>, vector<64x32xf32>, vector<16x32xf32> -> vector<16x32xf32>
    %c3_214 = arith.constant 3 : index
    %c0_215 = arith.constant 0 : index
    %c0_216 = arith.constant 0 : index
    %436 = vector.load %arg10[%c3_214, %c0_215, %c0_216] : memref<5x1x32xf32, #tpu.memory_space<vmem>>, vector<1x1x32xf32>
    %437 = vector.shape_cast %436 : vector<1x1x32xf32> to vector<1x32xf32>
    %438 = vector.broadcast %437 : vector<1x32xf32> to vector<16x32xf32>
    %439 = arith.addf %435, %438 : vector<16x32xf32>
    %440 = arith.addf %423, %439 : vector<16x32xf32>
    %c3_217 = arith.constant 3 : index
    %c0_218 = arith.constant 0 : index
    %c0_219 = arith.constant 0 : index
    %441 = vector.load %arg13[%c3_217, %c0_218, %c0_219] : memref<5x1x32xf32, #tpu.memory_space<vmem>>, vector<1x1x32xf32>
    %442 = vector.shape_cast %441 : vector<1x1x32xf32> to vector<1x32xf32>
    %c3_220 = arith.constant 3 : index
    %c0_221 = arith.constant 0 : index
    %c0_222 = arith.constant 0 : index
    %443 = vector.load %arg14[%c3_220, %c0_221, %c0_222] : memref<5x1x32xf32, #tpu.memory_space<vmem>>, vector<1x1x32xf32>
    %444 = vector.shape_cast %443 : vector<1x1x32xf32> to vector<1x32xf32>
    %cst_223 = arith.constant dense<0.000000e+00> : vector<16xf32>
    %445 = vector.multi_reduction <add>, %440, %cst_223 [1] : vector<16x32xf32> to vector<16xf32>
    %446 = vector.shape_cast %445 : vector<16xf32> to vector<16x1xf32>
    %cst_224 = arith.constant 3.200000e+01 : f32
    %447 = vector.broadcast %cst_224 : f32 to vector<16x1xf32>
    %448 = arith.divf %446, %447 : vector<16x1xf32>
    %449 = vector.broadcast %448 : vector<16x1xf32> to vector<16x32xf32>
    %450 = arith.subf %440, %449 : vector<16x32xf32>
    %451 = vector.broadcast %448 : vector<16x1xf32> to vector<16x32xf32>
    %452 = arith.subf %440, %451 : vector<16x32xf32>
    %453 = arith.mulf %450, %452 : vector<16x32xf32>
    %cst_225 = arith.constant dense<0.000000e+00> : vector<16xf32>
    %454 = vector.multi_reduction <add>, %453, %cst_225 [1] : vector<16x32xf32> to vector<16xf32>
    %455 = vector.shape_cast %454 : vector<16xf32> to vector<16x1xf32>
    %cst_226 = arith.constant 3.200000e+01 : f32
    %456 = vector.broadcast %cst_226 : f32 to vector<16x1xf32>
    %457 = arith.divf %455, %456 : vector<16x1xf32>
    %458 = vector.broadcast %448 : vector<16x1xf32> to vector<16x32xf32>
    %459 = arith.subf %440, %458 : vector<16x32xf32>
    %cst_227 = arith.constant 9.99999974E-6 : f32
    %460 = vector.broadcast %cst_227 : f32 to vector<16x1xf32>
    %461 = arith.addf %457, %460 : vector<16x1xf32>
    %462 = math.rsqrt %461 : vector<16x1xf32>
    %463 = vector.broadcast %462 : vector<16x1xf32> to vector<16x32xf32>
    %464 = arith.mulf %459, %463 : vector<16x32xf32>
    %465 = vector.broadcast %442 : vector<1x32xf32> to vector<16x32xf32>
    %466 = arith.mulf %464, %465 : vector<16x32xf32>
    %467 = vector.broadcast %444 : vector<1x32xf32> to vector<16x32xf32>
    %468 = arith.addf %466, %467 : vector<16x32xf32>
    %c4 = arith.constant 4 : index
    %c0_228 = arith.constant 0 : index
    %c0_229 = arith.constant 0 : index
    %469 = vector.load %arg3[%c4, %c0_228, %c0_229] : memref<5x32x96xf32, #tpu.memory_space<vmem>>, vector<1x32x96xf32>
    %470 = vector.shape_cast %469 : vector<1x32x96xf32> to vector<32x96xf32>
    %cst_230 = arith.constant dense<0.000000e+00> : vector<16x96xf32>
    %471 = tpu.matmul %468, %470, %cst_230 {dimension_numbers = #tpu.dot_dimension_numbers<[1], [0], [0], [1], [0, 0, 1, 1], [], []>} : vector<16x32xf32>, vector<32x96xf32>, vector<16x96xf32> -> vector<16x96xf32>
    %c4_231 = arith.constant 4 : index
    %c0_232 = arith.constant 0 : index
    %c0_233 = arith.constant 0 : index
    %472 = vector.load %arg4[%c4_231, %c0_232, %c0_233] : memref<5x1x96xf32, #tpu.memory_space<vmem>>, vector<1x1x96xf32>
    %473 = vector.shape_cast %472 : vector<1x1x96xf32> to vector<1x96xf32>
    %474 = vector.broadcast %473 : vector<1x96xf32> to vector<16x96xf32>
    %475 = arith.addf %471, %474 : vector<16x96xf32>
    %476 = vector.extract_strided_slice %475 {offsets = [0, 0], sizes = [16, 32], strides = [1, 1]} : vector<16x96xf32> to vector<16x32xf32>
    %477 = vector.extract_strided_slice %475 {offsets = [0, 32], sizes = [16, 32], strides = [1, 1]} : vector<16x96xf32> to vector<16x32xf32>
    %478 = vector.extract_strided_slice %475 {offsets = [0, 64], sizes = [16, 32], strides = [1, 1]} : vector<16x96xf32> to vector<16x32xf32>
    %479 = tpu.concatenate %476, %476, %476, %476 in 0 : vector<16x32xf32>, vector<16x32xf32>, vector<16x32xf32>, vector<16x32xf32> -> vector<64x32xf32>
    %480 = arith.mulf %479, %12 : vector<64x32xf32>
    %cst_234 = arith.constant dense<0.000000e+00> : vector<64x16xf32>
    %481 = tpu.matmul %480, %477, %cst_234 {dimension_numbers = #tpu.dot_dimension_numbers<[1], [1], [0], [0], [0, 0, 1, 0], [], []>} : vector<64x32xf32>, vector<16x32xf32>, vector<64x16xf32> -> vector<64x16xf32>
    %cst_235 = arith.constant 0.353553385 : f32
    %482 = vector.broadcast %cst_235 : f32 to vector<64x16xf32>
    %483 = arith.mulf %481, %482 : vector<64x16xf32>
    %cst_236 = arith.constant dense<0xFF800000> : vector<64xf32>
    %484 = vector.multi_reduction <maximumf>, %483, %cst_236 [1] : vector<64x16xf32> to vector<64xf32>
    %485 = vector.shape_cast %484 : vector<64xf32> to vector<64x1xf32>
    %486 = vector.broadcast %485 : vector<64x1xf32> to vector<64x16xf32>
    %487 = arith.subf %483, %486 : vector<64x16xf32>
    %488 = math.exp %487 : vector<64x16xf32>
    %cst_237 = arith.constant dense<0.000000e+00> : vector<64xf32>
    %489 = vector.multi_reduction <add>, %488, %cst_237 [1] : vector<64x16xf32> to vector<64xf32>
    %490 = vector.shape_cast %489 : vector<64xf32> to vector<64x1xf32>
    %491 = vector.broadcast %490 : vector<64x1xf32> to vector<64x16xf32>
    %492 = arith.divf %488, %491 : vector<64x16xf32>
    %cst_238 = arith.constant dense<0.000000e+00> : vector<64x32xf32>
    %493 = tpu.matmul %492, %478, %cst_238 {dimension_numbers = #tpu.dot_dimension_numbers<[1], [0], [0], [1], [0, 0, 1, 1], [], []>} : vector<64x16xf32>, vector<16x32xf32>, vector<64x32xf32> -> vector<64x32xf32>
    %494 = arith.mulf %493, %12 : vector<64x32xf32>
    %495 = vector.extract_strided_slice %494 {offsets = [0, 0], sizes = [16, 32], strides = [1, 1]} : vector<64x32xf32> to vector<16x32xf32>
    %496 = vector.extract_strided_slice %494 {offsets = [16, 0], sizes = [16, 32], strides = [1, 1]} : vector<64x32xf32> to vector<16x32xf32>
    %497 = arith.addf %495, %496 : vector<16x32xf32>
    %498 = vector.extract_strided_slice %494 {offsets = [32, 0], sizes = [16, 32], strides = [1, 1]} : vector<64x32xf32> to vector<16x32xf32>
    %499 = arith.addf %497, %498 : vector<16x32xf32>
    %500 = vector.extract_strided_slice %494 {offsets = [48, 0], sizes = [16, 32], strides = [1, 1]} : vector<64x32xf32> to vector<16x32xf32>
    %501 = arith.addf %499, %500 : vector<16x32xf32>
    %c4_239 = arith.constant 4 : index
    %c0_240 = arith.constant 0 : index
    %c0_241 = arith.constant 0 : index
    %502 = vector.load %arg5[%c4_239, %c0_240, %c0_241] : memref<5x32x32xf32, #tpu.memory_space<vmem>>, vector<1x32x32xf32>
    %503 = vector.shape_cast %502 : vector<1x32x32xf32> to vector<32x32xf32>
    %cst_242 = arith.constant dense<0.000000e+00> : vector<16x32xf32>
    %504 = tpu.matmul %501, %503, %cst_242 {dimension_numbers = #tpu.dot_dimension_numbers<[1], [0], [0], [1], [0, 0, 1, 1], [], []>} : vector<16x32xf32>, vector<32x32xf32>, vector<16x32xf32> -> vector<16x32xf32>
    %c4_243 = arith.constant 4 : index
    %c0_244 = arith.constant 0 : index
    %c0_245 = arith.constant 0 : index
    %505 = vector.load %arg6[%c4_243, %c0_244, %c0_245] : memref<5x1x32xf32, #tpu.memory_space<vmem>>, vector<1x1x32xf32>
    %506 = vector.shape_cast %505 : vector<1x1x32xf32> to vector<1x32xf32>
    %507 = vector.broadcast %506 : vector<1x32xf32> to vector<16x32xf32>
    %508 = arith.addf %504, %507 : vector<16x32xf32>
    %509 = arith.addf %468, %508 : vector<16x32xf32>
    %c4_246 = arith.constant 4 : index
    %c0_247 = arith.constant 0 : index
    %c0_248 = arith.constant 0 : index
    %510 = vector.load %arg11[%c4_246, %c0_247, %c0_248] : memref<5x1x32xf32, #tpu.memory_space<vmem>>, vector<1x1x32xf32>
    %511 = vector.shape_cast %510 : vector<1x1x32xf32> to vector<1x32xf32>
    %c4_249 = arith.constant 4 : index
    %c0_250 = arith.constant 0 : index
    %c0_251 = arith.constant 0 : index
    %512 = vector.load %arg12[%c4_249, %c0_250, %c0_251] : memref<5x1x32xf32, #tpu.memory_space<vmem>>, vector<1x1x32xf32>
    %513 = vector.shape_cast %512 : vector<1x1x32xf32> to vector<1x32xf32>
    %cst_252 = arith.constant dense<0.000000e+00> : vector<16xf32>
    %514 = vector.multi_reduction <add>, %509, %cst_252 [1] : vector<16x32xf32> to vector<16xf32>
    %515 = vector.shape_cast %514 : vector<16xf32> to vector<16x1xf32>
    %cst_253 = arith.constant 3.200000e+01 : f32
    %516 = vector.broadcast %cst_253 : f32 to vector<16x1xf32>
    %517 = arith.divf %515, %516 : vector<16x1xf32>
    %518 = vector.broadcast %517 : vector<16x1xf32> to vector<16x32xf32>
    %519 = arith.subf %509, %518 : vector<16x32xf32>
    %520 = vector.broadcast %517 : vector<16x1xf32> to vector<16x32xf32>
    %521 = arith.subf %509, %520 : vector<16x32xf32>
    %522 = arith.mulf %519, %521 : vector<16x32xf32>
    %cst_254 = arith.constant dense<0.000000e+00> : vector<16xf32>
    %523 = vector.multi_reduction <add>, %522, %cst_254 [1] : vector<16x32xf32> to vector<16xf32>
    %524 = vector.shape_cast %523 : vector<16xf32> to vector<16x1xf32>
    %cst_255 = arith.constant 3.200000e+01 : f32
    %525 = vector.broadcast %cst_255 : f32 to vector<16x1xf32>
    %526 = arith.divf %524, %525 : vector<16x1xf32>
    %527 = vector.broadcast %517 : vector<16x1xf32> to vector<16x32xf32>
    %528 = arith.subf %509, %527 : vector<16x32xf32>
    %cst_256 = arith.constant 9.99999974E-6 : f32
    %529 = vector.broadcast %cst_256 : f32 to vector<16x1xf32>
    %530 = arith.addf %526, %529 : vector<16x1xf32>
    %531 = math.rsqrt %530 : vector<16x1xf32>
    %532 = vector.broadcast %531 : vector<16x1xf32> to vector<16x32xf32>
    %533 = arith.mulf %528, %532 : vector<16x32xf32>
    %534 = vector.broadcast %511 : vector<1x32xf32> to vector<16x32xf32>
    %535 = arith.mulf %533, %534 : vector<16x32xf32>
    %536 = vector.broadcast %513 : vector<1x32xf32> to vector<16x32xf32>
    %537 = arith.addf %535, %536 : vector<16x32xf32>
    %c4_257 = arith.constant 4 : index
    %c0_258 = arith.constant 0 : index
    %c0_259 = arith.constant 0 : index
    %538 = vector.load %arg7[%c4_257, %c0_258, %c0_259] : memref<5x32x64xf32, #tpu.memory_space<vmem>>, vector<1x32x64xf32>
    %539 = vector.shape_cast %538 : vector<1x32x64xf32> to vector<32x64xf32>
    %cst_260 = arith.constant dense<0.000000e+00> : vector<16x64xf32>
    %540 = tpu.matmul %537, %539, %cst_260 {dimension_numbers = #tpu.dot_dimension_numbers<[1], [0], [0], [1], [0, 0, 1, 1], [], []>} : vector<16x32xf32>, vector<32x64xf32>, vector<16x64xf32> -> vector<16x64xf32>
    %c4_261 = arith.constant 4 : index
    %c0_262 = arith.constant 0 : index
    %c0_263 = arith.constant 0 : index
    %541 = vector.load %arg8[%c4_261, %c0_262, %c0_263] : memref<5x1x64xf32, #tpu.memory_space<vmem>>, vector<1x1x64xf32>
    %542 = vector.shape_cast %541 : vector<1x1x64xf32> to vector<1x64xf32>
    %543 = vector.broadcast %542 : vector<1x64xf32> to vector<16x64xf32>
    %544 = arith.addf %540, %543 : vector<16x64xf32>
    %cst_264 = arith.constant 0.000000e+00 : f32
    %545 = vector.broadcast %cst_264 : f32 to vector<16x64xf32>
    %546 = arith.maximumf %544, %545 : vector<16x64xf32>
    %c4_265 = arith.constant 4 : index
    %c0_266 = arith.constant 0 : index
    %c0_267 = arith.constant 0 : index
    %547 = vector.load %arg9[%c4_265, %c0_266, %c0_267] : memref<5x64x32xf32, #tpu.memory_space<vmem>>, vector<1x64x32xf32>
    %548 = vector.shape_cast %547 : vector<1x64x32xf32> to vector<64x32xf32>
    %cst_268 = arith.constant dense<0.000000e+00> : vector<16x32xf32>
    %549 = tpu.matmul %546, %548, %cst_268 {dimension_numbers = #tpu.dot_dimension_numbers<[1], [0], [0], [1], [0, 0, 1, 1], [], []>} : vector<16x64xf32>, vector<64x32xf32>, vector<16x32xf32> -> vector<16x32xf32>
    %c4_269 = arith.constant 4 : index
    %c0_270 = arith.constant 0 : index
    %c0_271 = arith.constant 0 : index
    %550 = vector.load %arg10[%c4_269, %c0_270, %c0_271] : memref<5x1x32xf32, #tpu.memory_space<vmem>>, vector<1x1x32xf32>
    %551 = vector.shape_cast %550 : vector<1x1x32xf32> to vector<1x32xf32>
    %552 = vector.broadcast %551 : vector<1x32xf32> to vector<16x32xf32>
    %553 = arith.addf %549, %552 : vector<16x32xf32>
    %554 = arith.addf %537, %553 : vector<16x32xf32>
    %c4_272 = arith.constant 4 : index
    %c0_273 = arith.constant 0 : index
    %c0_274 = arith.constant 0 : index
    %555 = vector.load %arg13[%c4_272, %c0_273, %c0_274] : memref<5x1x32xf32, #tpu.memory_space<vmem>>, vector<1x1x32xf32>
    %556 = vector.shape_cast %555 : vector<1x1x32xf32> to vector<1x32xf32>
    %c4_275 = arith.constant 4 : index
    %c0_276 = arith.constant 0 : index
    %c0_277 = arith.constant 0 : index
    %557 = vector.load %arg14[%c4_275, %c0_276, %c0_277] : memref<5x1x32xf32, #tpu.memory_space<vmem>>, vector<1x1x32xf32>
    %558 = vector.shape_cast %557 : vector<1x1x32xf32> to vector<1x32xf32>
    %cst_278 = arith.constant dense<0.000000e+00> : vector<16xf32>
    %559 = vector.multi_reduction <add>, %554, %cst_278 [1] : vector<16x32xf32> to vector<16xf32>
    %560 = vector.shape_cast %559 : vector<16xf32> to vector<16x1xf32>
    %cst_279 = arith.constant 3.200000e+01 : f32
    %561 = vector.broadcast %cst_279 : f32 to vector<16x1xf32>
    %562 = arith.divf %560, %561 : vector<16x1xf32>
    %563 = vector.broadcast %562 : vector<16x1xf32> to vector<16x32xf32>
    %564 = arith.subf %554, %563 : vector<16x32xf32>
    %565 = vector.broadcast %562 : vector<16x1xf32> to vector<16x32xf32>
    %566 = arith.subf %554, %565 : vector<16x32xf32>
    %567 = arith.mulf %564, %566 : vector<16x32xf32>
    %cst_280 = arith.constant dense<0.000000e+00> : vector<16xf32>
    %568 = vector.multi_reduction <add>, %567, %cst_280 [1] : vector<16x32xf32> to vector<16xf32>
    %569 = vector.shape_cast %568 : vector<16xf32> to vector<16x1xf32>
    %cst_281 = arith.constant 3.200000e+01 : f32
    %570 = vector.broadcast %cst_281 : f32 to vector<16x1xf32>
    %571 = arith.divf %569, %570 : vector<16x1xf32>
    %572 = vector.broadcast %562 : vector<16x1xf32> to vector<16x32xf32>
    %573 = arith.subf %554, %572 : vector<16x32xf32>
    %cst_282 = arith.constant 9.99999974E-6 : f32
    %574 = vector.broadcast %cst_282 : f32 to vector<16x1xf32>
    %575 = arith.addf %571, %574 : vector<16x1xf32>
    %576 = math.rsqrt %575 : vector<16x1xf32>
    %577 = vector.broadcast %576 : vector<16x1xf32> to vector<16x32xf32>
    %578 = arith.mulf %573, %577 : vector<16x32xf32>
    %579 = vector.broadcast %556 : vector<1x32xf32> to vector<16x32xf32>
    %580 = arith.mulf %578, %579 : vector<16x32xf32>
    %581 = vector.broadcast %558 : vector<1x32xf32> to vector<16x32xf32>
    %582 = arith.addf %580, %581 : vector<16x32xf32>
    %c0_283 = arith.constant 0 : index
    %c0_284 = arith.constant 0 : index
    %583 = vector.load %arg15[%c0_283, %c0_284] : memref<32x64xf32, #tpu.memory_space<vmem>>, vector<32x64xf32>
    %cst_285 = arith.constant dense<0.000000e+00> : vector<16x64xf32>
    %584 = tpu.matmul %582, %583, %cst_285 {dimension_numbers = #tpu.dot_dimension_numbers<[1], [0], [0], [1], [0, 0, 1, 1], [], []>} : vector<16x32xf32>, vector<32x64xf32>, vector<16x64xf32> -> vector<16x64xf32>
    %c0_286 = arith.constant 0 : index
    %c0_287 = arith.constant 0 : index
    %585 = vector.load %arg16[%c0_286, %c0_287] : memref<1x64xf32, #tpu.memory_space<vmem>>, vector<1x64xf32>
    %586 = vector.broadcast %585 : vector<1x64xf32> to vector<16x64xf32>
    %587 = arith.addf %584, %586 : vector<16x64xf32>
    %cst_288 = arith.constant 0.000000e+00 : f32
    %588 = vector.broadcast %cst_288 : f32 to vector<16x64xf32>
    %589 = arith.maximumf %587, %588 : vector<16x64xf32>
    %c0_289 = arith.constant 0 : index
    %c0_290 = arith.constant 0 : index
    %590 = vector.load %arg17[%c0_289, %c0_290] : memref<64x8xf32, #tpu.memory_space<vmem>>, vector<64x8xf32>
    %cst_291 = arith.constant dense<0.000000e+00> : vector<16x8xf32>
    %591 = tpu.matmul %589, %590, %cst_291 {dimension_numbers = #tpu.dot_dimension_numbers<[1], [0], [0], [1], [0, 0, 1, 1], [], []>} : vector<16x64xf32>, vector<64x8xf32>, vector<16x8xf32> -> vector<16x8xf32>
    %c0_292 = arith.constant 0 : index
    %c0_293 = arith.constant 0 : index
    %592 = vector.load %arg18[%c0_292, %c0_293] : memref<1x8xf32, #tpu.memory_space<vmem>>, vector<1x8xf32>
    %593 = vector.broadcast %592 : vector<1x8xf32> to vector<16x8xf32>
    %594 = arith.addf %591, %593 : vector<16x8xf32>
    %c0_294 = arith.constant 0 : index
    %c0_295 = arith.constant 0 : index
    %c0_296 = arith.constant 0 : index
    %595 = vector.load %arg19[%c0_294, %c0_295, %c0_296] : memref<1x16x8xf32, #tpu.memory_space<vmem>>, vector<1x16x8xf32>
    %596 = vector.shape_cast %595 : vector<1x16x8xf32> to vector<16x8xf32>
    %597 = vector.shape_cast %594 : vector<16x8xf32> to vector<1x16x8xf32>
    tpu.vector_store %arg19[%c0_294, %c0_295, %c0_296], %597 {strides = array<i32>} : memref<1x16x8xf32, #tpu.memory_space<vmem>>, vector<1x16x8xf32>,
    return
  }
  func.func @transform_0(%arg0: i32) -> (i32, i32, i32) {
    %c0_i32 = arith.constant 0 : i32
    %c0_i32_0 = arith.constant 0 : i32
    %c0_i32_1 = arith.constant 0 : i32
    return %arg0, %c0_i32, %c0_i32_0 : i32, i32, i32
  }
  func.func @transform_1(%arg0: i32) -> (i32, i32) {
    %c0_i32 = arith.constant 0 : i32
    %c0_i32_0 = arith.constant 0 : i32
    %c0_i32_1 = arith.constant 0 : i32
    return %c0_i32, %c0_i32_0 : i32, i32
  }
  func.func @transform_2(%arg0: i32) -> (i32, i32, i32) {
    %c0_i32 = arith.constant 0 : i32
    %c0_i32_0 = arith.constant 0 : i32
    %c0_i32_1 = arith.constant 0 : i32
    %c0_i32_2 = arith.constant 0 : i32
    return %c0_i32, %c0_i32_0, %c0_i32_1 : i32, i32, i32
  }
  func.func @transform_3(%arg0: i32) -> (i32, i32, i32) {
    %c0_i32 = arith.constant 0 : i32
    %c0_i32_0 = arith.constant 0 : i32
    %c0_i32_1 = arith.constant 0 : i32
    %c0_i32_2 = arith.constant 0 : i32
    return %c0_i32, %c0_i32_0, %c0_i32_1 : i32, i32, i32
  }
  func.func @transform_4(%arg0: i32) -> (i32, i32, i32) {
    %c0_i32 = arith.constant 0 : i32
    %c0_i32_0 = arith.constant 0 : i32
    %c0_i32_1 = arith.constant 0 : i32
    %c0_i32_2 = arith.constant 0 : i32
    return %c0_i32, %c0_i32_0, %c0_i32_1 : i32, i32, i32
  }
  func.func @transform_5(%arg0: i32) -> (i32, i32, i32) {
    %c0_i32 = arith.constant 0 : i32
    %c0_i32_0 = arith.constant 0 : i32
    %c0_i32_1 = arith.constant 0 : i32
    %c0_i32_2 = arith.constant 0 : i32
    return %c0_i32, %c0_i32_0, %c0_i32_1 : i32, i32, i32
  }
  func.func @transform_6(%arg0: i32) -> (i32, i32, i32) {
    %c0_i32 = arith.constant 0 : i32
    %c0_i32_0 = arith.constant 0 : i32
    %c0_i32_1 = arith.constant 0 : i32
    %c0_i32_2 = arith.constant 0 : i32
    return %c0_i32, %c0_i32_0, %c0_i32_1 : i32, i32, i32
  }
  func.func @transform_7(%arg0: i32) -> (i32, i32, i32) {
    %c0_i32 = arith.constant 0 : i32
    %c0_i32_0 = arith.constant 0 : i32
    %c0_i32_1 = arith.constant 0 : i32
    %c0_i32_2 = arith.constant 0 : i32
    return %c0_i32, %c0_i32_0, %c0_i32_1 : i32, i32, i32
  }
  func.func @transform_8(%arg0: i32) -> (i32, i32, i32) {
    %c0_i32 = arith.constant 0 : i32
    %c0_i32_0 = arith.constant 0 : i32
    %c0_i32_1 = arith.constant 0 : i32
    %c0_i32_2 = arith.constant 0 : i32
    return %c0_i32, %c0_i32_0, %c0_i32_1 : i32, i32, i32
  }
  func.func @transform_9(%arg0: i32) -> (i32, i32, i32) {
    %c0_i32 = arith.constant 0 : i32
    %c0_i32_0 = arith.constant 0 : i32
    %c0_i32_1 = arith.constant 0 : i32
    %c0_i32_2 = arith.constant 0 : i32
    return %c0_i32, %c0_i32_0, %c0_i32_1 : i32, i32, i32
  }
  func.func @transform_10(%arg0: i32) -> (i32, i32, i32) {
    %c0_i32 = arith.constant 0 : i32
    %c0_i32_0 = arith.constant 0 : i32
    %c0_i32_1 = arith.constant 0 : i32
    %c0_i32_2 = arith.constant 0 : i32
    return %c0_i32, %c0_i32_0, %c0_i32_1 : i32, i32, i32
  }
  func.func @transform_11(%arg0: i32) -> (i32, i32, i32) {
    %c0_i32 = arith.constant 0 : i32
    %c0_i32_0 = arith.constant 0 : i32
    %c0_i32_1 = arith.constant 0 : i32
    %c0_i32_2 = arith.constant 0 : i32
    return %c0_i32, %c0_i32_0, %c0_i32_1 : i32, i32, i32
  }
  func.func @transform_12(%arg0: i32) -> (i32, i32, i32) {
    %c0_i32 = arith.constant 0 : i32
    %c0_i32_0 = arith.constant 0 : i32
    %c0_i32_1 = arith.constant 0 : i32
    %c0_i32_2 = arith.constant 0 : i32
    return %c0_i32, %c0_i32_0, %c0_i32_1 : i32, i32, i32
  }
  func.func @transform_13(%arg0: i32) -> (i32, i32, i32) {
    %c0_i32 = arith.constant 0 : i32
    %c0_i32_0 = arith.constant 0 : i32
    %c0_i32_1 = arith.constant 0 : i32
    %c0_i32_2 = arith.constant 0 : i32
    return %c0_i32, %c0_i32_0, %c0_i32_1 : i32, i32, i32
  }
  func.func @transform_14(%arg0: i32) -> (i32, i32) {
    %c0_i32 = arith.constant 0 : i32
    %c0_i32_0 = arith.constant 0 : i32
    %c0_i32_1 = arith.constant 0 : i32
    return %c0_i32, %c0_i32_0 : i32, i32
  }
  func.func @transform_15(%arg0: i32) -> (i32, i32) {
    %c0_i32 = arith.constant 0 : i32
    %c0_i32_0 = arith.constant 0 : i32
    %c0_i32_1 = arith.constant 0 : i32
    return %c0_i32, %c0_i32_0 : i32, i32
  }
  func.func @transform_16(%arg0: i32) -> (i32, i32) {
    %c0_i32 = arith.constant 0 : i32
    %c0_i32_0 = arith.constant 0 : i32
    %c0_i32_1 = arith.constant 0 : i32
    return %c0_i32, %c0_i32_0 : i32, i32
  }
  func.func @transform_17(%arg0: i32) -> (i32, i32) {
    %c0_i32 = arith.constant 0 : i32
    %c0_i32_0 = arith.constant 0 : i32
    %c0_i32_1 = arith.constant 0 : i32
    return %c0_i32, %c0_i32_0 : i32, i32
  }
  func.func @transform_18(%arg0: i32) -> (i32, i32, i32) {
    %c0_i32 = arith.constant 0 : i32
    %c0_i32_0 = arith.constant 0 : i32
    %c0_i32_1 = arith.constant 0 : i32
    return %arg0, %c0_i32, %c0_i32_0 : i32, i32, i32
  }
  func.func @transform_19(%arg0: i32) -> (i32, i32, i32) {
    %c0_i32 = arith.constant 0 : i32
    %c0_i32_0 = arith.constant 0 : i32
    %c0_i32_1 = arith.constant 0 : i32
    return %arg0, %c0_i32, %c0_i32_0 : i32, i32, i32
  }
}

</mosaic_0001>

<bundles_post_ra>
// kernel: tpu_custom_call.1
= control target key start
LH: loop header
LB: loop body
LE: loop exit
PB: predicated region body
PF: predicated region fallthrough
CT: control target
= control target key end

     0   :  { %s8770_s0 = inlined_call_operand.vmem [shape: f32[2,16,32], index: 0, kind: input, shape index: {}]   ;;  %s8771_s1 = inlined_call_operand.vmem [shape: f32[64,32], index: 1, kind: input, shape index: {}]   ;;  %s8772_s2 = inlined_call_operand.vmem [shape: f32[5,32,96], index: 2, kind: input, shape index: {}]   ;;  %s8773_s3 = inlined_call_operand.hbm [shape: f32[5,1,96], index: 3, kind: input, shape index: {}]   ;;  %s8774_s4 = inlined_call_operand.vmem [shape: f32[5,32,32], index: 4, kind: input, shape index: {}]   ;;  %s8775_s5 = inlined_call_operand.hbm [shape: f32[5,1,32], index: 5, kind: input, shape index: {}]   ;;  %s8776_s6 = inlined_call_operand.vmem [shape: f32[5,32,64], index: 6, kind: input, shape index: {}]   ;;  %s8777_s7 = inlined_call_operand.hbm [shape: f32[5,1,64], index: 7, kind: input, shape index: {}]   ;;  %s8778_s8 = inlined_call_operand.vmem [shape: f32[5,64,32], index: 8, kind: input, shape index: {}]   ;;  %s8779_s9 = inlined_call_operand.hbm [shape: f32[5,1,32], index: 9, kind: input, shape index: {}]   ;;  %s8780_s10 = inlined_call_operand.vmem [shape: f32[5,1,32], index: 10, kind: input, shape index: {}]   ;;  %s8781_s11 = inlined_call_operand.hbm [shape: f32[5,1,32], index: 11, kind: input, shape index: {}]   ;;  %s8782_s12 = inlined_call_operand.vmem [shape: f32[5,1,32], index: 12, kind: input, shape index: {}]   ;;  %s8783_s13 = inlined_call_operand.hbm [shape: f32[5,1,32], index: 13, kind: input, shape index: {}]   ;;  %s8784_s14 = inlined_call_operand.hbm [shape: f32[32,64], index: 14, kind: input, shape index: {}]   ;;  %s8785_s15 = inlined_call_operand.vmem [shape: f32[1,64], index: 15, kind: input, shape index: {}]   ;;  %s8786_s16 = inlined_call_operand.vmem [shape: f32[64,8], index: 16, kind: input, shape index: {}]   ;;  %s8787_s17 = inlined_call_operand.vmem [shape: f32[1,8], index: 17, kind: input, shape index: {}]   ;;  %s8788_s18 = inlined_call_operand.vmem [shape: f32[2,16,8], index: 18, kind: output, shape index: {0}]   ;;  %s8789_s19 = inlined_call_operand.hbm [shape: f32[2,16,32], index: 19, kind: output, shape index: {1}]  }
   0x1   :  { %8805 = sst [smem:[#allocation27_spill]] %s8770_s0 }
   0x2   :  { %8806 = sst [smem:[#allocation28_spill]] %s8771_s1 }
   0x3   :  { %8807 = sst [smem:[#allocation29_spill]] %s8772_s2 }
   0x4   :  { %8808 = sst [smem:[#allocation30_spill]] %s8773_s3 }
   0x5   :  { %8809 = sst [smem:[#allocation31_spill]] %s8775_s5 }
   0x6   :  { %8810 = sst [smem:[#allocation32_spill]] %s8779_s9 }
   0x7   :  { %8811 = sst [smem:[#allocation33_spill]] %s8785_s15 }
   0x8   :  { %8812 = sst [smem:[#allocation34_spill]] %s8787_s17 }
   0x9   :  { %8813 = sst [smem:[#allocation35_spill]] %s8788_s18 }
   0xa   :  { %8814 = sst [smem:[#allocation36_spill]] %s8789_s19 }
   0xb   :  { %25 = vsyncpa [#allocation3], 0 }
   0xc   :  { %26 = vsyncpa [#allocation6], 0 }
   0xd   :  { %27 = vsyncpa [#allocation9], 0 }
   0xe   :  { %28 = vsyncpa [#allocation12], 0 }
   0xf   :  { %29 = vsyncpa [#allocation4], 0 }
  0x10   :  { %31 = vsyncpa [#allocation4 + $0x1], 0  ;;  %s7524_s0 = smov 0   ;;  %s7526_s30 = smov 0  }
  0x11   :  { %s7528_s20 = smov 0   ;;  %s7530_s21 = smov 0  }
  0x12 LB: > { %8815 = sst [smem:[#allocation20_spill]] %s7392_s0  ;;  %s7545_s1 = sadd.s32 4294967295, %s7404_s21   ;;  %s7404_s21 = sphi %s7530_s21, %s8854_s21   ;;  %s7400_s20 = sphi %s7528_s20, %s8856_s20   ;;  %s7396_s30 = sphi %s7526_s30, %s8858_s30   ;;  %s7392_s0 = sphi %s7524_s0, %s8857_s0  }
  0x13   : > { %8816 = sst [smem:[#allocation21_spill]] %s7400_s20  ;;  %s5469_s22 = sadd.s32 4294967294, %s7404_s21  }
  0x14   : > { %8817 = sst [smem:[#allocation22_spill]] %s7404_s21  ;;  %s7549_s2 = sadd.s32 1, %s7404_s21  }
  0x15   : > { %8818 = sst [smem:[#allocation23_spill]] %s7549_s2  ;;  %s453_s23 = sadd.s32 1, %s7400_s20 }
  0x16   : > { %s450_s24 = ssub.s32 %s7404_s21, %s7549_s2  ;;  %p463_p0 = scmp.ne.s32.totalorder %s7400_s20, %s7396_s30 }
  0x17   : > { %p451_p1 = scmp.eq.s32.totalorder %s450_s24, 0  ;;  %p464_p2 = scmp.eq.s32.totalorder %s7545_s1, 1 }
  0x18   : > { %p469_p3 = scmp.ne.s32.totalorder %s7396_s30, %s7392_s0  ;;  %p470_p4 = scmp.eq.s32.totalorder %s5469_s22, 1 }
  0x19   : > { %s7560_s25 = scalar_select %p451_p1, %s7400_s20, %s453_s23  }
  0x1a   : > { %p7562_p5 = por %p464_p2, %p463_p0  ;;  %p7566_p6 = por %p470_p4, %p469_p3 }
  0x1b   : > { %8819 = sst [smem:[#allocation24_spill]] %s7560_s25  ;;  %p5470_p7 = scmp.ge.s32.totalorder %s7404_s21, 1 }
  0x1c   : > { %s8820_s3 = scalar_select %p7562_p5, 1, 0 }
  0x1d   : > { %s8822_s26 = scalar_select %p7566_p6, 1, 0 }
  0x1e   : > { %8821 = sst [smem:[#allocation25_spill]] %s8820_s3  ;;  %p477_p8 = scmp.lt.s32.totalorder %s7404_s21, 3 }
  0x1f   : > { %8823 = sst [smem:[#allocation26_spill]] %s8822_s26  ;;  %p8799_p9 = scmp.eq.s32.totalorder %s7545_s1, 0 }
  0x20   : > { %p7573_p10 = pnand %p5470_p7, %p477_p8  ;;  %s7406_s28 = smov [#allocation5]  }
  0x21   : > { %s511_s29 = sshll.u32 %s7406_s28, 4  ;;  %s7407_s23 = smov [#allocation8]   ;;  %s7579_s29 = int_to_ptr.vmem [resolvable:$true] %s511_s29 }
  0x22   : > { %s8824_s27 = scalar_select %p7573_p10, 1, 0 }
  0x23   : > { %p6774_p11 = pneg %p7573_p10  ;;  %s543_s24 = sshll.u32 %s7407_s23, 4  ;;  %s7587_s24 = int_to_ptr.vmem [resolvable:$true] %s543_s24 }
  0x24   : > { %s7408_s25 = smov [#allocation11]   ;;  %s8826_s5 = sld [smem:[#allocation31_spill]] }
  0x25   : > { %p7583_p12 = pnand %p8799_p9, %p6774_p11  ;;  %s7589_s20 = sshll.u32 %s7408_s25, 4  ;;  %s576_s20 = int_to_ptr.vmem [resolvable:$true] %s7589_s20 }
  0x27   : > { %p7599_p0 = pneg %p7583_p12 }
  0x2a   : > { %s7130_s0 = scalar_lea.hbm %s8826_s5, 80 }
  0x2b   : > { %p7131_p13 = scmp.ne.s32.totalorder %s8826_s5, %s7130_s0  ;;  %p7137_p3 = scmp.lt.u32.totalorder %s7130_s0, %s8826_s5 }
  0x2d   : > { %p7133_p1 = pnand %p7599_p0, %p7131_p13 }
  0x2f   : > { %p7134_p2 = pneg %p7133_p1 }
  0x31   : > { %p7139_p4 = pnand %p7137_p3, %p7134_p2 }
  0x33   : > { %7142 = shalt.err (!%p7139_p4)
}
  0x34   : > { %s7143_s21 = scalar_lea.vmem %s7579_s29, 80  ;;  %s7150_s2 = scalar_lea.vmem %s7579_s29, 96 }
  0x35   : > { %p7144_p7 = scmp.ne.s32.totalorder %s7579_s29, %s7143_s21  ;;  %p7151_p13 = scmp.lt.s32.totalorder %s7579_s29, %s7579_s29 }
  0x36   : > { %p7152_p1 = scmp.lt.s32.totalorder %s7150_s2, %s7143_s21 }
  0x37   : > { %p7146_p8 = pnand %p7144_p7, %p7599_p0 }
  0x38   : > { %p7153_p9 = por %p7152_p1, %p7151_p13 }
  0x39   : > { %p7147_p11 = pneg %p7146_p8 }
  0x3b   : > { %p7154_p6 = pnand %p7153_p9, %p7147_p11 }
  0x3d   : > { %7157 = shalt.err (!%p7154_p6)
}
  0x3e   : > { %s7409_s0 = smov 16   ;;  %s7410_s26 = smov 1  }
  0x3f   : > { %6780 = dma.hbm_to_vmem [thread:$0]  (!%p7583_p12), %s8826_s5, 80, %s7579_s29, [#allocation6], %s7409_s0, %s7409_s0, %s7410_s26  }
  0x40   : > { %s8828_s9 = sld [smem:[#allocation32_spill]] }
  0x46   : > { %s7158_s21 = scalar_lea.hbm %s8828_s9, 80 }
  0x47   : > { %p7159_p6 = scmp.ne.s32.totalorder %s8828_s9, %s7158_s21  ;;  %p7165_p3 = scmp.lt.u32.totalorder %s7158_s21, %s8828_s9 }
  0x49   : > { %p7161_p9 = pnand %p7159_p6, %p7599_p0 }
  0x4b   : > { %p7162_p2 = pneg %p7161_p9 }
  0x4d   : > { %p7167_p4 = pnand %p7165_p3, %p7162_p2 }
  0x4f   : > { %7170 = shalt.err (!%p7167_p4)
}
  0x50   : > { %s7171_s17 = scalar_lea.vmem %s7587_s24, 80  ;;  %s7178_s19 = scalar_lea.vmem %s7587_s24, 96 }
  0x51   : > { %p7172_p7 = scmp.ne.s32.totalorder %s7587_s24, %s7171_s17  ;;  %p7179_p13 = scmp.lt.s32.totalorder %s7587_s24, %s7587_s24 }
  0x52   : > { %p7180_p1 = scmp.lt.s32.totalorder %s7178_s19, %s7171_s17 }
  0x53   : > { %p7174_p8 = pnand %p7172_p7, %p7599_p0 }
  0x54   : > { %p7181_p6 = por %p7180_p1, %p7179_p13 }
  0x55   : > { %p7175_p11 = pneg %p7174_p8 }
  0x57   : > { %p7182_p9 = pnand %p7181_p6, %p7175_p11 }
  0x59   : > { %7185 = shalt.err (!%p7182_p9)
}
  0x5a   : > { %6786 = dma.hbm_to_vmem [thread:$0]  (!%p7583_p12), %s8828_s9, 80, %s7587_s24, [#allocation9], %s7409_s0, %s7409_s0, %s7410_s26  }
  0x5b   : > { %s7186_s23 = scalar_lea.hbm %s8783_s13, 80 }
  0x5c   : > { %p7187_p2 = scmp.ne.s32.totalorder %s8783_s13, %s7186_s23  ;;  %p7193_p7 = scmp.lt.u32.totalorder %s7186_s23, %s8783_s13 }
  0x5e   : > { %p7189_p3 = pnand %p7187_p2, %p7599_p0 }
  0x60   : > { %p7190_p4 = pneg %p7189_p3 }
  0x62   : > { %p7195_p8 = pnand %p7193_p7, %p7190_p4 }
  0x64   : > { %7198 = shalt.err (!%p7195_p8)
}
  0x65   : > { %s7199_s19 = scalar_lea.vmem %s576_s20, 80  ;;  %s7206_s24 = scalar_lea.vmem %s576_s20, 96 }
  0x66   : > { %p7200_p11 = scmp.ne.s32.totalorder %s576_s20, %s7199_s19  ;;  %p7207_p6 = scmp.lt.s32.totalorder %s576_s20, %s576_s20 }
  0x67   : > { %p7208_p9 = scmp.lt.s32.totalorder %s7206_s24, %s7199_s19 }
  0x68   : > { %p7202_p13 = pnand %p7200_p11, %p7599_p0 }
  0x69   : > { %p7209_p5 = por %p7208_p9, %p7207_p6 }
  0x6a   : > { %p7203_p1 = pneg %p7202_p13 }
  0x6c   : > { %p7210_p10 = pnand %p7209_p5, %p7203_p1 }
  0x6e   : > { %7213 = shalt.err (!%p7210_p10)
}
  0x6f   : > { %6792 = dma.hbm_to_vmem [thread:$0]  (!%p7583_p12), %s8783_s13, 80, %s576_s20, [#allocation12], %s7409_s0, %s7409_s0, %s7410_s26  }
  0x70   : > { %s7411_s29 = smov [#allocation2]   ;;  %s7412_s23 = smov [#allocation7]  }
  0x71   : > { %s495_s28 = sshll.u32 %s7411_s29, 4  ;;  %s527_s25 = sshll.u32 %s7412_s23, 4  ;;  %s496_s28 = int_to_ptr.vmem [resolvable:$true] %s495_s28  ;;  %s528_s25 = int_to_ptr.vmem [resolvable:$true] %s527_s25 }
  0x72   : > { %s8829_s17 = sld [smem:[#allocation30_spill]] }
  0x78   : > { %s7214_s19 = scalar_lea.hbm %s8829_s17, 80 }
  0x79   : > { %p7215_p5 = scmp.ne.s32.totalorder %s8829_s17, %s7214_s19  ;;  %p7221_p3 = scmp.lt.u32.totalorder %s7214_s19, %s8829_s17 }
  0x7b   : > { %p7217_p10 = pnand %p7215_p5, %p7599_p0 }
  0x7d   : > { %p7218_p2 = pneg %p7217_p10 }
  0x7f   : > { %p7223_p4 = pnand %p7221_p3, %p7218_p2 }
  0x81   : > { %7226 = shalt.err (!%p7223_p4)
}
  0x82   : > { %s7227_s20 = scalar_lea.vmem %s496_s28, 80  ;;  %s7234_s3 = scalar_lea.vmem %s496_s28, 96 }
  0x83   : > { %p7228_p7 = scmp.ne.s32.totalorder %s496_s28, %s7227_s20  ;;  %p7235_p13 = scmp.lt.s32.totalorder %s496_s28, %s496_s28 }
  0x84   : > { %p7236_p1 = scmp.lt.s32.totalorder %s7234_s3, %s7227_s20 }
  0x85   : > { %p7230_p8 = pnand %p7228_p7, %p7599_p0 }
  0x86   : > { %p7237_p6 = por %p7236_p1, %p7235_p13 }
  0x87   : > { %p7231_p11 = pneg %p7230_p8 }
  0x89   : > { %p7238_p9 = pnand %p7237_p6, %p7231_p11 }
  0x8b   : > { %7241 = shalt.err (!%p7238_p9)
}
  0x8c   : > { %6777 = dma.hbm_to_vmem [thread:$0]  (!%p7583_p12), %s8829_s17, 80, %s496_s28, [#allocation3], %s7409_s0, %s7409_s0, %s7410_s26  }
  0x8d   : > { %s7242_s21 = scalar_lea.hbm %s8777_s7, 80 }
  0x8e   : > { %p7243_p5 = scmp.ne.s32.totalorder %s8777_s7, %s7242_s21  ;;  %p7249_p3 = scmp.lt.u32.totalorder %s7242_s21, %s8777_s7 }
  0x90   : > { %p7245_p10 = pnand %p7243_p5, %p7599_p0 }
  0x92   : > { %p7246_p2 = pneg %p7245_p10 }
  0x94   : > { %p7251_p4 = pnand %p7249_p3, %p7246_p2 }
  0x96   : > { %7254 = shalt.err (!%p7251_p4)
}
  0x97   : > { %s7255_s20 = scalar_lea.vmem %s528_s25, 80  ;;  %s7262_s28 = scalar_lea.vmem %s528_s25, 96 }
  0x98   : > { %p7256_p7 = scmp.ne.s32.totalorder %s528_s25, %s7255_s20  ;;  %p7263_p13 = scmp.lt.s32.totalorder %s528_s25, %s528_s25 }
  0x99   : > { %p7264_p1 = scmp.lt.s32.totalorder %s7262_s28, %s7255_s20 }
  0x9a   : > { %p7258_p8 = pnand %p7256_p7, %p7599_p0 }
  0x9b   : > { %p7265_p6 = por %p7264_p1, %p7263_p13 }
  0x9c   : > { %p7259_p11 = pneg %p7258_p8 }
  0x9e   : > { %p7266_p9 = pnand %p7265_p6, %p7259_p11 }
  0xa0   : > { %7269 = shalt.err (!%p7266_p9)
}
  0xa1   : > { %6783 = dma.hbm_to_vmem [thread:$0]  (!%p7583_p12), %s8777_s7, 80, %s528_s25, [#allocation6], %s7409_s0, %s7409_s0, %s7410_s26  }
  0xa2   : > { %s7413_s9 = smov [#allocation10]   ;;  %s7414_s23 = smov [#allocation13]  }
  0xa3   : > { %s559_s29 = sshll.u32 %s7413_s9, 4  ;;  %s588_s21 = sshll.u32 %s7414_s23, 4  ;;  %s560_s29 = int_to_ptr.vmem [resolvable:$true] %s559_s29  ;;  %s589_s21 = int_to_ptr.vmem [resolvable:$true] %s588_s21 }
  0xa4   : > { %s7270_s24 = scalar_lea.hbm %s8781_s11, 80 }
  0xa5   : > { %p7271_p5 = scmp.ne.s32.totalorder %s8781_s11, %s7270_s24  ;;  %p7277_p3 = scmp.lt.u32.totalorder %s7270_s24, %s8781_s11 }
  0xa7   : > { %p7273_p10 = pnand %p7271_p5, %p7599_p0 }
  0xa9   : > { %p7274_p2 = pneg %p7273_p10 }
  0xab   : > { %p7279_p4 = pnand %p7277_p3, %p7274_p2 }
  0xad   : > { %7282 = shalt.err (!%p7279_p4)
}
  0xae   : > { %s7283_s25 = scalar_lea.vmem %s560_s29, 80  ;;  %s7290_s5 = scalar_lea.vmem %s560_s29, 96 }
  0xaf   : > { %p7284_p7 = scmp.ne.s32.totalorder %s560_s29, %s7283_s25  ;;  %p7291_p13 = scmp.lt.s32.totalorder %s560_s29, %s560_s29 }
  0xb0   : > { %p7292_p1 = scmp.lt.s32.totalorder %s7290_s5, %s7283_s25 }
  0xb1   : > { %p7286_p8 = pnand %p7284_p7, %p7599_p0 }
  0xb2   : > { %p7293_p6 = por %p7292_p1, %p7291_p13 }
  0xb3   : > { %p7287_p11 = pneg %p7286_p8 }
  0xb5   : > { %p7294_p9 = pnand %p7293_p6, %p7287_p11 }
  0xb7   : > { %7297 = shalt.err (!%p7294_p9)
}
  0xb8   : > { %6789 = dma.hbm_to_vmem [thread:$0]  (!%p7583_p12), %s8781_s11, 80, %s560_s29, [#allocation9], %s7409_s0, %s7409_s0, %s7410_s26  }
  0xb9   : > { %s7298_s24 = scalar_lea.hbm %s8784_s14, 512 }
  0xba   : > { %p7299_p5 = scmp.ne.s32.totalorder %s8784_s14, %s7298_s24  ;;  %p7305_p3 = scmp.lt.u32.totalorder %s7298_s24, %s8784_s14 }
  0xbc   : > { %p7301_p10 = pnand %p7299_p5, %p7599_p0 }
  0xbe   : > { %p7302_p2 = pneg %p7301_p10 }
  0xc0   : > { %p7307_p4 = pnand %p7305_p3, %p7302_p2 }
  0xc2   : > { %7310 = shalt.err (!%p7307_p4)
}
  0xc3   : > { %s7311_s25 = scalar_lea.vmem %s589_s21, 512  ;;  %p7319_p13 = scmp.lt.s32.totalorder %s589_s21, %s589_s21 }
  0xc4   : > { %p7312_p7 = scmp.ne.s32.totalorder %s589_s21, %s7311_s25  ;;  %p7320_p1 = scmp.lt.s32.totalorder %s7311_s25, %s7311_s25 }
  0xc6   : > { %p7314_p8 = pnand %p7312_p7, %p7599_p0  ;;  %p7321_p6 = por %p7320_p1, %p7319_p13 }
  0xc8   : > { %p7315_p11 = pneg %p7314_p8 }
  0xca   : > { %p7322_p9 = pnand %p7321_p6, %p7315_p11 }
  0xcc   : > { %7325 = shalt.err (!%p7322_p9)
}
  0xcd   : > { %s7415_s0 = smov 128   ;;  %s7416_s26 = smov 8  }
  0xce   : > { %6795 = dma.hbm_to_vmem [thread:$0]  (!%p7583_p12), %s8784_s14, 512, %s589_s21, [#allocation12], %s7415_s0, %s7415_s0, %s7416_s26  }
  0xcf   : > { %p8830_p5 = scmp.ne.s32.totalorder %s8824_s27, 0 }
  0xd0   : > { %p8831_p10 = scmp.eq.s32.totalorder (!%p8830_p5), %s7545_s1, 0 }
  0xd1   : > { %621 = sbr.rel (%p8830_p5) target bundleno = 13052 (0x32fc), region = 92 }
  0xd8   : > { %7371 = dma.done.wait (%p8831_p10), [#allocation3], 80   ;;  %p8832_p0 = pmov %p8831_p10 }
  0xda   : > { %7373 = vsyncadd (%p8832_p0), [#allocation3], 4294967216  ;;  %p8833_p2 = pmov %p8832_p0 }
  0xdb   : > { %p8834_p3 = pmov %p8832_p0 }
  0xdc   : > { %7375 = dma.done.wait (%p8833_p2), [#allocation6], 160  }
  0xdd   : > { %7377 = vsyncadd (%p8834_p3), [#allocation6], 4294967136  ;;  %p8835_p4 = pmov %p8832_p0 }
  0xde   : > { %p8836_p12 = pmov %p8832_p0 }
  0xdf   : > { %7379 = dma.done.wait (%p8835_p4), [#allocation9], 160  }
  0xe0   : > { %7381 = vsyncadd (%p8836_p12), [#allocation9], 4294967136  ;;  %p8837_p7 = pmov %p8832_p0 }
  0xe1   : > { %p8838_p8 = pmov %p8832_p0 }
  0xe2   : > { %7383 = dma.done.wait (%p8837_p7), [#allocation12], 592  }
  0xe3   : > { %7385 = vsyncadd (%p8838_p8), [#allocation12], 4294966704  ;;  %p706_p11 = scmp.lt.s32.totalorder %s7545_s1, 1  ;;  %s8839_s9 = sld [smem:[#allocation27_spill]]  ;;  %vm718_vm0 = vcmask 1047808   ;;  %v731_v16 = vlaneseq  ;;  %vm746_vm2 = vcmask 261120  }
  0xe4   : > { %s7417_s2 = smov 32   ;;  %s8840_s15 = sld [smem:[#allocation29_spill]]  ;;  %v5492_v24 = vld [vmem:[#allocation2] ss:$0 sm:$0xff]  ;;  %vm7830_vm3 = vmpackc.low %vm746_vm2, %vm746_vm2  ;;  %vm1004_vm4 = vcmask 130048   ;;  %vm1490_vm5 = vcmask 523264  }
  0xe5   : > { %s7774_s18 = scalar_select %p706_p11, %s7545_s1, 1  ;;  %v732_v17 = vand.u32 127, %v731_v16 }
  0xe6   : > { %s7418_s29 = smov 97   ;;  %s703_s5 = sand.u32 1, %s7396_s30  }
  0xe7   : > { %s5761_s27 = sshll.u32 %s7774_s18, 4  ;;  %s5487_s22 = sshll.u32 %s703_s5, 4  ;;  %vm733_vm1 = vcmp.eq.s32.totalorder %v732_v17, 0 }
  0xe8   : > { %s7803_s21 = scalar_lea.vmem [#allocation14], %s5487_s22  ;;  %s7419_s19 = smov 96  }
  0xe9   : > { %s710_s23 = scalar_lea.vmem %s8839_s9, %s5761_s27  ;;  %s7420_s3 = smov 64  }
  0xea   : > { %v716_v0 = vld [vmem:[%s710_s23] sm:$0xff]  ;;  %v717_v1 = vld [vmem:[%s710_s23 + $0x8] sm:$0xff]  ;;  %v759_v9 = vld [vmem:[%s8840_s15 + $0x10] sm:$0xff]  ;;  %s8844_s0 = sld [smem:[#allocation33_spill]]  ;;  %s8845_s26 = sld [smem:[#allocation25_spill]] }
  0xeb   : > { %719 = vrot.lane.b32.xlu0 %v716_v0, %s7417_s2  ;;  %v757_v2 = vld [vmem:[%s8840_s15] sm:$0xff]  ;;  %v758_v3 = vld [vmem:[%s8840_s15 + $0x8] sm:$0xff]  ;;  %v760_v10 = vld [vmem:[%s8840_s15 + $0x18] sm:$0xff]  ;;  %s5763_s22 = sshll.u32 %s7545_s1, 8  ;;  %s8721_s24 = scalar_lea.sflag [#allocation4], %s703_s5 }
  0xec   : > { %v6470_v4 = vpack.c.bf16 %v758_v3, %v757_v2  ;;  %v6474_v11 = vpack.c.bf16 %v760_v10, %v759_v9 }
  0xee   : > { %6471 = vmatprep.subr.bf16.mxu1 %v6470_v4 }
  0xef   : > { %722 = vrot.lane.b32.xlu0 %v717_v1, %s7417_s2  ;;  %6473 = vmatpush3.bf16.msra.mxu1 %v6470_v4 }
  0xf0   : > { %6475 = vmatprep.subr.bf16.mxu1 %v6474_v11  ;;  %p8847_p1 = scmp.ne.s32.totalorder %s8845_s26, 0 }
  0xf3   : > { %6477 = vmatpush3.bf16.msra.mxu1 %v6474_v11 }
 0x15d   : > { %v720_v5 = vpop.permute.xlu0 %719 }
 0x15e   : > { %v721_v6 = vsel %vm718_vm0, %v720_v5, %v716_v0 }
 0x15f   : > { %725 = vrot.lane.b32.xlu1 %v721_v6, %s7417_s2 }
 0x161   : > { %v723_v7 = vpop.permute.xlu0 %722 }
 0x162   : > { %v724_v8 = vsel %vm718_vm0, %v723_v7, %v717_v1 }
 0x163   : > { %727 = vrot.lane.b32.xlu1 %v724_v8, %s7417_s2  ;;  %s8841_s2 = sld [smem:[#allocation28_spill]] }
 0x169   : > { %v7820_v28 = vld [vmem:[%s8841_s2] sm:$0xff]  ;;  %v7841_v37 = vld [vmem:[%s8841_s2 + $0x8] sm:$0xff]  ;;  %v7846_v38 = vld [vmem:[%s8841_s2 + $0x10] sm:$0xff] }
 0x16a   : > { %v7853_v41 = vld [vmem:[%s8841_s2 + $0x18] sm:$0xff]  ;;  %v7859_v42 = vld [vmem:[%s8841_s2 + $0x20] sm:$0xff]  ;;  %v7867_v45 = vld [vmem:[%s8841_s2 + $0x28] sm:$0xff] }
 0x16b   : > { %v7873_v46 = vld [vmem:[%s8841_s2 + $0x30] sm:$0xff]  ;;  %v7881_v49 = vld [vmem:[%s8841_s2 + $0x38] sm:$0xff] }
 0x16c   : > { %v8539_v35 = vld [vmem:[%s8841_s2 + $0x18] sm:$0xff] }
 0x1d1   : > { %v726_v12 = vpop.permute.xlu1 %725 }
 0x1d2   : > { %v729_v13 = vsel %vm718_vm0, %v726_v12, %v716_v0 }
 0x1d3   : > { %736 = vrot.lane.b32.xlu0 %v729_v13, %s7418_s29 }
 0x1d5   : > { %v728_v14 = vpop.permute.xlu1 %727 }
 0x1d6   : > { %v730_v15 = vsel %vm718_vm0, %v728_v14, %v717_v1 }
 0x1d7   : > { %738 = vrot.lane.b32.xlu1 %v730_v15, %s7418_s29  ;;  %s5313_s29 = sshll.u32 %s7803_s21, 4  ;;  %s8711_s29 = int_to_ptr.vmem [resolvable:$true] %s5313_s29 }
 0x1d8   : > { %s7326_s20 = scalar_lea.vmem %s8711_s29, 256 }
 0x1d9   : > { %p7327_p13 = scmp.ne.s32.totalorder %s8711_s29, %s7326_s20 }
 0x1db   : > { %p7328_p6 = pnand %p7327_p13, %p8847_p1 }
 0x1dd   : > { %p7329_p9 = pneg %p7328_p6 }
 0x245   : > { %v737_v18 = vpop.permute.xlu0 %736 }
 0x246   : > { %v742_v19 = vsub.f32 %v716_v0, %v737_v18 }
 0x248   : > { %v7801_v20 = vsel %vm733_vm1, 0.0, %v742_v19 }
 0x249   : > { %v739_v21 = vpop.permute.xlu1 %738  ;;  %747 = vst.msk [vmem:[%s7803_s21] sm:$0xff] %vm746_vm2, %v7801_v20  ;;  %6028 = vmatprep.mubr.msk.f32.mxu1 %vm746_vm2, %v7801_v20 }
 0x24a   : > { %v743_v22 = vsub.f32 %v717_v1, %v739_v21 }
 0x24c   : > { %v7810_v23 = vsel %vm733_vm1, 0.0, %v743_v22 }
 0x24d   : > { %748 = vst.msk [vmem:[%s7803_s21 + $0x8] sm:$0xff] %vm746_vm2, %v7810_v23  ;;  %6029 = vmatmul.mubr.msk.f32.vlgmr.msra.gmra.mrb[0].mxu1 %vm746_vm2, %v7810_v23  ;;  %s7421_s21 = smov [#allocation14]  }
 0x24e   : > { %s7330_s28 = sshll.u32 %s7421_s21, 4  ;;  %s7331_s28 = int_to_ptr.vmem [resolvable:$false] %s7330_s28 }
 0x24f   : > { %s7332_s25 = scalar_lea.vmem %s7331_s28, 512  ;;  %p7333_p5 = scmp.lt.s32.totalorder %s8711_s29, %s7331_s28 }
 0x250   : > { %p7334_p10 = scmp.lt.s32.totalorder %s7332_s25, %s7326_s20 }
 0x252   : > { %p7335_p0 = por %p7334_p10, %p7333_p5 }
 0x254   : > { %p7336_p2 = pnand %p7335_p0, %p7329_p9 }
 0x320   : > { %v6030_v25 = vpop.f32.mrb[0].mxu1 }
 0x321   : > { %v846_v26 = vadd.f32 %v6030_v25, %v5492_v24  ;;  %v840_v27 = vpop.f32.mrb[1].mxu1 }
 0x322   : > { %v841_v29 = vadd.f32 %v5492_v24, %v840_v27 }
 0x323   : > { %v850_v39 = vmul.f32 %v846_v26, %v7841_v37  ;;  %v852_v43 = vmul.f32 %v846_v26, %v7853_v41  ;;  %v854_v47 = vmul.f32 %v846_v26, %v7867_v45  ;;  %v856_v50 = vmul.f32 %v846_v26, %v7881_v49 }
 0x324   : > { %v7822_v30 = vpack.i.bf16 %v846_v26, %v841_v29  ;;  %v849_v31 = vmul.f32 %v841_v29, %v7820_v28  ;;  %v851_v40 = vmul.f32 %v841_v29, %v7846_v38  ;;  %v853_v44 = vmul.f32 %v841_v29, %v7859_v42 }
 0x325   : > { %v855_v48 = vmul.f32 %v841_v29, %v7873_v46 }
 0x326   : > { %6865 = vrot.lane.b32.xlu0 %v7822_v30, %s7419_s19  ;;  %6035 = vmatprep.mubr.msk.f32.mxu1 %vm746_vm2, %v849_v31 }
 0x398   : > { %v6866_v32 = vpop.permute.xlu0 %6865 }
 0x399   : > { %v6868_v33 = vunpack.i.h.bf16 %v6866_v32  ;;  %v6867_v34 = vunpack.i.l.bf16 %v6866_v32 }
 0x39b   : > { %v6478_v36 = vpack.c.bf16 %v6868_v33, %v6867_v34 }
 0x39d   : > { %6480 = vmatprep.subr.msk.bf16.mxu1 %vm7830_vm3, %v6478_v36 }
 0x39e   : > { %6483 = vmatpush3.bf16.xpose.msk.msra.mxu1 %vm7830_vm3, %v6478_v36 }
 0x3a5   : > { %6036 = vmatmul.mubr.msk.f32.vlgmr.msra.gmra.mrb[2].mxu1 %vm746_vm2, %v850_v39 }
 0x3a6   : > { %6038 = vmatprep.mubr.msk.f32.mxu1 %vm746_vm2, %v851_v40 }
 0x3a9   : > { %6039 = vmatmul.mubr.msk.f32.gmra.mrb[4].mxu1 %vm746_vm2, %v852_v43 }
 0x3aa   : > { %6041 = vmatprep.mubr.msk.f32.mxu1 %vm746_vm2, %v853_v44 }
 0x3ad   : > { %6042 = vmatmul.mubr.msk.f32.gmra.mrb[6].mxu1 %vm746_vm2, %v854_v47 }
 0x3ae   : > { %6044 = vmatprep.mubr.msk.f32.mxu1 %vm746_vm2, %v855_v48 }
 0x3b1   : > { %6045 = vmatmul.mubr.msk.f32.gmra.mrb[8].mxu1 %vm746_vm2, %v856_v50 }
 0x478   : > { %v6037_v51 = vpop.f32.mrb[2].mxu1 }
 0x479   : > { %v997_v52 = vmul.f32 0.35355338, %v6037_v51  ;;  %v957_v53 = vpop.f32.mrb[3].mxu1 }
 0x47a   : > { %v996_v54 = vmul.f32 0.35355338, %v957_v53 }
 0x47b   : > { %v1008_v55 = vsel %vm1004_vm4, %v997_v52, -inf }
 0x47c   : > { %1009 = vmax.xlane.f32.xlu0 %v1008_v55  ;;  %v6040_v56 = vpop.f32.mrb[4].mxu1  ;;  %v1005_v57 = vsel %vm1004_vm4, %v996_v54, -inf }
 0x47d   : > { %v999_v58 = vmul.f32 0.35355338, %v6040_v56  ;;  %1006 = vmax.xlane.f32.xlu1 %v1005_v57  ;;  %v967_v59 = vpop.f32.mrb[5].mxu1 }
 0x47e   : > { %v998_v60 = vmul.f32 0.35355338, %v967_v59 }
 0x47f   : > { %v1014_v61 = vsel %vm1004_vm4, %v999_v58, -inf }
 0x480   : > { %v6043_v62 = vpop.f32.mrb[6].mxu1  ;;  %v1011_v63 = vsel %vm1004_vm4, %v998_v60, -inf }
 0x481   : > { %v1001_v0 = vmul.f32 0.35355338, %v6043_v62  ;;  %1015 = vmax.xlane.f32.xlu1 %v1014_v61  ;;  %1012 = vmax.xlane.f32.xlu0 %v1011_v63  ;;  %v977_v1 = vpop.f32.mrb[7].mxu1 }
 0x482   : > { %v1000_v2 = vmul.f32 0.35355338, %v977_v1 }
 0x483   : > { %v1020_v3 = vsel %vm1004_vm4, %v1001_v0, -inf }
 0x484   : > { %v6046_v4 = vpop.f32.mrb[8].mxu1  ;;  %v1017_v5 = vsel %vm1004_vm4, %v1000_v2, -inf }
 0x485   : > { %v1003_v6 = vmul.f32 0.35355338, %v6046_v4  ;;  %1021 = vmax.xlane.f32.xlu1 %v1020_v3  ;;  %1018 = vmax.xlane.f32.xlu0 %v1017_v5  ;;  %v987_v7 = vpop.f32.mrb[9].mxu1 }
 0x486   : > { %v1002_v8 = vmul.f32 0.35355338, %v987_v7 }
 0x487   : > { %v1026_v9 = vsel %vm1004_vm4, %v1003_v6, -inf }
 0x488   : > { %v1023_v10 = vsel %vm1004_vm4, %v1002_v8, -inf }
 0x489   : > { %1027 = vmax.xlane.f32.xlu1 %v1026_v9  ;;  %1024 = vmax.xlane.f32.xlu0 %v1023_v10 }
 0x509   : > { %v1010_v11 = vpop.xlane.xlu0 %1009 }
 0x50a   : > { %v1030_v12 = vsub.f32 %v997_v52, %v1010_v11  ;;  %v1007_v13 = vpop.xlane.xlu1 %1006 }
 0x50b   : > { %v1029_v14 = vsub.f32 %v996_v54, %v1007_v13 }
 0x50c   : > { %v1039_v15 = vmul.f32 1.442695, %v1030_v12 }
 0x50d   : > { %v1037_v16 = vmul.f32 1.442695, %v1029_v14 }
 0x50e   : > { %6914 = vpow2.f32 %v1039_v15  ;;  %v1016_v17 = vpop.xlane.xlu1 %1015  ;;  %v1013_v18 = vpop.xlane.xlu0 %1012 }
 0x50f   : > { %6916 = vpow2.f32 %v1037_v16  ;;  %v1032_v19 = vsub.f32 %v999_v58, %v1016_v17  ;;  %v1031_v21 = vsub.f32 %v998_v60, %v1013_v18 }
 0x511   : > { %v1043_v22 = vmul.f32 1.442695, %v1032_v19  ;;  %v1041_v24 = vmul.f32 1.442695, %v1031_v21 }
 0x512   : > { %v1022_v25 = vpop.xlane.xlu1 %1021  ;;  %v1019_v26 = vpop.xlane.xlu0 %1018 }
 0x513   : > { %6918 = vpow2.f32 %v1043_v22  ;;  %v1034_v27 = vsub.f32 %v1001_v0, %v1022_v25  ;;  %v1033_v29 = vsub.f32 %v1000_v2, %v1019_v26 }
 0x514   : > { %6920 = vpow2.f32 %v1041_v24 }
 0x515   : > { %v1047_v31 = vmul.f32 1.442695, %v1034_v27  ;;  %v1045_v32 = vmul.f32 1.442695, %v1033_v29  ;;  %v1242_v29 = vld [vmem:[%s8774_s4] sm:$0xff] }
 0x516   : > { %v1028_v33 = vpop.xlane.xlu1 %1027  ;;  %v1025_v34 = vpop.xlane.xlu0 %1024 }
 0x517   : > { %6922 = vpow2.f32 %v1047_v31  ;;  %v1036_v36 = vsub.f32 %v1003_v6, %v1028_v33  ;;  %v1035_v39 = vsub.f32 %v1002_v8, %v1025_v34  ;;  %v1243_v31 = vld [vmem:[%s8774_s4 + $0x8] sm:$0xff]  ;;  %v1244_v33 = vld [vmem:[%s8774_s4 + $0x10] sm:$0xff]  ;;  %v1245_v34 = vld [vmem:[%s8774_s4 + $0x18] sm:$0xff] }
 0x518   : > { %v6915_v40 = vpop.eup %6914  ;;  %6924 = vpow2.f32 %v1045_v32  ;;  %v6488_v32 = vpack.c.bf16 %v1243_v31, %v1242_v29  ;;  %v1477_v29 = vld [vmem:[%s8778_s8 + $0x10] sm:$0xff] }
 0x519   : > { %v6917_v43 = vpop.eup %6916  ;;  %v1051_v44 = vmul.f32 1.442695, %v1036_v36  ;;  %v1049_v47 = vmul.f32 1.442695, %v1035_v39  ;;  %v1056_v48 = vsel %vm1004_vm4, %v6915_v40, 0.0  ;;  %v6492_v36 = vpack.c.bf16 %v1245_v34, %v1244_v33  ;;  %v1479_v34 = vld [vmem:[%s8778_s8 + $0x20] sm:$0xff] }
 0x51a   : > { %1057 = vadd.xlane.f32.xlu1 %v1056_v48  ;;  %v1053_v50 = vsel %vm1004_vm4, %v6917_v43, 0.0  ;;  %6489 = vmatprep.subr.bf16.mxu1 %v6488_v32 }
 0x51b   : > { %6926 = vpow2.f32 %v1051_v44  ;;  %1054 = vadd.xlane.f32.xlu0 %v1053_v50  ;;  %6491 = vmatpush3.bf16.msra.mxu1 %v6488_v32  ;;  %v1478_v32 = vld [vmem:[%s8778_s8 + $0x18] sm:$0xff] }
 0x51c   : > { %6928 = vpow2.f32 %v1049_v47  ;;  %6493 = vmatprep.subr.bf16.mxu1 %v6492_v36  ;;  %v6508_v33 = vpack.c.bf16 %v1478_v32, %v1477_v29 }
 0x51d   : > { %v6919_v51 = vpop.eup %6918 }
 0x51e   : > { %v6921_v52 = vpop.eup %6920  ;;  %v1062_v53 = vsel %vm1004_vm4, %v6919_v51, 0.0 }
 0x51f   : > { %1063 = vadd.xlane.f32.xlu1 %v1062_v53  ;;  %v1059_v54 = vsel %vm1004_vm4, %v6921_v52, 0.0  ;;  %6495 = vmatpush3.bf16.msra.mxu1 %v6492_v36  ;;  %v1480_v36 = vld [vmem:[%s8778_s8 + $0x28] sm:$0xff] }
 0x520   : > { %1060 = vadd.xlane.f32.xlu0 %v1059_v54 }
 0x521   : > { %v6923_v55 = vpop.eup %6922 }
 0x522   : > { %v6925_v56 = vpop.eup %6924  ;;  %v1068_v57 = vsel %vm1004_vm4, %v6923_v55, 0.0 }
 0x523   : > { %1069 = vadd.xlane.f32.xlu1 %v1068_v57  ;;  %v1065_v58 = vsel %vm1004_vm4, %v6925_v56, 0.0 }
 0x524   : > { %1066 = vadd.xlane.f32.xlu0 %v1065_v58 }
 0x525   : > { %v6927_v59 = vpop.eup %6926 }
 0x526   : > { %v6929_v60 = vpop.eup %6928  ;;  %v1074_v61 = vsel %vm1004_vm4, %v6927_v59, 0.0 }
 0x527   : > { %1075 = vadd.xlane.f32.xlu1 %v1074_v61  ;;  %v1071_v62 = vsel %vm1004_vm4, %v6929_v60, 0.0 }
 0x528   : > { %1072 = vadd.xlane.f32.xlu0 %v1071_v62 }
 0x53e   : > { %6870 = vrot.lane.b32.xlu0 %v7822_v30, %s7420_s3 }
 0x5a7   : > { %v1058_v0 = vpop.xlane.xlu1 %1057 }
 0x5a8   : > { %v1055_v63 = vpop.xlane.xlu0 %1054 }
 0x5a9   : > { %6930 = vrcp.f32 %v1055_v63 }
 0x5aa   : > { %6932 = vrcp.f32 %v1058_v0 }
 0x5ac   : > { %v1064_v2 = vpop.xlane.xlu1 %1063 }
 0x5ad   : > { %v1061_v1 = vpop.xlane.xlu0 %1060 }
 0x5ae   : > { %6934 = vrcp.f32 %v1061_v1 }
 0x5af   : > { %6936 = vrcp.f32 %v1064_v2  ;;  %v5513_v2 = vld [vmem:[#allocation5] ss:$0 sm:$0xff] }
 0x5b0   : > { %v1070_v7 = vpop.xlane.xlu1 %1069 }
 0x5b1   : > { %v1067_v3 = vpop.xlane.xlu0 %1066 }
 0x5b2   : > { %6938 = vrcp.f32 %v1067_v3 }
 0x5b3   : > { %v6931_v4 = vpop.eup %6930  ;;  %6940 = vrcp.f32 %v1070_v7 }
 0x5b4   : > { %v1078_v5 = vmul.f32 %v6931_v4, %v6917_v43  ;;  %v1076_v30 = vpop.xlane.xlu1 %1075  ;;  %v6933_v12 = vpop.eup %6932 }
 0x5b5   : > { %v1073_v6 = vpop.xlane.xlu0 %1072  ;;  %v1080_v14 = vmul.f32 %v6933_v12, %v6915_v40 }
 0x5b6   : > { %6051 = vmatprep.mubr.msk.f32.mxu0 %vm1004_vm4, %v1078_v5  ;;  %6942 = vrcp.f32 %v1073_v6 }
 0x5b7   : > { %6944 = vrcp.f32 %v1076_v30 }
 0x5b8   : > { %v6935_v13 = vpop.eup %6934 }
 0x5b9   : > { %v6871_v8 = vpop.permute.xlu0 %6870  ;;  %v6937_v15 = vpop.eup %6936  ;;  %v1082_v16 = vmul.f32 %v6935_v13, %v6921_v52 }
 0x5ba   : > { %v6873_v9 = vunpack.i.h.bf16 %v6871_v8  ;;  %v6872_v10 = vunpack.i.l.bf16 %v6871_v8  ;;  %v1084_v18 = vmul.f32 %v6937_v15, %v6919_v51 }
 0x5bc   : > { %v6484_v11 = vpack.c.bf16 %v6873_v9, %v6872_v10  ;;  %v6939_v17 = vpop.eup %6938 }
 0x5bd   : > { %v6941_v19 = vpop.eup %6940  ;;  %v1086_v21 = vmul.f32 %v6939_v17, %v6925_v56 }
 0x5be   : > { %6485 = vmatprep.subr.bf16.mxu0 %v6484_v11  ;;  %v1088_v24 = vmul.f32 %v6941_v19, %v6923_v55  ;;  %v1382_v19 = vld [vmem:[%s8776_s6 + $0x8] sm:$0xff] }
 0x5bf   : > { %6487 = vmatpush3.bf16.msra.mxu0 %v6484_v11 }
 0x5c0   : > { %v6943_v22 = vpop.eup %6942 }
 0x5c1   : > { %v6945_v25 = vpop.eup %6944  ;;  %v1090_v26 = vmul.f32 %v6943_v22, %v6929_v60 }
 0x5c2   : > { %6052 = vmatmul.mubr.msk.f32.vlgmr.msra.gmra.mrb[0].mxu0 %vm1004_vm4, %v1080_v14  ;;  %v1092_v27 = vmul.f32 %v6945_v25, %v6927_v59 }
 0x5c3   : > { %6054 = vmatprep.mubr.msk.f32.mxu0 %vm1004_vm4, %v1082_v16 }
 0x5c6   : > { %6055 = vmatmul.mubr.msk.f32.gmra.mrb[2].mxu0 %vm1004_vm4, %v1084_v18 }
 0x5c7   : > { %6057 = vmatprep.mubr.msk.f32.mxu0 %vm1004_vm4, %v1086_v21  ;;  %v1383_v21 = vld [vmem:[%s8776_s6 + $0x10] sm:$0xff] }
 0x5ca   : > { %6058 = vmatmul.mubr.msk.f32.gmra.mrb[4].mxu0 %vm1004_vm4, %v1088_v24  ;;  %v1384_v24 = vld [vmem:[%s8776_s6 + $0x18] sm:$0xff] }
 0x5cb   : > { %6060 = vmatprep.mubr.msk.f32.mxu0 %vm1004_vm4, %v1090_v26  ;;  %v6500_v25 = vpack.c.bf16 %v1384_v24, %v1383_v21  ;;  %v1475_v26 = vld [vmem:[%s8778_s8] sm:$0xff] }
 0x5ce   : > { %6061 = vmatmul.mubr.msk.f32.gmra.mrb[6].mxu0 %vm1004_vm4, %v1092_v27  ;;  %v1476_v27 = vld [vmem:[%s8778_s8 + $0x8] sm:$0xff] }
 0x5cf   : > { %v6504_v31 = vpack.c.bf16 %v1476_v27, %v1475_v26  ;;  %v5527_v26 = vld [vmem:[%s8840_s15 + $0x28] sm:$0xff]  ;;  %v5528_v27 = vld [vmem:[%s8840_s15 + $0x30] sm:$0xff] }
 0x5d1   : > { %6505 = vmatprep.subr.bf16.mxu1 %v6504_v31 }
 0x695   : > { %v6053_v39 = vpop.f32.mrb[0].mxu0 }
 0x696   : > { %v1189_v40 = vpop.f32.mrb[1].mxu0  ;;  %v1229_v44 = vmul.f32 %v6053_v39, %v7841_v37  ;;  %v6512_v39 = vpack.c.bf16 %v1480_v36, %v1479_v34 }
 0x697   : > { %v1228_v50 = vmul.f32 %v1189_v40, %v7820_v28 }
 0x699   : > { %v6056_v43 = vpop.f32.mrb[2].mxu0 }
 0x69a   : > { %v1231_v47 = vmul.f32 %v6056_v43, %v7853_v41  ;;  %v1199_v48 = vpop.f32.mrb[3].mxu0 }
 0x69b   : > { %v1230_v51 = vmul.f32 %v1199_v48, %v7846_v38 }
 0x69c   : > { %v1237_v52 = vadd.f32 %v1231_v47, %v1229_v44 }
 0x69d   : > { %v1236_v53 = vadd.f32 %v1230_v51, %v1228_v50  ;;  %v6059_v54 = vpop.f32.mrb[4].mxu0 }
 0x69e   : > { %v1233_v55 = vmul.f32 %v6059_v54, %v7867_v45  ;;  %v1209_v56 = vpop.f32.mrb[5].mxu0  ;;  %v5517_v54 = vld [vmem:[#allocation10] ss:$0 sm:$0xff] }
 0x69f   : > { %v1232_v57 = vmul.f32 %v1209_v56, %v7859_v42 }
 0x6a0   : > { %v1239_v58 = vadd.f32 %v1237_v52, %v1233_v55  ;;  %v5516_v52 = vld [vmem:[%s8780_s10] ss:$0 sm:$0xff] }
 0x6a1   : > { %v1238_v59 = vadd.f32 %v1236_v53, %v1232_v57  ;;  %v6062_v60 = vpop.f32.mrb[6].mxu0 }
 0x6a2   : > { %v1235_v61 = vmul.f32 %v6062_v60, %v7881_v49  ;;  %v1219_v62 = vpop.f32.mrb[7].mxu0 }
 0x6a3   : > { %v1234_v63 = vmul.f32 %v1219_v62, %v7873_v46  ;;  %v1482_v62 = vld [vmem:[%s8778_s8 + $0x38] sm:$0xff] }
 0x6a4   : > { %v1241_v0 = vadd.f32 %v1239_v58, %v1235_v61  ;;  %v1481_v61 = vld [vmem:[%s8778_s8 + $0x30] sm:$0xff] }
 0x6a5   : > { %v1240_v1 = vadd.f32 %v1238_v59, %v1234_v63  ;;  %v6516_v63 = vpack.c.bf16 %v1482_v62, %v1481_v61 }
 0x6a7   : > { %6071 = vmatprep.mubr.msk.f32.mxu1 %vm746_vm2, %v1240_v1 }
 0x6a8   : > { %6072 = vmatmul.mubr.msk.f32.vlgmr.msra.gmra.mrb[10].mxu1 %vm746_vm2, %v1241_v0  ;;  %v5518_v0 = vld [vmem:[#allocation7] ss:$0 sm:$0xff] }
 0x6a9   : > { %6507 = vmatpush3.bf16.msra.mxu1 %v6504_v31  ;;  %v5529_v31 = vld [vmem:[%s8840_s15 + $0x38] sm:$0xff] }
 0x6aa   : > { %6509 = vmatprep.subr.bf16.mxu1 %v6508_v33  ;;  %v6524_v32 = vpack.c.bf16 %v5529_v31, %v5528_v27 }
 0x6ad   : > { %6511 = vmatpush3.bf16.msra.mxu1 %v6508_v33 }
 0x6ae   : > { %6513 = vmatprep.subr.bf16.mxu1 %v6512_v39 }
 0x6b1   : > { %6515 = vmatpush3.bf16.msra.mxu1 %v6512_v39 }
 0x6b2   : > { %6517 = vmatprep.subr.bf16.mxu1 %v6516_v63 }
 0x6b5   : > { %6519 = vmatpush3.bf16.msra.mxu1 %v6516_v63 }
 0x77b   : > { %v6073_v3 = vpop.f32.mrb[10].mxu1 }
 0x77c   : > { %v1325_v4 = vpop.f32.mrb[11].mxu1  ;;  %v1331_v5 = vadd.f32 %v6073_v3, %v5513_v2 }
 0x77d   : > { %v1326_v6 = vadd.f32 %v5513_v2, %v1325_v4 }
 0x77e   : > { %v1335_v9 = vadd.f32 %v1331_v5, %v7810_v23  ;;  %v1381_v23 = vld [vmem:[%s8776_s6] sm:$0xff] }
 0x77f   : > { %v1334_v7 = vadd.f32 %v1326_v6, %v7801_v20  ;;  %v6496_v22 = vpack.c.bf16 %v1382_v19, %v1381_v23 }
 0x780   : > { %v1341_v10 = vsel %vm746_vm2, %v1335_v9, 0.0 }
 0x781   : > { %v1338_v8 = vsel %vm746_vm2, %v1334_v7, 0.0  ;;  %6497 = vmatprep.subr.bf16.mxu0 %v6496_v22 }
 0x782   : > { %1339 = vadd.xlane.f32.xlu1 %v1338_v8  ;;  %6499 = vmatpush3.bf16.msra.mxu0 %v6496_v22 }
 0x783   : > { %6501 = vmatprep.subr.bf16.mxu0 %v6500_v25 }
 0x786   : > { %1342 = vadd.xlane.f32.xlu1 %v1341_v10  ;;  %6503 = vmatpush3.bf16.msra.mxu0 %v6500_v25  ;;  %v5526_v25 = vld [vmem:[%s8840_s15 + $0x20] sm:$0xff] }
 0x787   : > { %v6520_v29 = vpack.c.bf16 %v5527_v26, %v5526_v25 }
 0x789   : > { %6521 = vmatprep.subr.bf16.mxu0 %v6520_v29 }
 0x80f   : > { %v1340_v30 = vpop.xlane.xlu1 %1339 }
 0x810   : > { %v1345_v11 = vmul.f32 0.03125, %v1340_v30 }
 0x812   : > { %v1347_v12 = vsub.f32 %v1334_v7, %v1345_v11  ;;  %v5521_v7 = vld [vmem:[#allocation8] ss:$0 sm:$0xff] }
 0x813   : > { %v1343_v13 = vpop.xlane.xlu1 %1342 }
 0x814   : > { %v1346_v14 = vmul.f32 0.03125, %v1343_v13  ;;  %v1349_v15 = vmul.f32 %v1347_v12, %v1347_v12 }
 0x816   : > { %v1348_v16 = vsub.f32 %v1335_v9, %v1346_v14  ;;  %v1351_v17 = vsel %vm746_vm2, %v1349_v15, 0.0 }
 0x817   : > { %1352 = vadd.xlane.f32.xlu1 %v1351_v17 }
 0x818   : > { %v1350_v18 = vmul.f32 %v1348_v16, %v1348_v16 }
 0x81a   : > { %v1354_v20 = vsel %vm746_vm2, %v1350_v18, 0.0 }
 0x81b   : > { %1355 = vadd.xlane.f32.xlu1 %v1354_v20 }
 0x8a4   : > { %v1353_v40 = vpop.xlane.xlu1 %1352 }
 0x8a5   : > { %v1357_v43 = vmul.f32 0.03125, %v1353_v40 }
 0x8a7   : > { %v1359_v44 = vadd.f32 1e-05, %v1357_v43 }
 0x8a8   : > { %v1356_v47 = vpop.xlane.xlu1 %1355 }
 0x8a9   : > { %6946 = vrsqrt.f32 %v1359_v44  ;;  %v1358_v48 = vmul.f32 0.03125, %v1356_v47  ;;  %v5524_v47 = vld [vmem:[%s8782_s12] ss:$0 sm:$0xff] }
 0x8ab   : > { %v1360_v50 = vadd.f32 1e-05, %v1358_v48 }
 0x8ad   : > { %6948 = vrsqrt.f32 %v1360_v50  ;;  %v5525_v50 = vld [vmem:[#allocation11] ss:$0 sm:$0xff] }
 0x8b3   : > { %v6947_v51 = vpop.eup %6946 }
 0x8b4   : > { %v1363_v53 = vmul.f32 %v6947_v51, %v1347_v12 }
 0x8b6   : > { %v1371_v55 = vmul.f32 %v5516_v52, %v1363_v53 }
 0x8b7   : > { %v6949_v56 = vpop.eup %6948 }
 0x8b8   : > { %v1364_v57 = vmul.f32 %v6949_v56, %v1348_v16  ;;  %v1379_v58 = vadd.f32 %v5517_v54, %v1371_v55 }
 0x8ba   : > { %v1372_v59 = vmul.f32 %v5516_v52, %v1364_v57  ;;  %6082 = vmatprep.mubr.msk.f32.mxu0 %vm746_vm2, %v1379_v58  ;;  %v5530_v57 = vld [vmem:[#allocation2 + $0x1] ss:$0 sm:$0xff] }
 0x8bc   : > { %v1380_v60 = vadd.f32 %v5517_v54, %v1372_v59 }
 0x8be   : > { %6083 = vmatmul.mubr.msk.f32.vlgmr.msra.gmra.mrb[8].mxu0 %vm746_vm2, %v1380_v60 }
 0x8bf   : > { %6523 = vmatpush3.bf16.msra.mxu0 %v6520_v29 }
 0x8c0   : > { %6525 = vmatprep.subr.bf16.mxu0 %v6524_v32 }
 0x8c3   : > { %6527 = vmatpush3.bf16.msra.mxu0 %v6524_v32 }
 0x991   : > { %v6084_v1 = vpop.f32.mrb[8].mxu0 }
 0x992   : > { %v1470_v2 = vadd.f32 %v6084_v1, %v5518_v0  ;;  %v1464_v3 = vpop.f32.mrb[9].mxu0 }
 0x993   : > { %v1465_v4 = vadd.f32 %v5518_v0, %v1464_v3 }
 0x994   : > { %v1474_v6 = vmax.f32 %v1470_v2, 0.0 }
 0x995   : > { %v1473_v5 = vmax.f32 %v1465_v4, 0.0 }
 0x997   : > { %6101 = vmatprep.mubr.msk.f32.mxu1 %vm1490_vm5, %v1473_v5 }
 0x998   : > { %6102 = vmatmul.mubr.msk.f32.vlgmr.msra.gmra.mrb[12].mxu1 %vm1490_vm5, %v1474_v6 }
 0xa6b   : > { %v6103_v8 = vpop.f32.mrb[12].mxu1 }
 0xa6c   : > { %v1563_v9 = vpop.f32.mrb[13].mxu1  ;;  %v1569_v10 = vadd.f32 %v6103_v8, %v5521_v7 }
 0xa6d   : > { %v1564_v30 = vadd.f32 %v5521_v7, %v1563_v9 }
 0xa6e   : > { %v1573_v13 = vadd.f32 %v1569_v10, %v1380_v60 }
 0xa6f   : > { %v1572_v11 = vadd.f32 %v1564_v30, %v1379_v58 }
 0xa70   : > { %v1579_v14 = vsel %vm746_vm2, %v1573_v13, 0.0 }
 0xa71   : > { %v1576_v12 = vsel %vm746_vm2, %v1572_v11, 0.0 }
 0xa72   : > { %1577 = vadd.xlane.f32.xlu1 %v1576_v12 }
 0xa76   : > { %1580 = vadd.xlane.f32.xlu1 %v1579_v14 }
 0xaff   : > { %v1578_v15 = vpop.xlane.xlu1 %1577 }
 0xb00   : > { %v1582_v16 = vmul.f32 0.03125, %v1578_v15 }
 0xb02   : > { %v1584_v17 = vsub.f32 %v1572_v11, %v1582_v16 }
 0xb03   : > { %v1581_v18 = vpop.xlane.xlu1 %1580 }
 0xb04   : > { %v1583_v20 = vmul.f32 0.03125, %v1581_v18  ;;  %v1586_v23 = vmul.f32 %v1584_v17, %v1584_v17 }
 0xb06   : > { %v1585_v19 = vsub.f32 %v1573_v13, %v1583_v20  ;;  %v1588_v21 = vsel %vm746_vm2, %v1586_v23, 0.0 }
 0xb07   : > { %1589 = vadd.xlane.f32.xlu0 %v1588_v21 }
 0xb08   : > { %v1587_v22 = vmul.f32 %v1585_v19, %v1585_v19 }
 0xb0a   : > { %v1591_v24 = vsel %vm746_vm2, %v1587_v22, 0.0 }
 0xb0b   : > { %1592 = vadd.xlane.f32.xlu1 %v1591_v24 }
 0xb94   : > { %v1590_v33 = vpop.xlane.xlu0 %1589 }
 0xb95   : > { %v1594_v34 = vmul.f32 0.03125, %v1590_v33 }
 0xb97   : > { %v1596_v36 = vadd.f32 1e-05, %v1594_v34 }
 0xb98   : > { %v1593_v39 = vpop.xlane.xlu1 %1592 }
 0xb99   : > { %6950 = vrsqrt.f32 %v1596_v36  ;;  %v1595_v40 = vmul.f32 0.03125, %v1593_v39 }
 0xb9b   : > { %v1597_v43 = vadd.f32 1e-05, %v1595_v40 }
 0xb9d   : > { %6952 = vrsqrt.f32 %v1597_v43 }
 0xba3   : > { %v6951_v44 = vpop.eup %6950 }
 0xba4   : > { %v1600_v48 = vmul.f32 %v6951_v44, %v1584_v17 }
 0xba6   : > { %v1608_v51 = vmul.f32 %v5524_v47, %v1600_v48 }
 0xba7   : > { %v6953_v52 = vpop.eup %6952 }
 0xba8   : > { %v1601_v53 = vmul.f32 %v6953_v52, %v1585_v19  ;;  %v8003_v54 = vadd.f32 %v5525_v50, %v1608_v51 }
 0xbaa   : > { %v1609_v55 = vmul.f32 %v5524_v47, %v1601_v53  ;;  %6112 = vmatprep.mubr.msk.f32.mxu0 %vm746_vm2, %v8003_v54 }
 0xbac   : > { %v8007_v56 = vadd.f32 %v5525_v50, %v1609_v55 }
 0xbae   : > { %6113 = vmatmul.mubr.msk.f32.vlgmr.msra.gmra.mrb[10].mxu0 %vm746_vm2, %v8007_v56 }
 0xc81   : > { %v6114_v58 = vpop.f32.mrb[10].mxu0 }
 0xc82   : > { %v1709_v59 = vadd.f32 %v6114_v58, %v5530_v57  ;;  %v1703_v60 = vpop.f32.mrb[11].mxu0 }
 0xc83   : > { %v1704_v61 = vadd.f32 %v5530_v57, %v1703_v60 }
 0xc84   : > { %v1713_v4 = vmul.f32 %v1709_v59, %v7841_v37  ;;  %v1717_v7 = vmul.f32 %v1709_v59, %v7867_v45  ;;  %v1719_v9 = vmul.f32 %v1709_v59, %v7881_v49 }
 0xc85   : > { %v8011_v62 = vpack.i.bf16 %v1709_v59, %v1704_v61  ;;  %v1712_v63 = vmul.f32 %v1704_v61, %v7820_v28  ;;  %v1714_v5 = vmul.f32 %v1704_v61, %v7846_v38  ;;  %v1715_v28 = vmul.f32 %v1709_v59, %v7853_v41 }
 0xc86   : > { %v1716_v6 = vmul.f32 %v1704_v61, %v7859_v42  ;;  %v1718_v8 = vmul.f32 %v1704_v61, %v7873_v46 }
 0xc87   : > { %6875 = vrot.lane.b32.xlu1 %v8011_v62, %s7419_s19  ;;  %6119 = vmatprep.mubr.msk.f32.mxu0 %vm746_vm2, %v1712_v63 }
 0xcf9   : > { %v6876_v0 = vpop.permute.xlu1 %6875 }
 0xcfa   : > { %v6878_v1 = vunpack.i.h.bf16 %v6876_v0  ;;  %v6877_v2 = vunpack.i.l.bf16 %v6876_v0 }
 0xcfc   : > { %v6528_v3 = vpack.c.bf16 %v6878_v1, %v6877_v2 }
 0xcfe   : > { %6530 = vmatprep.subr.msk.bf16.mxu0 %vm7830_vm3, %v6528_v3 }
 0xcff   : > { %6533 = vmatpush3.bf16.xpose.msk.msra.mxu0 %vm7830_vm3, %v6528_v3 }
 0xd06   : > { %6120 = vmatmul.mubr.msk.f32.vlgmr.msra.gmra.mrb[12].mxu0 %vm746_vm2, %v1713_v4 }
 0xd07   : > { %6122 = vmatprep.mubr.msk.f32.mxu0 %vm746_vm2, %v1714_v5 }
 0xd0a   : > { %6123 = vmatmul.mubr.msk.f32.gmra.mrb[14].mxu0 %vm746_vm2, %v1715_v28 }
 0xd0b   : > { %6125 = vmatprep.mubr.msk.f32.mxu0 %vm746_vm2, %v1716_v6 }
 0xd0e   : > { %6126 = vmatmul.mubr.msk.f32.gmra.mrb[16].mxu0 %vm746_vm2, %v1717_v7 }
 0xd0f   : > { %6128 = vmatprep.mubr.msk.f32.mxu0 %vm746_vm2, %v1718_v8 }
 0xd12   : > { %6129 = vmatmul.mubr.msk.f32.gmra.mrb[18].mxu0 %vm746_vm2, %v1719_v9 }
 0xdd9   : > { %v6121_v10 = vpop.f32.mrb[12].mxu0 }
 0xdda   : > { %v1860_v30 = vmul.f32 0.35355338, %v6121_v10  ;;  %v1820_v11 = vpop.f32.mrb[13].mxu0 }
 0xddb   : > { %v1859_v12 = vmul.f32 0.35355338, %v1820_v11 }
 0xddc   : > { %v1870_v13 = vsel %vm1004_vm4, %v1860_v30, -inf }
 0xddd   : > { %1871 = vmax.xlane.f32.xlu0 %v1870_v13  ;;  %v6124_v14 = vpop.f32.mrb[14].mxu0  ;;  %v1867_v15 = vsel %vm1004_vm4, %v1859_v12, -inf }
 0xdde   : > { %v1862_v16 = vmul.f32 0.35355338, %v6124_v14  ;;  %1868 = vmax.xlane.f32.xlu1 %v1867_v15  ;;  %v1830_v17 = vpop.f32.mrb[15].mxu0 }
 0xddf   : > { %v1861_v18 = vmul.f32 0.35355338, %v1830_v17 }
 0xde0   : > { %v1876_v20 = vsel %vm1004_vm4, %v1862_v16, -inf }
 0xde1   : > { %1877 = vmax.xlane.f32.xlu0 %v1876_v20  ;;  %v6127_v23 = vpop.f32.mrb[16].mxu0  ;;  %v1873_v22 = vsel %vm1004_vm4, %v1861_v18, -inf }
 0xde2   : > { %v1840_v19 = vpop.f32.mrb[17].mxu0  ;;  %v1864_v21 = vmul.f32 0.35355338, %v6127_v23 }
 0xde3   : > { %v1863_v26 = vmul.f32 0.35355338, %v1840_v19 }
 0xde4   : > { %v1882_v27 = vsel %vm1004_vm4, %v1864_v21, -inf }
 0xde5   : > { %1874 = vmax.xlane.f32.xlu0 %v1873_v22  ;;  %v6130_v24 = vpop.f32.mrb[18].mxu0  ;;  %v1879_v31 = vsel %vm1004_vm4, %v1863_v26, -inf }
 0xde6   : > { %v1850_v25 = vpop.f32.mrb[19].mxu0  ;;  %v1866_v32 = vmul.f32 0.35355338, %v6130_v24 }
 0xde7   : > { %v1865_v29 = vmul.f32 0.35355338, %v1850_v25 }
 0xde8   : > { %v1888_v34 = vsel %vm1004_vm4, %v1866_v32, -inf }
 0xde9   : > { %1883 = vmax.xlane.f32.xlu0 %v1882_v27  ;;  %v1885_v33 = vsel %vm1004_vm4, %v1865_v29, -inf }
 0xded   : > { %1880 = vmax.xlane.f32.xlu0 %v1879_v31 }
 0xdf1   : > { %1886 = vmax.xlane.f32.xlu0 %v1885_v33 }
 0xdf5   : > { %1889 = vmax.xlane.f32.xlu0 %v1888_v34 }
 0xe6a   : > { %v1872_v36 = vpop.xlane.xlu0 %1871 }
 0xe6b   : > { %v1892_v39 = vsub.f32 %v1860_v30, %v1872_v36  ;;  %v1869_v40 = vpop.xlane.xlu1 %1868 }
 0xe6c   : > { %v1891_v43 = vsub.f32 %v1859_v12, %v1869_v40 }
 0xe6d   : > { %v1901_v44 = vmul.f32 1.442695, %v1892_v39 }
 0xe6e   : > { %v1899_v47 = vmul.f32 1.442695, %v1891_v43  ;;  %v1878_v48 = vpop.xlane.xlu0 %1877 }
 0xe6f   : > { %6954 = vpow2.f32 %v1901_v44  ;;  %v1894_v50 = vsub.f32 %v1862_v16, %v1878_v48 }
 0xe70   : > { %6956 = vpow2.f32 %v1899_v47 }
 0xe71   : > { %v1905_v51 = vmul.f32 1.442695, %v1894_v50 }
 0xe72   : > { %v1875_v52 = vpop.xlane.xlu0 %1874 }
 0xe73   : > { %6958 = vpow2.f32 %v1905_v51  ;;  %v1893_v53 = vsub.f32 %v1861_v18, %v1875_v52 }
 0xe75   : > { %v1903_v55 = vmul.f32 1.442695, %v1893_v53 }
 0xe76   : > { %v1884_v57 = vpop.xlane.xlu0 %1883 }
 0xe77   : > { %6960 = vpow2.f32 %v1903_v55  ;;  %v1896_v58 = vsub.f32 %v1864_v21, %v1884_v57 }
 0xe79   : > { %v8043_v59 = vpop.eup %6954  ;;  %v1909_v60 = vmul.f32 1.442695, %v1896_v58 }
 0xe7a   : > { %v6957_v61 = vpop.eup %6956  ;;  %v1881_v63 = vpop.xlane.xlu0 %1880  ;;  %v1918_v0 = vsel %vm1004_vm4, %v8043_v59, 0.0 }
 0xe7b   : > { %6962 = vpow2.f32 %v1909_v60  ;;  %v1895_v1 = vsub.f32 %v1863_v26, %v1881_v63  ;;  %1919 = vadd.xlane.f32.xlu1 %v1918_v0  ;;  %v1915_v2 = vsel %vm1004_vm4, %v6957_v61, 0.0  ;;  %v5552_v60 = vld [vmem:[%s8774_s4 + $0x28] sm:$0xff]  ;;  %v5553_v63 = vld [vmem:[%s8774_s4 + $0x30] sm:$0xff]  ;;  %v5554_v0 = vld [vmem:[%s8774_s4 + $0x38] sm:$0xff] }
 0xe7c   : > { %1916 = vadd.xlane.f32.xlu0 %v1915_v2 }
 0xe7d   : > { %v6959_v3 = vpop.eup %6958  ;;  %v1907_v4 = vmul.f32 1.442695, %v1895_v1  ;;  %v6542_v1 = vpack.c.bf16 %v5554_v0, %v5553_v63 }
 0xe7e   : > { %v1887_v5 = vpop.xlane.xlu0 %1886  ;;  %v1924_v28 = vsel %vm1004_vm4, %v6959_v3, 0.0 }
 0xe7f   : > { %6964 = vpow2.f32 %v1907_v4  ;;  %v1897_v6 = vsub.f32 %v1865_v29, %v1887_v5  ;;  %1925 = vadd.xlane.f32.xlu1 %v1924_v28 }
 0xe81   : > { %v6961_v7 = vpop.eup %6960  ;;  %v1911_v8 = vmul.f32 1.442695, %v1897_v6 }
 0xe82   : > { %v1890_v9 = vpop.xlane.xlu0 %1889  ;;  %v1921_v10 = vsel %vm1004_vm4, %v6961_v7, 0.0 }
 0xe83   : > { %6966 = vpow2.f32 %v1911_v8  ;;  %v1898_v30 = vsub.f32 %v1866_v32, %v1890_v9  ;;  %1922 = vadd.xlane.f32.xlu0 %v1921_v10 }
 0xe85   : > { %v6963_v11 = vpop.eup %6962  ;;  %v1913_v12 = vmul.f32 1.442695, %v1898_v30 }
 0xe86   : > { %v1930_v13 = vsel %vm1004_vm4, %v6963_v11, 0.0 }
 0xe87   : > { %6968 = vpow2.f32 %v1913_v12  ;;  %1931 = vadd.xlane.f32.xlu1 %v1930_v13 }
 0xe89   : > { %v6965_v14 = vpop.eup %6964 }
 0xe8a   : > { %v1927_v15 = vsel %vm1004_vm4, %v6965_v14, 0.0 }
 0xe8b   : > { %1928 = vadd.xlane.f32.xlu0 %v1927_v15 }
 0xe8d   : > { %v6967_v16 = vpop.eup %6966 }
 0xe8e   : > { %v1933_v17 = vsel %vm1004_vm4, %v6967_v16, 0.0 }
 0xe8f   : > { %1934 = vadd.xlane.f32.xlu0 %v1933_v17 }
 0xe91   : > { %v6969_v18 = vpop.eup %6968 }
 0xe92   : > { %v1936_v20 = vsel %vm1004_vm4, %v6969_v18, 0.0 }
 0xe93   : > { %1937 = vadd.xlane.f32.xlu1 %v1936_v20 }
 0xea5   : > { %6880 = vrot.lane.b32.xlu0 %v8011_v62, %s7420_s3 }
 0xf08   : > { %v1920_v22 = vpop.xlane.xlu1 %1919 }
 0xf09   : > { %v1917_v23 = vpop.xlane.xlu0 %1916 }
 0xf0a   : > { %6970 = vrcp.f32 %v1917_v23 }
 0xf0b   : > { %6972 = vrcp.f32 %v1920_v22 }
 0xf0c   : > { %v1926_v26 = vpop.xlane.xlu1 %1925 }
 0xf10   : > { %v1923_v21 = vpop.xlane.xlu0 %1922 }
 0xf11   : > { %6974 = vrcp.f32 %v1923_v21 }
 0xf12   : > { %6976 = vrcp.f32 %v1926_v26 }
 0xf14   : > { %v6971_v19 = vpop.eup %6970  ;;  %v1932_v29 = vpop.xlane.xlu1 %1931 }
 0xf15   : > { %v1940_v24 = vmul.f32 %v6971_v19, %v6957_v61  ;;  %v6973_v36 = vpop.eup %6972 }
 0xf16   : > { %v1942_v40 = vmul.f32 %v6973_v36, %v8043_v59  ;;  %v5551_v59 = vld [vmem:[%s8774_s4 + $0x20] sm:$0xff]  ;;  %v5562_v36 = vld [vmem:[%s8776_s6 + $0x28] sm:$0xff] }
 0xf17   : > { %6135 = vmatprep.mubr.msk.f32.mxu1 %vm1004_vm4, %v1940_v24  ;;  %v6538_v61 = vpack.c.bf16 %v5552_v60, %v5551_v59 }
 0xf18   : > { %v1929_v25 = vpop.xlane.xlu0 %1928 }
 0xf19   : > { %6978 = vrcp.f32 %v1929_v25  ;;  %6539 = vmatprep.subr.bf16.mxu0 %v6538_v61 }
 0xf1a   : > { %6980 = vrcp.f32 %v1932_v29  ;;  %6541 = vmatpush3.bf16.msra.mxu0 %v6538_v61 }
 0xf1b   : > { %v6975_v39 = vpop.eup %6974  ;;  %6543 = vmatprep.subr.bf16.mxu0 %v6542_v1 }
 0xf1c   : > { %v1935_v27 = vpop.xlane.xlu0 %1934  ;;  %v6977_v43 = vpop.eup %6976  ;;  %v1944_v44 = vmul.f32 %v6975_v39, %v6961_v7  ;;  %v8082_v7 = vld [vmem:[%s8841_s2] sm:$0xff] }
 0xf1d   : > { %6982 = vrcp.f32 %v1935_v27  ;;  %v1946_v48 = vmul.f32 %v6977_v43, %v6959_v3  ;;  %v5564_v43 = vld [vmem:[%s8776_s6 + $0x38] sm:$0xff] }
 0xf1e   : > { %6545 = vmatpush3.bf16.msra.mxu0 %v6542_v1 }
 0xf20   : > { %v6881_v31 = vpop.permute.xlu0 %6880  ;;  %v1938_v62 = vpop.xlane.xlu1 %1937 }
 0xf21   : > { %v6883_v32 = vunpack.i.h.bf16 %v6881_v31  ;;  %v6882_v33 = vunpack.i.l.bf16 %v6881_v31  ;;  %6984 = vrcp.f32 %v1938_v62 }
 0xf23   : > { %v6534_v34 = vpack.c.bf16 %v6883_v32, %v6882_v33  ;;  %v6979_v47 = vpop.eup %6978 }
 0xf24   : > { %v6981_v50 = vpop.eup %6980  ;;  %v1948_v51 = vmul.f32 %v6979_v47, %v6965_v14  ;;  %v5568_v47 = vld [vmem:[%s8778_s8 + $0x40] sm:$0xff] }
 0xf25   : > { %6535 = vmatprep.subr.bf16.mxu1 %v6534_v34  ;;  %v1950_v53 = vmul.f32 %v6981_v50, %v6963_v11  ;;  %v5570_v50 = vld [vmem:[%s8778_s8 + $0x50] sm:$0xff] }
 0xf26   : > { %6537 = vmatpush3.bf16.msra.mxu1 %v6534_v34 }
 0xf27   : > { %v6983_v52 = vpop.eup %6982 }
 0xf28   : > { %v1952_v57 = vmul.f32 %v6983_v52, %v6967_v16  ;;  %v5571_v52 = vld [vmem:[%s8778_s8 + $0x58] sm:$0xff] }
 0xf29   : > { %6136 = vmatmul.mubr.msk.f32.vlgmr.msra.gmra.mrb[14].mxu1 %vm1004_vm4, %v1942_v40  ;;  %v5563_v40 = vld [vmem:[%s8776_s6 + $0x30] sm:$0xff] }
 0xf2a   : > { %6138 = vmatprep.mubr.msk.f32.mxu1 %vm1004_vm4, %v1944_v44  ;;  %v6550_v44 = vpack.c.bf16 %v5564_v43, %v5563_v40 }
 0xf2b   : > { %v6985_v55 = vpop.eup %6984 }
 0xf2c   : > { %v1954_v58 = vmul.f32 %v6985_v55, %v6969_v18  ;;  %v5572_v55 = vld [vmem:[%s8778_s8 + $0x60] sm:$0xff] }
 0xf2d   : > { %6139 = vmatmul.mubr.msk.f32.gmra.mrb[16].mxu1 %vm1004_vm4, %v1946_v48  ;;  %v5569_v48 = vld [vmem:[%s8778_s8 + $0x48] sm:$0xff] }
 0xf2e   : > { %6141 = vmatprep.mubr.msk.f32.mxu1 %vm1004_vm4, %v1948_v51  ;;  %v6554_v51 = vpack.c.bf16 %v5569_v48, %v5568_v47 }
 0xf30   : > { %6555 = vmatprep.subr.bf16.mxu0 %v6554_v51 }
 0xf31   : > { %6142 = vmatmul.mubr.msk.f32.gmra.mrb[18].mxu1 %vm1004_vm4, %v1950_v53  ;;  %v6558_v53 = vpack.c.bf16 %v5571_v52, %v5570_v50 }
 0xf32   : > { %6144 = vmatprep.mubr.msk.f32.mxu1 %vm1004_vm4, %v1952_v57  ;;  %v5573_v57 = vld [vmem:[%s8778_s8 + $0x68] sm:$0xff] }
 0xf35   : > { %6145 = vmatmul.mubr.msk.f32.gmra.mrb[20].mxu1 %vm1004_vm4, %v1954_v58  ;;  %v6562_v58 = vpack.c.bf16 %v5573_v57, %v5572_v55  ;;  %v5581_v57 = vld [vmem:[#allocation11 + $0x1] ss:$0 sm:$0xff] }
 0xffc   : > { %v6137_v2 = vpop.f32.mrb[14].mxu1 }
 0xffd   : > { %v2051_v3 = vpop.f32.mrb[15].mxu1  ;;  %v2091_v5 = vmul.f32 %v6137_v2, %v7841_v37 }
 0xffe   : > { %v2090_v8 = vmul.f32 %v8082_v7, %v2051_v3  ;;  %v5559_v3 = vld [vmem:[%s8780_s10 + $0x1] ss:$0 sm:$0xff] }
0x1000   : > { %v6140_v4 = vpop.f32.mrb[16].mxu1 }
0x1001   : > { %v2093_v28 = vmul.f32 %v6140_v4, %v7853_v41  ;;  %v2061_v6 = vpop.f32.mrb[17].mxu1 }
0x1002   : > { %v2092_v9 = vmul.f32 %v2061_v6, %v7846_v38  ;;  %v5555_v38 = vld [vmem:[#allocation5 + $0x1] ss:$0 sm:$0xff] }
0x1003   : > { %v2099_v10 = vadd.f32 %v2093_v28, %v2091_v5  ;;  %v5560_v5 = vld [vmem:[#allocation10 + $0x1] ss:$0 sm:$0xff] }
0x1004   : > { %v2098_v30 = vadd.f32 %v2092_v9, %v2090_v8  ;;  %v6143_v11 = vpop.f32.mrb[18].mxu1 }
0x1005   : > { %v2095_v12 = vmul.f32 %v6143_v11, %v7867_v45  ;;  %v2071_v13 = vpop.f32.mrb[19].mxu1  ;;  %v5574_v11 = vld [vmem:[%s8778_s8 + $0x70] sm:$0xff] }
0x1006   : > { %v2094_v37 = vmul.f32 %v2071_v13, %v7859_v42 }
0x1007   : > { %v2101_v14 = vadd.f32 %v2099_v10, %v2095_v12  ;;  %v5575_v12 = vld [vmem:[%s8778_s8 + $0x78] sm:$0xff] }
0x1008   : > { %v2100_v41 = vadd.f32 %v2098_v30, %v2094_v37  ;;  %v6146_v15 = vpop.f32.mrb[20].mxu1  ;;  %v6566_v13 = vpack.c.bf16 %v5575_v12, %v5574_v11  ;;  %v5565_v37 = vld [vmem:[#allocation7 + $0x1] ss:$0 sm:$0xff] }
0x1009   : > { %v2097_v16 = vmul.f32 %v6146_v15, %v7881_v49  ;;  %v2081_v17 = vpop.f32.mrb[21].mxu1  ;;  %v8181_v11 = vld [vmem:[%s8841_s2 + $0x8] sm:$0xff] }
0x100a   : > { %v2096_v18 = vmul.f32 %v2081_v17, %v7873_v46 }
0x100b   : > { %v2103_v20 = vadd.f32 %v2101_v14, %v2097_v16 }
0x100c   : > { %v2102_v23 = vadd.f32 %v2100_v41, %v2096_v18 }
0x100e   : > { %6155 = vmatprep.mubr.msk.f32.mxu0 %vm746_vm2, %v2102_v23 }
0x100f   : > { %6156 = vmatmul.mubr.msk.f32.vlgmr.msra.gmra.mrb[20].mxu0 %vm746_vm2, %v2103_v20  ;;  %v5576_v20 = vld [vmem:[#allocation8 + $0x1] ss:$0 sm:$0xff] }
0x1010   : > { %6557 = vmatpush3.bf16.msra.mxu0 %v6554_v51 }
0x1011   : > { %6559 = vmatprep.subr.bf16.mxu0 %v6558_v53 }
0x1014   : > { %6561 = vmatpush3.bf16.msra.mxu0 %v6558_v53  ;;  %v5580_v53 = vld [vmem:[%s8782_s12 + $0x1] ss:$0 sm:$0xff] }
0x1015   : > { %6563 = vmatprep.subr.bf16.mxu0 %v6562_v58 }
0x1018   : > { %6565 = vmatpush3.bf16.msra.mxu0 %v6562_v58 }
0x1019   : > { %6567 = vmatprep.subr.bf16.mxu0 %v6566_v13 }
0x101c   : > { %6569 = vmatpush3.bf16.msra.mxu0 %v6566_v13  ;;  %v8187_v13 = vld [vmem:[%s8841_s2 + $0x10] sm:$0xff] }
0x10e2   : > { %v6157_v19 = vpop.f32.mrb[20].mxu0 }
0x10e3   : > { %v2189_v45 = vpop.f32.mrb[21].mxu0  ;;  %v2195_v21 = vadd.f32 %v6157_v19, %v5555_v38 }
0x10e4   : > { %v2190_v22 = vadd.f32 %v5555_v38, %v2189_v45 }
0x10e5   : > { %v2199_v49 = vadd.f32 %v2195_v21, %v8007_v56  ;;  %v5561_v56 = vld [vmem:[%s8776_s6 + $0x20] sm:$0xff] }
0x10e6   : > { %v2198_v42 = vadd.f32 %v2190_v22, %v8003_v54  ;;  %v6546_v39 = vpack.c.bf16 %v5562_v36, %v5561_v56  ;;  %v5584_v36 = vld [vmem:[%s8840_s15 + $0x50] sm:$0xff] }
0x10e7   : > { %v2207_v46 = vsel %vm746_vm2, %v2199_v49, 0.0 }
0x10e8   : > { %v2204_v24 = vsel %vm746_vm2, %v2198_v42, 0.0  ;;  %6547 = vmatprep.subr.bf16.mxu1 %v6546_v39 }
0x10e9   : > { %2205 = vadd.xlane.f32.xlu1 %v2204_v24  ;;  %6549 = vmatpush3.bf16.msra.mxu1 %v6546_v39  ;;  %v5585_v39 = vld [vmem:[%s8840_s15 + $0x58] sm:$0xff] }
0x10ea   : > { %6551 = vmatprep.subr.bf16.mxu1 %v6550_v44  ;;  %v6574_v40 = vpack.c.bf16 %v5585_v39, %v5584_v36 }
0x10ed   : > { %2208 = vadd.xlane.f32.xlu1 %v2207_v46  ;;  %6553 = vmatpush3.bf16.msra.mxu1 %v6550_v44 }
0x1176   : > { %v2206_v25 = vpop.xlane.xlu1 %2205 }
0x1177   : > { %v2210_v26 = vmul.f32 0.03125, %v2206_v25 }
0x1179   : > { %v2212_v27 = vsub.f32 %v2198_v42, %v2210_v26 }
0x117a   : > { %v2209_v29 = vpop.xlane.xlu1 %2208 }
0x117b   : > { %v2211_v31 = vmul.f32 0.03125, %v2209_v29  ;;  %v2214_v32 = vmul.f32 %v2212_v27, %v2212_v27 }
0x117d   : > { %v2213_v33 = vsub.f32 %v2199_v49, %v2211_v31  ;;  %v2216_v62 = vsel %vm746_vm2, %v2214_v32, 0.0 }
0x117e   : > { %2217 = vadd.xlane.f32.xlu1 %v2216_v62 }
0x117f   : > { %v2215_v34 = vmul.f32 %v2213_v33, %v2213_v33 }
0x1181   : > { %v2219_v54 = vsel %vm746_vm2, %v2215_v34, 0.0  ;;  %v5582_v34 = vld [vmem:[%s8840_s15 + $0x40] sm:$0xff] }
0x1182   : > { %2220 = vadd.xlane.f32.xlu1 %v2219_v54  ;;  %v5583_v54 = vld [vmem:[%s8840_s15 + $0x48] sm:$0xff] }
0x1183   : > { %v6570_v56 = vpack.c.bf16 %v5583_v54, %v5582_v34 }
0x1185   : > { %6571 = vmatprep.subr.bf16.mxu1 %v6570_v56 }
0x120b   : > { %v2218_v59 = vpop.xlane.xlu1 %2217 }
0x120c   : > { %v2222_v60 = vmul.f32 0.03125, %v2218_v59 }
0x120e   : > { %v2224_v61 = vadd.f32 1e-05, %v2222_v60 }
0x120f   : > { %v2221_v63 = vpop.xlane.xlu1 %2220 }
0x1210   : > { %6986 = vrsqrt.f32 %v2224_v61  ;;  %v2223_v0 = vmul.f32 0.03125, %v2221_v63 }
0x1212   : > { %v2225_v1 = vadd.f32 1e-05, %v2223_v0 }
0x1214   : > { %6988 = vrsqrt.f32 %v2225_v1  ;;  %v5586_v1 = vld [vmem:[#allocation2 + $0x2] ss:$0 sm:$0xff] }
0x121a   : > { %v6987_v2 = vpop.eup %6986 }
0x121b   : > { %v2228_v4 = vmul.f32 %v6987_v2, %v2212_v27 }
0x121d   : > { %v2236_v28 = vmul.f32 %v5559_v3, %v2228_v4 }
0x121e   : > { %v6989_v6 = vpop.eup %6988 }
0x121f   : > { %v2229_v8 = vmul.f32 %v6989_v6, %v2213_v33  ;;  %v2244_v9 = vadd.f32 %v5560_v5, %v2236_v28 }
0x1221   : > { %v2237_v10 = vmul.f32 %v5559_v3, %v2229_v8  ;;  %6166 = vmatprep.mubr.msk.f32.mxu1 %vm746_vm2, %v2244_v9 }
0x1223   : > { %v2245_v30 = vadd.f32 %v5560_v5, %v2237_v10 }
0x1225   : > { %6167 = vmatmul.mubr.msk.f32.vlgmr.msra.gmra.mrb[22].mxu1 %vm746_vm2, %v2245_v30 }
0x1226   : > { %6573 = vmatpush3.bf16.msra.mxu1 %v6570_v56 }
0x1227   : > { %6575 = vmatprep.subr.bf16.mxu1 %v6574_v40 }
0x122a   : > { %6577 = vmatpush3.bf16.msra.mxu1 %v6574_v40 }
0x12f8   : > { %v6168_v14 = vpop.f32.mrb[22].mxu1 }
0x12f9   : > { %v2337_v41 = vadd.f32 %v6168_v14, %v5565_v37  ;;  %v2331_v15 = vpop.f32.mrb[23].mxu1  ;;  %v8195_v14 = vld [vmem:[%s8841_s2 + $0x18] sm:$0xff] }
0x12fa   : > { %v2332_v16 = vadd.f32 %v5565_v37, %v2331_v15  ;;  %v8201_v15 = vld [vmem:[%s8841_s2 + $0x20] sm:$0xff] }
0x12fb   : > { %v2341_v18 = vmax.f32 %v2337_v41, 0.0 }
0x12fc   : > { %v2340_v17 = vmax.f32 %v2332_v16, 0.0 }
0x12fe   : > { %6185 = vmatprep.mubr.msk.f32.mxu0 %vm1490_vm5, %v2340_v17  ;;  %v8209_v17 = vld [vmem:[%s8841_s2 + $0x28] sm:$0xff] }
0x12ff   : > { %6186 = vmatmul.mubr.msk.f32.vlgmr.msra.gmra.mrb[22].mxu0 %vm1490_vm5, %v2341_v18 }
0x13d2   : > { %v6187_v23 = vpop.f32.mrb[22].mxu0 }
0x13d3   : > { %v2431_v38 = vpop.f32.mrb[23].mxu0  ;;  %v2437_v19 = vadd.f32 %v6187_v23, %v5576_v20 }
0x13d4   : > { %v2432_v45 = vadd.f32 %v5576_v20, %v2431_v38  ;;  %v8215_v20 = vld [vmem:[%s8841_s2 + $0x30] sm:$0xff]  ;;  %v8223_v38 = vld [vmem:[%s8841_s2 + $0x38] sm:$0xff] }
0x13d5   : > { %v2441_v42 = vadd.f32 %v2437_v19, %v2245_v30 }
0x13d6   : > { %v2440_v21 = vadd.f32 %v2432_v45, %v2244_v9 }
0x13d7   : > { %v2449_v24 = vsel %vm746_vm2, %v2441_v42, 0.0 }
0x13d8   : > { %v2446_v22 = vsel %vm746_vm2, %v2440_v21, 0.0 }
0x13d9   : > { %2447 = vadd.xlane.f32.xlu1 %v2446_v22 }
0x13dd   : > { %2450 = vadd.xlane.f32.xlu1 %v2449_v24 }
0x1466   : > { %v2448_v49 = vpop.xlane.xlu1 %2447 }
0x1467   : > { %v2452_v46 = vmul.f32 0.03125, %v2448_v49 }
0x1469   : > { %v2454_v25 = vsub.f32 %v2440_v21, %v2452_v46 }
0x146a   : > { %v2451_v26 = vpop.xlane.xlu1 %2450 }
0x146b   : > { %v2453_v27 = vmul.f32 0.03125, %v2451_v26  ;;  %v2456_v29 = vmul.f32 %v2454_v25, %v2454_v25 }
0x146d   : > { %v2455_v31 = vsub.f32 %v2441_v42, %v2453_v27  ;;  %v2458_v32 = vsel %vm746_vm2, %v2456_v29, 0.0 }
0x146e   : > { %2459 = vadd.xlane.f32.xlu0 %v2458_v32 }
0x146f   : > { %v2457_v33 = vmul.f32 %v2455_v31, %v2455_v31 }
0x1471   : > { %v2461_v62 = vsel %vm746_vm2, %v2457_v33, 0.0 }
0x1472   : > { %2462 = vadd.xlane.f32.xlu1 %v2461_v62 }
0x14fb   : > { %v2460_v43 = vpop.xlane.xlu0 %2459 }
0x14fc   : > { %v2464_v44 = vmul.f32 0.03125, %v2460_v43 }
0x14fe   : > { %v2466_v47 = vadd.f32 1e-05, %v2464_v44 }
0x14ff   : > { %v2463_v48 = vpop.xlane.xlu1 %2462 }
0x1500   : > { %6990 = vrsqrt.f32 %v2466_v47  ;;  %v2465_v50 = vmul.f32 0.03125, %v2463_v48 }
0x1502   : > { %v2467_v51 = vadd.f32 1e-05, %v2465_v50 }
0x1504   : > { %6992 = vrsqrt.f32 %v2467_v51 }
0x150a   : > { %v6991_v52 = vpop.eup %6990 }
0x150b   : > { %v2470_v55 = vmul.f32 %v6991_v52, %v2454_v25 }
0x150d   : > { %v2478_v58 = vmul.f32 %v5580_v53, %v2470_v55 }
0x150e   : > { %v6993_v59 = vpop.eup %6992 }
0x150f   : > { %v2471_v60 = vmul.f32 %v6993_v59, %v2455_v31  ;;  %v8160_v61 = vadd.f32 %v5581_v57, %v2478_v58 }
0x1511   : > { %v2479_v63 = vmul.f32 %v5580_v53, %v2471_v60  ;;  %6196 = vmatprep.mubr.msk.f32.mxu1 %vm746_vm2, %v8160_v61 }
0x1513   : > { %v8164_v0 = vadd.f32 %v5581_v57, %v2479_v63 }
0x1515   : > { %6197 = vmatmul.mubr.msk.f32.vlgmr.msra.gmra.mrb[24].mxu1 %vm746_vm2, %v8164_v0 }
0x15e8   : > { %v6198_v2 = vpop.f32.mrb[24].mxu1 }
0x15e9   : > { %v2579_v3 = vadd.f32 %v6198_v2, %v5586_v1  ;;  %v2573_v4 = vpop.f32.mrb[25].mxu1 }
0x15ea   : > { %v2574_v5 = vadd.f32 %v5586_v1, %v2573_v4 }
0x15eb   : > { %v2583_v12 = vmul.f32 %v8181_v11, %v2579_v3  ;;  %v2585_v41 = vmul.f32 %v8195_v14, %v2579_v3  ;;  %v2587_v18 = vmul.f32 %v8209_v17, %v2579_v3  ;;  %v2589_v19 = vmul.f32 %v8223_v38, %v2579_v3 }
0x15ec   : > { %v8168_v28 = vpack.i.bf16 %v2579_v3, %v2574_v5  ;;  %v2582_v6 = vmul.f32 %v8082_v7, %v2574_v5  ;;  %v2584_v37 = vmul.f32 %v8187_v13, %v2574_v5  ;;  %v2586_v16 = vmul.f32 %v8201_v15, %v2574_v5 }
0x15ed   : > { %v2588_v23 = vmul.f32 %v8215_v20, %v2574_v5 }
0x15ee   : > { %6885 = vrot.lane.b32.xlu1 %v8168_v28, %s7419_s19  ;;  %6203 = vmatprep.mubr.msk.f32.mxu1 %vm746_vm2, %v2582_v6 }
0x1660   : > { %v6886_v8 = vpop.permute.xlu1 %6885 }
0x1661   : > { %v6888_v9 = vunpack.i.h.bf16 %v6886_v8  ;;  %v6887_v10 = vunpack.i.l.bf16 %v6886_v8 }
0x1663   : > { %v6578_v30 = vpack.c.bf16 %v6888_v9, %v6887_v10 }
0x1665   : > { %6580 = vmatprep.subr.msk.bf16.mxu1 %vm7830_vm3, %v6578_v30 }
0x1666   : > { %6583 = vmatpush3.bf16.xpose.msk.msra.mxu1 %vm7830_vm3, %v6578_v30 }
0x166d   : > { %6204 = vmatmul.mubr.msk.f32.vlgmr.msra.gmra.mrb[26].mxu1 %vm746_vm2, %v2583_v12 }
0x166e   : > { %6206 = vmatprep.mubr.msk.f32.mxu1 %vm746_vm2, %v2584_v37 }
0x1671   : > { %6207 = vmatmul.mubr.msk.f32.gmra.mrb[28].mxu1 %vm746_vm2, %v2585_v41 }
0x1672   : > { %6209 = vmatprep.mubr.msk.f32.mxu1 %vm746_vm2, %v2586_v16 }
0x1675   : > { %6210 = vmatmul.mubr.msk.f32.gmra.mrb[30].mxu1 %vm746_vm2, %v2587_v18 }
0x1676   : > { %6212 = vmatprep.mubr.msk.f32.mxu1 %vm746_vm2, %v2588_v23 }
0x1679   : > { %6213 = vmatmul.mubr.msk.f32.gmra.mrb[32].mxu1 %vm746_vm2, %v2589_v19 }
0x1740   : > { %v6205_v45 = vpop.f32.mrb[26].mxu1 }
0x1741   : > { %v2730_v21 = vmul.f32 0.35355338, %v6205_v45  ;;  %v2690_v22 = vpop.f32.mrb[27].mxu1 }
0x1742   : > { %v2729_v42 = vmul.f32 0.35355338, %v2690_v22 }
0x1743   : > { %v2740_v24 = vsel %vm1004_vm4, %v2730_v21, -inf }
0x1744   : > { %2741 = vmax.xlane.f32.xlu0 %v2740_v24  ;;  %v6208_v49 = vpop.f32.mrb[28].mxu1  ;;  %v2737_v46 = vsel %vm1004_vm4, %v2729_v42, -inf }
0x1745   : > { %v2732_v25 = vmul.f32 0.35355338, %v6208_v49  ;;  %2738 = vmax.xlane.f32.xlu1 %v2737_v46  ;;  %v2700_v26 = vpop.f32.mrb[29].mxu1 }
0x1746   : > { %v2731_v27 = vmul.f32 0.35355338, %v2700_v26 }
0x1747   : > { %v2746_v29 = vsel %vm1004_vm4, %v2732_v25, -inf }
0x1748   : > { %2747 = vmax.xlane.f32.xlu0 %v2746_v29  ;;  %v6211_v31 = vpop.f32.mrb[30].mxu1  ;;  %v2743_v62 = vsel %vm1004_vm4, %v2731_v27, -inf }
0x1749   : > { %v2710_v32 = vpop.f32.mrb[31].mxu1  ;;  %v2734_v33 = vmul.f32 0.35355338, %v6211_v31 }
0x174a   : > { %v2733_v56 = vmul.f32 0.35355338, %v2710_v32 }
0x174b   : > { %v2752_v36 = vsel %vm1004_vm4, %v2734_v33, -inf }
0x174c   : > { %2744 = vmax.xlane.f32.xlu0 %v2743_v62  ;;  %v6214_v34 = vpop.f32.mrb[32].mxu1  ;;  %v2749_v40 = vsel %vm1004_vm4, %v2733_v56, -inf }
0x174d   : > { %v2720_v54 = vpop.f32.mrb[33].mxu1  ;;  %v2736_v43 = vmul.f32 0.35355338, %v6214_v34 }
0x174e   : > { %v2735_v39 = vmul.f32 0.35355338, %v2720_v54 }
0x174f   : > { %v2758_v47 = vsel %vm1004_vm4, %v2736_v43, -inf }
0x1750   : > { %2753 = vmax.xlane.f32.xlu0 %v2752_v36  ;;  %v2755_v44 = vsel %vm1004_vm4, %v2735_v39, -inf }
0x1754   : > { %2750 = vmax.xlane.f32.xlu0 %v2749_v40 }
0x1758   : > { %2756 = vmax.xlane.f32.xlu0 %v2755_v44 }
0x175c   : > { %2759 = vmax.xlane.f32.xlu0 %v2758_v47 }
0x17d1   : > { %v2742_v48 = vpop.xlane.xlu0 %2741 }
0x17d2   : > { %v2762_v50 = vsub.f32 %v2730_v21, %v2742_v48  ;;  %v2739_v51 = vpop.xlane.xlu1 %2738 }
0x17d3   : > { %v2761_v52 = vsub.f32 %v2729_v42, %v2739_v51 }
0x17d4   : > { %v2771_v53 = vmul.f32 1.442695, %v2762_v50 }
0x17d5   : > { %v2769_v55 = vmul.f32 1.442695, %v2761_v52  ;;  %v2748_v57 = vpop.xlane.xlu0 %2747 }
0x17d6   : > { %6994 = vpow2.f32 %v2771_v53  ;;  %v2764_v58 = vsub.f32 %v2732_v25, %v2748_v57 }
0x17d7   : > { %6996 = vpow2.f32 %v2769_v55 }
0x17d8   : > { %v2775_v59 = vmul.f32 1.442695, %v2764_v58 }
0x17d9   : > { %v2745_v60 = vpop.xlane.xlu0 %2744 }
0x17da   : > { %6998 = vpow2.f32 %v2775_v59  ;;  %v2763_v63 = vsub.f32 %v2731_v27, %v2745_v60 }
0x17dc   : > { %v2773_v1 = vmul.f32 1.442695, %v2763_v63 }
0x17dd   : > { %v2754_v2 = vpop.xlane.xlu0 %2753 }
0x17de   : > { %7000 = vpow2.f32 %v2773_v1  ;;  %v2766_v3 = vsub.f32 %v2734_v33, %v2754_v2 }
0x17e0   : > { %v8235_v4 = vpop.eup %6994  ;;  %v2779_v5 = vmul.f32 1.442695, %v2766_v3 }
0x17e1   : > { %v6997_v6 = vpop.eup %6996  ;;  %v2751_v8 = vpop.xlane.xlu0 %2750  ;;  %v2788_v9 = vsel %vm1004_vm4, %v8235_v4, 0.0 }
0x17e2   : > { %7002 = vpow2.f32 %v2779_v5  ;;  %v2765_v10 = vsub.f32 %v2733_v56, %v2751_v8  ;;  %2789 = vadd.xlane.f32.xlu1 %v2788_v9  ;;  %v2785_v30 = vsel %vm1004_vm4, %v6997_v6, 0.0  ;;  %v5607_v5 = vld [vmem:[%s8774_s4 + $0x40] sm:$0xff]  ;;  %v5609_v9 = vld [vmem:[%s8774_s4 + $0x50] sm:$0xff] }
0x17e3   : > { %2786 = vadd.xlane.f32.xlu0 %v2785_v30 }
0x17e4   : > { %v6999_v12 = vpop.eup %6998  ;;  %v2777_v37 = vmul.f32 1.442695, %v2765_v10  ;;  %v5610_v10 = vld [vmem:[%s8774_s4 + $0x58] sm:$0xff] }
0x17e5   : > { %v2757_v41 = vpop.xlane.xlu0 %2756  ;;  %v2794_v16 = vsel %vm1004_vm4, %v6999_v12, 0.0  ;;  %v6592_v30 = vpack.c.bf16 %v5610_v10, %v5609_v9  ;;  %v5628_v10 = vld [vmem:[%s8778_s8 + $0xa0] sm:$0xff] }
0x17e6   : > { %7004 = vpow2.f32 %v2777_v37  ;;  %v2767_v18 = vsub.f32 %v2735_v39, %v2757_v41  ;;  %2795 = vadd.xlane.f32.xlu1 %v2794_v16 }
0x17e8   : > { %v7001_v23 = vpop.eup %7000  ;;  %v2781_v19 = vmul.f32 1.442695, %v2767_v18 }
0x17e9   : > { %v2760_v45 = vpop.xlane.xlu0 %2759  ;;  %v2791_v21 = vsel %vm1004_vm4, %v7001_v23, 0.0 }
0x17ea   : > { %7006 = vpow2.f32 %v2781_v19  ;;  %v2768_v22 = vsub.f32 %v2736_v43, %v2760_v45  ;;  %2792 = vadd.xlane.f32.xlu0 %v2791_v21 }
0x17ec   : > { %v7003_v42 = vpop.eup %7002  ;;  %v2783_v24 = vmul.f32 1.442695, %v2768_v22 }
0x17ed   : > { %v2800_v49 = vsel %vm1004_vm4, %v7003_v42, 0.0 }
0x17ee   : > { %7008 = vpow2.f32 %v2783_v24  ;;  %2801 = vadd.xlane.f32.xlu1 %v2800_v49 }
0x17f0   : > { %v7005_v46 = vpop.eup %7004 }
0x17f1   : > { %v2797_v25 = vsel %vm1004_vm4, %v7005_v46, 0.0 }
0x17f2   : > { %2798 = vadd.xlane.f32.xlu0 %v2797_v25 }
0x17f4   : > { %v7007_v26 = vpop.eup %7006 }
0x17f5   : > { %v2803_v27 = vsel %vm1004_vm4, %v7007_v26, 0.0 }
0x17f6   : > { %2804 = vadd.xlane.f32.xlu0 %v2803_v27 }
0x17f8   : > { %v7009_v29 = vpop.eup %7008 }
0x17f9   : > { %v2806_v31 = vsel %vm1004_vm4, %v7009_v29, 0.0 }
0x17fa   : > { %2807 = vadd.xlane.f32.xlu1 %v2806_v31 }
0x180c   : > { %6890 = vrot.lane.b32.xlu0 %v8168_v28, %s7420_s3 }
0x186f   : > { %v2790_v34 = vpop.xlane.xlu1 %2789 }
0x1870   : > { %v2787_v32 = vpop.xlane.xlu0 %2786 }
0x1871   : > { %7010 = vrcp.f32 %v2787_v32 }
0x1872   : > { %7012 = vrcp.f32 %v2790_v34  ;;  %v5611_v34 = vld [vmem:[#allocation5 + $0x2] ss:$0 sm:$0xff] }
0x1873   : > { %v2796_v36 = vpop.xlane.xlu1 %2795 }
0x1877   : > { %v2793_v62 = vpop.xlane.xlu0 %2792 }
0x1878   : > { %7014 = vrcp.f32 %v2793_v62 }
0x1879   : > { %7016 = vrcp.f32 %v2796_v36 }
0x187b   : > { %v7011_v33 = vpop.eup %7010  ;;  %v2802_v40 = vpop.xlane.xlu1 %2801 }
0x187c   : > { %v2810_v54 = vmul.f32 %v7011_v33, %v6997_v6  ;;  %v7013_v50 = vpop.eup %7012  ;;  %v5608_v6 = vld [vmem:[%s8774_s4 + $0x48] sm:$0xff] }
0x187d   : > { %v2812_v52 = vmul.f32 %v7013_v50, %v8235_v4  ;;  %v6588_v8 = vpack.c.bf16 %v5608_v6, %v5607_v5  ;;  %v5626_v5 = vld [vmem:[%s8778_s8 + $0x90] sm:$0xff] }
0x187e   : > { %6219 = vmatprep.mubr.msk.f32.mxu0 %vm1004_vm4, %v2810_v54 }
0x187f   : > { %v2799_v56 = vpop.xlane.xlu0 %2798  ;;  %6589 = vmatprep.subr.bf16.mxu1 %v6588_v8 }
0x1880   : > { %7018 = vrcp.f32 %v2799_v56  ;;  %6591 = vmatpush3.bf16.msra.mxu1 %v6588_v8  ;;  %v5627_v8 = vld [vmem:[%s8778_s8 + $0x98] sm:$0xff] }
0x1881   : > { %7020 = vrcp.f32 %v2802_v40  ;;  %6593 = vmatprep.subr.bf16.mxu1 %v6592_v30  ;;  %v6608_v9 = vpack.c.bf16 %v5627_v8, %v5626_v5  ;;  %v5640_v5 = vld [vmem:[%s8840_s15 + $0x70] sm:$0xff] }
0x1882   : > { %v7015_v51 = vpop.eup %7014 }
0x1883   : > { %v2805_v39 = vpop.xlane.xlu0 %2804  ;;  %v7017_v53 = vpop.eup %7016  ;;  %v2814_v55 = vmul.f32 %v7015_v51, %v7001_v23 }
0x1884   : > { %7022 = vrcp.f32 %v2805_v39  ;;  %v2816_v58 = vmul.f32 %v7017_v53, %v6999_v12  ;;  %6595 = vmatpush3.bf16.msra.mxu1 %v6592_v30  ;;  %v5629_v30 = vld [vmem:[%s8778_s8 + $0xa8] sm:$0xff] }
0x1887   : > { %v6891_v43 = vpop.permute.xlu0 %6890  ;;  %v2808_v28 = vpop.xlane.xlu1 %2807 }
0x1888   : > { %v6893_v44 = vunpack.i.h.bf16 %v6891_v43  ;;  %v6892_v47 = vunpack.i.l.bf16 %v6891_v43  ;;  %7024 = vrcp.f32 %v2808_v28 }
0x188a   : > { %v6584_v48 = vpack.c.bf16 %v6893_v44, %v6892_v47  ;;  %v7019_v57 = vpop.eup %7018 }
0x188b   : > { %v7021_v59 = vpop.eup %7020  ;;  %v2818_v60 = vmul.f32 %v7019_v57, %v7005_v46 }
0x188c   : > { %6585 = vmatprep.subr.bf16.mxu0 %v6584_v48  ;;  %v2820_v1 = vmul.f32 %v7021_v59, %v7003_v42  ;;  %v5618_v59 = vld [vmem:[%s8776_s6 + $0x48] sm:$0xff] }
0x188d   : > { %6587 = vmatpush3.bf16.msra.mxu0 %v6584_v48 }
0x188e   : > { %v7023_v63 = vpop.eup %7022 }
0x188f   : > { %v2822_v3 = vmul.f32 %v7023_v63, %v7007_v26  ;;  %v5619_v63 = vld [vmem:[%s8776_s6 + $0x50] sm:$0xff] }
0x1890   : > { %6220 = vmatmul.mubr.msk.f32.vlgmr.msra.gmra.mrb[24].mxu0 %vm1004_vm4, %v2812_v52 }
0x1891   : > { %6222 = vmatprep.mubr.msk.f32.mxu0 %vm1004_vm4, %v2814_v55 }
0x1892   : > { %v7025_v2 = vpop.eup %7024 }
0x1893   : > { %v2824_v4 = vmul.f32 %v7025_v2, %v7009_v29 }
0x1894   : > { %6223 = vmatmul.mubr.msk.f32.gmra.mrb[26].mxu0 %vm1004_vm4, %v2816_v58 }
0x1895   : > { %6225 = vmatprep.mubr.msk.f32.mxu0 %vm1004_vm4, %v2818_v60 }
0x1898   : > { %6226 = vmatmul.mubr.msk.f32.gmra.mrb[28].mxu0 %vm1004_vm4, %v2820_v1  ;;  %v5620_v1 = vld [vmem:[%s8776_s6 + $0x58] sm:$0xff] }
0x1899   : > { %6228 = vmatprep.mubr.msk.f32.mxu0 %vm1004_vm4, %v2822_v3  ;;  %v6600_v2 = vpack.c.bf16 %v5620_v1, %v5619_v63  ;;  %v5624_v3 = vld [vmem:[%s8778_s8 + $0x80] sm:$0xff] }
0x189c   : > { %6229 = vmatmul.mubr.msk.f32.gmra.mrb[30].mxu0 %vm1004_vm4, %v2824_v4  ;;  %v5625_v4 = vld [vmem:[%s8778_s8 + $0x88] sm:$0xff] }
0x189d   : > { %v6604_v6 = vpack.c.bf16 %v5625_v4, %v5624_v3  ;;  %v5639_v3 = vld [vmem:[%s8840_s15 + $0x68] sm:$0xff] }
0x189f   : > { %6605 = vmatprep.subr.bf16.mxu1 %v6604_v6 }
0x1963   : > { %v6221_v12 = vpop.f32.mrb[24].mxu0 }
0x1964   : > { %v2921_v37 = vpop.f32.mrb[25].mxu0  ;;  %v2961_v16 = vmul.f32 %v8181_v11, %v6221_v12  ;;  %v6612_v12 = vpack.c.bf16 %v5629_v30, %v5628_v10 }
0x1965   : > { %v2960_v19 = vmul.f32 %v8082_v7, %v2921_v37 }
0x1967   : > { %v6224_v41 = vpop.f32.mrb[26].mxu0 }
0x1968   : > { %v2963_v18 = vmul.f32 %v8195_v14, %v6224_v41  ;;  %v2931_v23 = vpop.f32.mrb[27].mxu0 }
0x1969   : > { %v2962_v45 = vmul.f32 %v8187_v13, %v2931_v23 }
0x196a   : > { %v2969_v21 = vadd.f32 %v2963_v18, %v2961_v16 }
0x196b   : > { %v2968_v22 = vadd.f32 %v2962_v45, %v2960_v19  ;;  %v6227_v42 = vpop.f32.mrb[28].mxu0 }
0x196c   : > { %v2965_v24 = vmul.f32 %v8209_v17, %v6227_v42  ;;  %v2941_v49 = vpop.f32.mrb[29].mxu0  ;;  %v5616_v42 = vld [vmem:[#allocation10 + $0x2] ss:$0 sm:$0xff] }
0x196d   : > { %v2964_v46 = vmul.f32 %v8201_v15, %v2941_v49 }
0x196e   : > { %v2971_v25 = vadd.f32 %v2969_v21, %v2965_v24  ;;  %v5615_v21 = vld [vmem:[%s8780_s10 + $0x2] ss:$0 sm:$0xff] }
0x196f   : > { %v2970_v26 = vadd.f32 %v2968_v22, %v2964_v46  ;;  %v6230_v27 = vpop.f32.mrb[30].mxu0 }
0x1970   : > { %v2967_v29 = vmul.f32 %v8223_v38, %v6230_v27  ;;  %v2951_v31 = vpop.f32.mrb[31].mxu0 }
0x1971   : > { %v2966_v32 = vmul.f32 %v8215_v20, %v2951_v31  ;;  %v5631_v31 = vld [vmem:[%s8778_s8 + $0xb8] sm:$0xff] }
0x1972   : > { %v2973_v33 = vadd.f32 %v2971_v25, %v2967_v29  ;;  %v5630_v29 = vld [vmem:[%s8778_s8 + $0xb0] sm:$0xff] }
0x1973   : > { %v2972_v62 = vadd.f32 %v2970_v26, %v2966_v32  ;;  %v6616_v32 = vpack.c.bf16 %v5631_v31, %v5630_v29 }
0x1975   : > { %6239 = vmatprep.mubr.msk.f32.mxu1 %vm746_vm2, %v2972_v62 }
0x1976   : > { %6240 = vmatmul.mubr.msk.f32.vlgmr.msra.gmra.mrb[34].mxu1 %vm746_vm2, %v2973_v33  ;;  %v5621_v33 = vld [vmem:[#allocation7 + $0x2] ss:$0 sm:$0xff] }
0x1977   : > { %6607 = vmatpush3.bf16.msra.mxu1 %v6604_v6  ;;  %v5641_v6 = vld [vmem:[%s8840_s15 + $0x78] sm:$0xff] }
0x1978   : > { %6609 = vmatprep.subr.bf16.mxu1 %v6608_v9  ;;  %v6624_v8 = vpack.c.bf16 %v5641_v6, %v5640_v5 }
0x197b   : > { %6611 = vmatpush3.bf16.msra.mxu1 %v6608_v9 }
0x197c   : > { %6613 = vmatprep.subr.bf16.mxu1 %v6612_v12 }
0x197f   : > { %6615 = vmatpush3.bf16.msra.mxu1 %v6612_v12 }
0x1980   : > { %6617 = vmatprep.subr.bf16.mxu1 %v6616_v32 }
0x1983   : > { %6619 = vmatpush3.bf16.msra.mxu1 %v6616_v32 }
0x1a49   : > { %v6241_v54 = vpop.f32.mrb[34].mxu1 }
0x1a4a   : > { %v3059_v56 = vpop.f32.mrb[35].mxu1  ;;  %v3065_v36 = vadd.f32 %v6241_v54, %v5611_v34 }
0x1a4b   : > { %v3060_v39 = vadd.f32 %v5611_v34, %v3059_v56 }
0x1a4c   : > { %v3069_v44 = vadd.f32 %v3065_v36, %v8164_v0  ;;  %v5617_v0 = vld [vmem:[%s8776_s6 + $0x40] sm:$0xff] }
0x1a4d   : > { %v3068_v40 = vadd.f32 %v3060_v39, %v8160_v61  ;;  %v6596_v60 = vpack.c.bf16 %v5618_v59, %v5617_v0 }
0x1a4e   : > { %v3077_v47 = vsel %vm746_vm2, %v3069_v44, 0.0 }
0x1a4f   : > { %v3074_v43 = vsel %vm746_vm2, %v3068_v40, 0.0  ;;  %6597 = vmatprep.subr.bf16.mxu0 %v6596_v60 }
0x1a50   : > { %3075 = vadd.xlane.f32.xlu1 %v3074_v43  ;;  %6599 = vmatpush3.bf16.msra.mxu0 %v6596_v60 }
0x1a51   : > { %6601 = vmatprep.subr.bf16.mxu0 %v6600_v2 }
0x1a54   : > { %3078 = vadd.xlane.f32.xlu1 %v3077_v47  ;;  %6603 = vmatpush3.bf16.msra.mxu0 %v6600_v2  ;;  %v5638_v2 = vld [vmem:[%s8840_s15 + $0x60] sm:$0xff] }
0x1a55   : > { %v6620_v4 = vpack.c.bf16 %v5639_v3, %v5638_v2 }
0x1a57   : > { %6621 = vmatprep.subr.bf16.mxu0 %v6620_v4 }
0x1add   : > { %v3076_v28 = vpop.xlane.xlu1 %3075 }
0x1ade   : > { %v3080_v48 = vmul.f32 0.03125, %v3076_v28 }
0x1ae0   : > { %v3082_v50 = vsub.f32 %v3068_v40, %v3080_v48  ;;  %v5632_v40 = vld [vmem:[#allocation8 + $0x2] ss:$0 sm:$0xff] }
0x1ae1   : > { %v3079_v51 = vpop.xlane.xlu1 %3078 }
0x1ae2   : > { %v3081_v52 = vmul.f32 0.03125, %v3079_v51  ;;  %v3084_v53 = vmul.f32 %v3082_v50, %v3082_v50 }
0x1ae4   : > { %v3083_v55 = vsub.f32 %v3069_v44, %v3081_v52  ;;  %v3086_v57 = vsel %vm746_vm2, %v3084_v53, 0.0 }
0x1ae5   : > { %3087 = vadd.xlane.f32.xlu1 %v3086_v57 }
0x1ae6   : > { %v3085_v58 = vmul.f32 %v3083_v55, %v3083_v55 }
0x1ae8   : > { %v3089_v61 = vsel %vm746_vm2, %v3085_v58, 0.0 }
0x1ae9   : > { %3090 = vadd.xlane.f32.xlu1 %v3089_v61 }
0x1b72   : > { %v3088_v37 = vpop.xlane.xlu1 %3087 }
0x1b73   : > { %v3092_v41 = vmul.f32 0.03125, %v3088_v37 }
0x1b75   : > { %v3094_v16 = vadd.f32 1e-05, %v3092_v41 }
0x1b76   : > { %v3091_v18 = vpop.xlane.xlu1 %3090 }
0x1b77   : > { %7026 = vrsqrt.f32 %v3094_v16  ;;  %v3093_v23 = vmul.f32 0.03125, %v3091_v18  ;;  %v5636_v18 = vld [vmem:[%s8782_s12 + $0x2] ss:$0 sm:$0xff] }
0x1b79   : > { %v3095_v19 = vadd.f32 1e-05, %v3093_v23 }
0x1b7b   : > { %7028 = vrsqrt.f32 %v3095_v19  ;;  %v5637_v19 = vld [vmem:[#allocation11 + $0x2] ss:$0 sm:$0xff] }
0x1b81   : > { %v7027_v45 = vpop.eup %7026 }
0x1b82   : > { %v3098_v22 = vmul.f32 %v7027_v45, %v3082_v50 }
0x1b84   : > { %v3106_v24 = vmul.f32 %v5615_v21, %v3098_v22 }
0x1b85   : > { %v7029_v49 = vpop.eup %7028 }
0x1b86   : > { %v3099_v46 = vmul.f32 %v7029_v49, %v3083_v55  ;;  %v3114_v25 = vadd.f32 %v5616_v42, %v3106_v24 }
0x1b88   : > { %v3107_v26 = vmul.f32 %v5615_v21, %v3099_v46  ;;  %6250 = vmatprep.mubr.msk.f32.mxu0 %vm746_vm2, %v3114_v25  ;;  %v5642_v46 = vld [vmem:[#allocation2 + $0x3] ss:$0 sm:$0xff] }
0x1b8a   : > { %v3115_v27 = vadd.f32 %v5616_v42, %v3107_v26 }
0x1b8c   : > { %6251 = vmatmul.mubr.msk.f32.vlgmr.msra.gmra.mrb[32].mxu0 %vm746_vm2, %v3115_v27 }
0x1b8d   : > { %6623 = vmatpush3.bf16.msra.mxu0 %v6620_v4 }
0x1b8e   : > { %6625 = vmatprep.subr.bf16.mxu0 %v6624_v8 }
0x1b91   : > { %6627 = vmatpush3.bf16.msra.mxu0 %v6624_v8 }
0x1c5f   : > { %v6252_v62 = vpop.f32.mrb[32].mxu0 }
0x1c60   : > { %v3207_v34 = vadd.f32 %v6252_v62, %v5621_v33  ;;  %v3201_v54 = vpop.f32.mrb[33].mxu0 }
0x1c61   : > { %v3202_v56 = vadd.f32 %v5621_v33, %v3201_v54 }
0x1c62   : > { %v3211_v39 = vmax.f32 %v3207_v34, 0.0 }
0x1c63   : > { %v3210_v36 = vmax.f32 %v3202_v56, 0.0 }
0x1c65   : > { %6269 = vmatprep.mubr.msk.f32.mxu1 %vm1490_vm5, %v3210_v36 }
0x1c66   : > { %6270 = vmatmul.mubr.msk.f32.vlgmr.msra.gmra.mrb[36].mxu1 %vm1490_vm5, %v3211_v39 }
0x1d39   : > { %v6271_v43 = vpop.f32.mrb[36].mxu1 }
0x1d3a   : > { %v3301_v44 = vpop.f32.mrb[37].mxu1  ;;  %v3307_v47 = vadd.f32 %v6271_v43, %v5632_v40 }
0x1d3b   : > { %v3302_v28 = vadd.f32 %v5632_v40, %v3301_v44 }
0x1d3c   : > { %v3311_v51 = vadd.f32 %v3307_v47, %v3115_v27 }
0x1d3d   : > { %v3310_v48 = vadd.f32 %v3302_v28, %v3114_v25 }
0x1d3e   : > { %v3319_v52 = vsel %vm746_vm2, %v3311_v51, 0.0 }
0x1d3f   : > { %v3316_v50 = vsel %vm746_vm2, %v3310_v48, 0.0 }
0x1d40   : > { %3317 = vadd.xlane.f32.xlu1 %v3316_v50 }
0x1d44   : > { %3320 = vadd.xlane.f32.xlu1 %v3319_v52 }
0x1dcd   : > { %v3318_v53 = vpop.xlane.xlu1 %3317 }
0x1dce   : > { %v3322_v55 = vmul.f32 0.03125, %v3318_v53 }
0x1dd0   : > { %v3324_v57 = vsub.f32 %v3310_v48, %v3322_v55 }
0x1dd1   : > { %v3321_v58 = vpop.xlane.xlu1 %3320 }
0x1dd2   : > { %v3323_v61 = vmul.f32 0.03125, %v3321_v58  ;;  %v3326_v0 = vmul.f32 %v3324_v57, %v3324_v57 }
0x1dd4   : > { %v3325_v59 = vsub.f32 %v3311_v51, %v3323_v61  ;;  %v3328_v60 = vsel %vm746_vm2, %v3326_v0, 0.0 }
0x1dd5   : > { %3329 = vadd.xlane.f32.xlu0 %v3328_v60 }
0x1dd6   : > { %v3327_v63 = vmul.f32 %v3325_v59, %v3325_v59 }
0x1dd8   : > { %v3331_v1 = vsel %vm746_vm2, %v3327_v63, 0.0 }
0x1dd9   : > { %3332 = vadd.xlane.f32.xlu1 %v3331_v1 }
0x1e62   : > { %v3330_v9 = vpop.xlane.xlu0 %3329 }
0x1e63   : > { %v3334_v10 = vmul.f32 0.03125, %v3330_v9 }
0x1e65   : > { %v3336_v30 = vadd.f32 1e-05, %v3334_v10 }
0x1e66   : > { %v3333_v12 = vpop.xlane.xlu1 %3332 }
0x1e67   : > { %7030 = vrsqrt.f32 %v3336_v30  ;;  %v3335_v37 = vmul.f32 0.03125, %v3333_v12 }
0x1e69   : > { %v3337_v41 = vadd.f32 1e-05, %v3335_v37 }
0x1e6b   : > { %7032 = vrsqrt.f32 %v3337_v41 }
0x1e71   : > { %v7031_v16 = vpop.eup %7030 }
0x1e72   : > { %v3340_v23 = vmul.f32 %v7031_v16, %v3324_v57 }
0x1e74   : > { %v3348_v45 = vmul.f32 %v5636_v18, %v3340_v23 }
0x1e75   : > { %v7033_v21 = vpop.eup %7032 }
0x1e76   : > { %v3341_v22 = vmul.f32 %v7033_v21, %v3325_v59  ;;  %v8347_v42 = vadd.f32 %v5637_v19, %v3348_v45 }
0x1e78   : > { %v3349_v24 = vmul.f32 %v5636_v18, %v3341_v22  ;;  %6280 = vmatprep.mubr.msk.f32.mxu0 %vm746_vm2, %v8347_v42 }
0x1e7a   : > { %v8351_v49 = vadd.f32 %v5637_v19, %v3349_v24 }
0x1e7c   : > { %6281 = vmatmul.mubr.msk.f32.vlgmr.msra.gmra.mrb[34].mxu0 %vm746_vm2, %v8351_v49 }
0x1f4f   : > { %v6282_v25 = vpop.f32.mrb[34].mxu0 }
0x1f50   : > { %v3449_v26 = vadd.f32 %v6282_v25, %v5642_v46  ;;  %v3443_v27 = vpop.f32.mrb[35].mxu0 }
0x1f51   : > { %v3444_v29 = vadd.f32 %v5642_v46, %v3443_v27 }
0x1f52   : > { %v3453_v56 = vmul.f32 %v8181_v11, %v3449_v26  ;;  %v3457_v40 = vmul.f32 %v8209_v17, %v3449_v26  ;;  %v3459_v44 = vmul.f32 %v8223_v38, %v3449_v26 }
0x1f53   : > { %v8355_v31 = vpack.i.bf16 %v3449_v26, %v3444_v29  ;;  %v3452_v32 = vmul.f32 %v8082_v7, %v3444_v29  ;;  %v3454_v36 = vmul.f32 %v8187_v13, %v3444_v29  ;;  %v3455_v7 = vmul.f32 %v8195_v14, %v3449_v26 }
0x1f54   : > { %v3456_v39 = vmul.f32 %v8201_v15, %v3444_v29  ;;  %v3458_v43 = vmul.f32 %v8215_v20, %v3444_v29 }
0x1f55   : > { %6895 = vrot.lane.b32.xlu1 %v8355_v31, %s7419_s19  ;;  %6287 = vmatprep.mubr.msk.f32.mxu0 %vm746_vm2, %v3452_v32 }
0x1fc7   : > { %v6896_v33 = vpop.permute.xlu1 %6895 }
0x1fc8   : > { %v6898_v62 = vunpack.i.h.bf16 %v6896_v33  ;;  %v6897_v34 = vunpack.i.l.bf16 %v6896_v33 }
0x1fca   : > { %v6628_v54 = vpack.c.bf16 %v6898_v62, %v6897_v34 }
0x1fcc   : > { %6630 = vmatprep.subr.msk.bf16.mxu0 %vm7830_vm3, %v6628_v54 }
0x1fcd   : > { %6633 = vmatpush3.bf16.xpose.msk.msra.mxu0 %vm7830_vm3, %v6628_v54 }
0x1fd4   : > { %6288 = vmatmul.mubr.msk.f32.vlgmr.msra.gmra.mrb[36].mxu0 %vm746_vm2, %v3453_v56 }
0x1fd5   : > { %6290 = vmatprep.mubr.msk.f32.mxu0 %vm746_vm2, %v3454_v36 }
0x1fd8   : > { %6291 = vmatmul.mubr.msk.f32.gmra.mrb[38].mxu0 %vm746_vm2, %v3455_v7 }
0x1fd9   : > { %6293 = vmatprep.mubr.msk.f32.mxu0 %vm746_vm2, %v3456_v39 }
0x1fdc   : > { %6294 = vmatmul.mubr.msk.f32.gmra.mrb[40].mxu0 %vm746_vm2, %v3457_v40 }
0x1fdd   : > { %6296 = vmatprep.mubr.msk.f32.mxu0 %vm746_vm2, %v3458_v43 }
0x1fe0   : > { %6297 = vmatmul.mubr.msk.f32.gmra.mrb[42].mxu0 %vm746_vm2, %v3459_v44 }
0x20a7   : > { %v6289_v47 = vpop.f32.mrb[36].mxu0 }
0x20a8   : > { %v3600_v28 = vmul.f32 0.35355338, %v6289_v47  ;;  %v3560_v48 = vpop.f32.mrb[37].mxu0 }
0x20a9   : > { %v3599_v50 = vmul.f32 0.35355338, %v3560_v48 }
0x20aa   : > { %v3610_v51 = vsel %vm1004_vm4, %v3600_v28, -inf }
0x20ab   : > { %3611 = vmax.xlane.f32.xlu0 %v3610_v51  ;;  %v6292_v52 = vpop.f32.mrb[38].mxu0  ;;  %v3607_v53 = vsel %vm1004_vm4, %v3599_v50, -inf }
0x20ac   : > { %v3602_v55 = vmul.f32 0.35355338, %v6292_v52  ;;  %3608 = vmax.xlane.f32.xlu1 %v3607_v53  ;;  %v3570_v57 = vpop.f32.mrb[39].mxu0 }
0x20ad   : > { %v3601_v58 = vmul.f32 0.35355338, %v3570_v57 }
0x20ae   : > { %v3616_v61 = vsel %vm1004_vm4, %v3602_v55, -inf }
0x20af   : > { %3617 = vmax.xlane.f32.xlu0 %v3616_v61  ;;  %v6295_v0 = vpop.f32.mrb[40].mxu0  ;;  %v3613_v63 = vsel %vm1004_vm4, %v3601_v58, -inf }
0x20b0   : > { %v3580_v59 = vpop.f32.mrb[41].mxu0  ;;  %v3604_v60 = vmul.f32 0.35355338, %v6295_v0 }
0x20b1   : > { %v3603_v3 = vmul.f32 0.35355338, %v3580_v59 }
0x20b2   : > { %v3622_v4 = vsel %vm1004_vm4, %v3604_v60, -inf }
0x20b3   : > { %3614 = vmax.xlane.f32.xlu0 %v3613_v63  ;;  %v6298_v1 = vpop.f32.mrb[42].mxu0  ;;  %v3619_v6 = vsel %vm1004_vm4, %v3603_v3, -inf }
0x20b4   : > { %v3590_v2 = vpop.f32.mrb[43].mxu0  ;;  %v3606_v8 = vmul.f32 0.35355338, %v6298_v1 }
0x20b5   : > { %v3605_v5 = vmul.f32 0.35355338, %v3590_v2 }
0x20b6   : > { %v3628_v10 = vsel %vm1004_vm4, %v3606_v8, -inf }
0x20b7   : > { %3623 = vmax.xlane.f32.xlu0 %v3622_v4  ;;  %v3625_v9 = vsel %vm1004_vm4, %v3605_v5, -inf }
0x20bb   : > { %3620 = vmax.xlane.f32.xlu0 %v3619_v6 }
0x20bf   : > { %3626 = vmax.xlane.f32.xlu0 %v3625_v9 }
0x20c3   : > { %3629 = vmax.xlane.f32.xlu0 %v3628_v10 }
0x2138   : > { %v3612_v30 = vpop.xlane.xlu0 %3611 }
0x2139   : > { %v3632_v12 = vsub.f32 %v3600_v28, %v3612_v30  ;;  %v3609_v37 = vpop.xlane.xlu1 %3608 }
0x213a   : > { %v3631_v41 = vsub.f32 %v3599_v50, %v3609_v37 }
0x213b   : > { %v3641_v16 = vmul.f32 1.442695, %v3632_v12 }
0x213c   : > { %v3639_v18 = vmul.f32 1.442695, %v3631_v41  ;;  %v3618_v23 = vpop.xlane.xlu0 %3617 }
0x213d   : > { %7034 = vpow2.f32 %v3641_v16  ;;  %v3634_v19 = vsub.f32 %v3602_v55, %v3618_v23 }
0x213e   : > { %7036 = vpow2.f32 %v3639_v18 }
0x213f   : > { %v3645_v45 = vmul.f32 1.442695, %v3634_v19 }
0x2140   : > { %v3615_v21 = vpop.xlane.xlu0 %3614 }
0x2141   : > { %7038 = vpow2.f32 %v3645_v45  ;;  %v3633_v22 = vsub.f32 %v3601_v58, %v3615_v21 }
0x2143   : > { %v3643_v24 = vmul.f32 1.442695, %v3633_v22 }
0x2144   : > { %v3624_v46 = vpop.xlane.xlu0 %3623 }
0x2145   : > { %7040 = vpow2.f32 %v3643_v24  ;;  %v3636_v25 = vsub.f32 %v3604_v60, %v3624_v46 }
0x2147   : > { %v8387_v26 = vpop.eup %7034  ;;  %v3649_v27 = vmul.f32 1.442695, %v3636_v25 }
0x2148   : > { %v7037_v29 = vpop.eup %7036  ;;  %v3621_v32 = vpop.xlane.xlu0 %3620  ;;  %v3658_v33 = vsel %vm1004_vm4, %v8387_v26, 0.0 }
0x2149   : > { %7042 = vpow2.f32 %v3649_v27  ;;  %v3635_v62 = vsub.f32 %v3603_v3, %v3621_v32  ;;  %3659 = vadd.xlane.f32.xlu1 %v3658_v33  ;;  %v3655_v34 = vsel %vm1004_vm4, %v7037_v29, 0.0  ;;  %v5664_v27 = vld [vmem:[%s8774_s4 + $0x68] sm:$0xff]  ;;  %v5665_v32 = vld [vmem:[%s8774_s4 + $0x70] sm:$0xff]  ;;  %v5666_v33 = vld [vmem:[%s8774_s4 + $0x78] sm:$0xff] }
0x214a   : > { %3656 = vadd.xlane.f32.xlu0 %v3655_v34 }
0x214b   : > { %v7039_v54 = vpop.eup %7038  ;;  %v3647_v56 = vmul.f32 1.442695, %v3635_v62  ;;  %v6642_v62 = vpack.c.bf16 %v5666_v33, %v5665_v32 }
0x214c   : > { %v3627_v36 = vpop.xlane.xlu0 %3626  ;;  %v3664_v7 = vsel %vm1004_vm4, %v7039_v54, 0.0 }
0x214d   : > { %7044 = vpow2.f32 %v3647_v56  ;;  %v3637_v39 = vsub.f32 %v3605_v5, %v3627_v36  ;;  %3665 = vadd.xlane.f32.xlu1 %v3664_v7 }
0x214f   : > { %v7041_v40 = vpop.eup %7040  ;;  %v3651_v43 = vmul.f32 1.442695, %v3637_v39 }
0x2150   : > { %v3630_v44 = vpop.xlane.xlu0 %3629  ;;  %v3661_v47 = vsel %vm1004_vm4, %v7041_v40, 0.0 }
0x2151   : > { %7046 = vpow2.f32 %v3651_v43  ;;  %v3638_v28 = vsub.f32 %v3606_v8, %v3630_v44  ;;  %3662 = vadd.xlane.f32.xlu0 %v3661_v47 }
0x2153   : > { %v7043_v48 = vpop.eup %7042  ;;  %v3653_v50 = vmul.f32 1.442695, %v3638_v28 }
0x2154   : > { %v3670_v51 = vsel %vm1004_vm4, %v7043_v48, 0.0 }
0x2155   : > { %7048 = vpow2.f32 %v3653_v50  ;;  %3671 = vadd.xlane.f32.xlu1 %v3670_v51 }
0x2157   : > { %v7045_v52 = vpop.eup %7044 }
0x2158   : > { %v3667_v53 = vsel %vm1004_vm4, %v7045_v52, 0.0 }
0x2159   : > { %3668 = vadd.xlane.f32.xlu0 %v3667_v53 }
0x215b   : > { %v7047_v55 = vpop.eup %7046 }
0x215c   : > { %v3673_v57 = vsel %vm1004_vm4, %v7047_v55, 0.0 }
0x215d   : > { %3674 = vadd.xlane.f32.xlu0 %v3673_v57 }
0x215f   : > { %v7049_v58 = vpop.eup %7048 }
0x2160   : > { %v3676_v61 = vsel %vm1004_vm4, %v7049_v58, 0.0 }
0x2161   : > { %3677 = vadd.xlane.f32.xlu1 %v3676_v61 }
0x2173   : > { %6900 = vrot.lane.b32.xlu0 %v8355_v31, %s7420_s3 }
0x21d6   : > { %v3660_v63 = vpop.xlane.xlu1 %3659 }
0x21d7   : > { %v3657_v0 = vpop.xlane.xlu0 %3656 }
0x21d8   : > { %7050 = vrcp.f32 %v3657_v0 }
0x21d9   : > { %7052 = vrcp.f32 %v3660_v63 }
0x21da   : > { %v3666_v3 = vpop.xlane.xlu1 %3665 }
0x21de   : > { %v3663_v60 = vpop.xlane.xlu0 %3662 }
0x21df   : > { %7054 = vrcp.f32 %v3663_v60 }
0x21e0   : > { %7056 = vrcp.f32 %v3666_v3 }
0x21e2   : > { %v7051_v59 = vpop.eup %7050  ;;  %v3672_v5 = vpop.xlane.xlu1 %3671 }
0x21e3   : > { %v3680_v1 = vmul.f32 %v7051_v59, %v7037_v29  ;;  %v7053_v30 = vpop.eup %7052 }
0x21e4   : > { %v3682_v37 = vmul.f32 %v7053_v30, %v8387_v26  ;;  %v5663_v26 = vld [vmem:[%s8774_s4 + $0x60] sm:$0xff]  ;;  %v5674_v30 = vld [vmem:[%s8776_s6 + $0x68] sm:$0xff] }
0x21e5   : > { %6303 = vmatprep.mubr.msk.f32.mxu1 %vm1004_vm4, %v3680_v1  ;;  %v6638_v29 = vpack.c.bf16 %v5664_v27, %v5663_v26 }
0x21e6   : > { %v3669_v2 = vpop.xlane.xlu0 %3668 }
0x21e7   : > { %7058 = vrcp.f32 %v3669_v2  ;;  %6639 = vmatprep.subr.bf16.mxu0 %v6638_v29 }
0x21e8   : > { %7060 = vrcp.f32 %v3672_v5  ;;  %6641 = vmatpush3.bf16.msra.mxu0 %v6638_v29 }
0x21e9   : > { %v7055_v12 = vpop.eup %7054  ;;  %6643 = vmatprep.subr.bf16.mxu0 %v6642_v62 }
0x21ea   : > { %v3675_v4 = vpop.xlane.xlu0 %3674  ;;  %v7057_v41 = vpop.eup %7056  ;;  %v3684_v16 = vmul.f32 %v7055_v12, %v7041_v40  ;;  %v8426_v40 = vld [vmem:[%s8841_s2] sm:$0xff] }
0x21eb   : > { %7062 = vrcp.f32 %v3675_v4  ;;  %v3686_v23 = vmul.f32 %v7057_v41, %v7039_v54  ;;  %v5676_v41 = vld [vmem:[%s8776_s6 + $0x78] sm:$0xff] }
0x21ec   : > { %6645 = vmatpush3.bf16.msra.mxu0 %v6642_v62 }
0x21ee   : > { %v6901_v6 = vpop.permute.xlu0 %6900  ;;  %v3678_v31 = vpop.xlane.xlu1 %3677 }
0x21ef   : > { %v6903_v8 = vunpack.i.h.bf16 %v6901_v6  ;;  %v6902_v9 = vunpack.i.l.bf16 %v6901_v6  ;;  %7064 = vrcp.f32 %v3678_v31 }
0x21f1   : > { %v6634_v10 = vpack.c.bf16 %v6903_v8, %v6902_v9  ;;  %v7059_v18 = vpop.eup %7058 }
0x21f2   : > { %v7061_v19 = vpop.eup %7060  ;;  %v3688_v45 = vmul.f32 %v7059_v18, %v7045_v52  ;;  %v5680_v18 = vld [vmem:[%s8778_s8 + $0xc0] sm:$0xff] }
0x21f3   : > { %6635 = vmatprep.subr.bf16.mxu1 %v6634_v10  ;;  %v3690_v22 = vmul.f32 %v7061_v19, %v7043_v48  ;;  %v5682_v19 = vld [vmem:[%s8778_s8 + $0xd0] sm:$0xff] }
0x21f4   : > { %6637 = vmatpush3.bf16.msra.mxu1 %v6634_v10 }
0x21f5   : > { %v7063_v21 = vpop.eup %7062 }
0x21f6   : > { %v3692_v46 = vmul.f32 %v7063_v21, %v7047_v55  ;;  %v5683_v21 = vld [vmem:[%s8778_s8 + $0xd8] sm:$0xff] }
0x21f7   : > { %6304 = vmatmul.mubr.msk.f32.vlgmr.msra.gmra.mrb[38].mxu1 %vm1004_vm4, %v3682_v37  ;;  %v5675_v37 = vld [vmem:[%s8776_s6 + $0x70] sm:$0xff] }
0x21f8   : > { %6306 = vmatprep.mubr.msk.f32.mxu1 %vm1004_vm4, %v3684_v16  ;;  %v6650_v16 = vpack.c.bf16 %v5676_v41, %v5675_v37 }
0x21f9   : > { %v7065_v24 = vpop.eup %7064 }
0x21fa   : > { %v3694_v25 = vmul.f32 %v7065_v24, %v7049_v58  ;;  %v5684_v24 = vld [vmem:[%s8778_s8 + $0xe0] sm:$0xff] }
0x21fb   : > { %6307 = vmatmul.mubr.msk.f32.gmra.mrb[40].mxu1 %vm1004_vm4, %v3686_v23  ;;  %v5681_v23 = vld [vmem:[%s8778_s8 + $0xc8] sm:$0xff] }
0x21fc   : > { %6309 = vmatprep.mubr.msk.f32.mxu1 %vm1004_vm4, %v3688_v45  ;;  %v6654_v45 = vpack.c.bf16 %v5681_v23, %v5680_v18 }
0x21fe   : > { %6655 = vmatprep.subr.bf16.mxu0 %v6654_v45 }
0x21ff   : > { %6310 = vmatmul.mubr.msk.f32.gmra.mrb[42].mxu1 %vm1004_vm4, %v3690_v22  ;;  %v6658_v22 = vpack.c.bf16 %v5683_v21, %v5682_v19 }
0x2200   : > { %6312 = vmatprep.mubr.msk.f32.mxu1 %vm1004_vm4, %v3692_v46  ;;  %v5685_v46 = vld [vmem:[%s8778_s8 + $0xe8] sm:$0xff] }
0x2203   : > { %6313 = vmatmul.mubr.msk.f32.gmra.mrb[44].mxu1 %vm1004_vm4, %v3694_v25  ;;  %v6662_v25 = vpack.c.bf16 %v5685_v46, %v5684_v24  ;;  %v5693_v46 = vld [vmem:[#allocation11 + $0x3] ss:$0 sm:$0xff] }
0x22ca   : > { %v6305_v34 = vpop.f32.mrb[38].mxu1 }
0x22cb   : > { %v3791_v54 = vpop.f32.mrb[39].mxu1  ;;  %v3831_v36 = vmul.f32 %v8181_v11, %v6305_v34 }
0x22cc   : > { %v3830_v43 = vmul.f32 %v8426_v40, %v3791_v54  ;;  %v5671_v54 = vld [vmem:[%s8780_s10 + $0x3] ss:$0 sm:$0xff] }
0x22ce   : > { %v6308_v56 = vpop.f32.mrb[40].mxu1 }
0x22cf   : > { %v3833_v7 = vmul.f32 %v8195_v14, %v6308_v56  ;;  %v3801_v39 = vpop.f32.mrb[41].mxu1 }
0x22d0   : > { %v3832_v44 = vmul.f32 %v8187_v13, %v3801_v39  ;;  %v5667_v13 = vld [vmem:[#allocation5 + $0x3] ss:$0 sm:$0xff] }
0x22d1   : > { %v3839_v47 = vadd.f32 %v3833_v7, %v3831_v36  ;;  %v5672_v36 = vld [vmem:[#allocation10 + $0x3] ss:$0 sm:$0xff] }
0x22d2   : > { %v3838_v28 = vadd.f32 %v3832_v44, %v3830_v43  ;;  %v6311_v48 = vpop.f32.mrb[42].mxu1 }
0x22d3   : > { %v3835_v50 = vmul.f32 %v8209_v17, %v6311_v48  ;;  %v3811_v51 = vpop.f32.mrb[43].mxu1  ;;  %v5686_v48 = vld [vmem:[%s8778_s8 + $0xf0] sm:$0xff] }
0x22d4   : > { %v3834_v11 = vmul.f32 %v8201_v15, %v3811_v51 }
0x22d5   : > { %v3841_v52 = vadd.f32 %v3839_v47, %v3835_v50  ;;  %v5687_v50 = vld [vmem:[%s8778_s8 + $0xf8] sm:$0xff] }
0x22d6   : > { %v3840_v14 = vadd.f32 %v3838_v28, %v3834_v11  ;;  %v6314_v53 = vpop.f32.mrb[44].mxu1  ;;  %v6666_v51 = vpack.c.bf16 %v5687_v50, %v5686_v48  ;;  %v5677_v11 = vld [vmem:[#allocation7 + $0x3] ss:$0 sm:$0xff] }
0x22d7   : > { %v3837_v55 = vmul.f32 %v8223_v38, %v6314_v53  ;;  %v3821_v57 = vpop.f32.mrb[45].mxu1  ;;  %v8525_v48 = vld [vmem:[%s8841_s2 + $0x8] sm:$0xff] }
0x22d8   : > { %v3836_v58 = vmul.f32 %v8215_v20, %v3821_v57 }
0x22d9   : > { %v3843_v61 = vadd.f32 %v3841_v52, %v3837_v55 }
0x22da   : > { %v3842_v0 = vadd.f32 %v3840_v14, %v3836_v58 }
0x22dc   : > { %6323 = vmatprep.mubr.msk.f32.mxu0 %vm746_vm2, %v3842_v0 }
0x22dd   : > { %6324 = vmatmul.mubr.msk.f32.vlgmr.msra.gmra.mrb[44].mxu0 %vm746_vm2, %v3843_v61  ;;  %v5688_v61 = vld [vmem:[#allocation8 + $0x3] ss:$0 sm:$0xff] }
0x22de   : > { %6657 = vmatpush3.bf16.msra.mxu0 %v6654_v45 }
0x22df   : > { %6659 = vmatprep.subr.bf16.mxu0 %v6658_v22 }
0x22e2   : > { %6661 = vmatpush3.bf16.msra.mxu0 %v6658_v22  ;;  %v5692_v22 = vld [vmem:[%s8782_s12 + $0x3] ss:$0 sm:$0xff] }
0x22e3   : > { %6663 = vmatprep.subr.bf16.mxu0 %v6662_v25 }
0x22e6   : > { %6665 = vmatpush3.bf16.msra.mxu0 %v6662_v25 }
0x22e7   : > { %6667 = vmatprep.subr.bf16.mxu0 %v6666_v51 }
0x22ea   : > { %6669 = vmatpush3.bf16.msra.mxu0 %v6666_v51  ;;  %v8531_v51 = vld [vmem:[%s8841_s2 + $0x10] sm:$0xff] }
0x23b0   : > { %v6325_v59 = vpop.f32.mrb[44].mxu0 }
0x23b1   : > { %v3929_v17 = vpop.f32.mrb[45].mxu0  ;;  %v3935_v60 = vadd.f32 %v6325_v59, %v5667_v13 }
0x23b2   : > { %v3930_v63 = vadd.f32 %v5667_v13, %v3929_v17 }
0x23b3   : > { %v3939_v1 = vadd.f32 %v3935_v60, %v8351_v49  ;;  %v5673_v49 = vld [vmem:[%s8776_s6 + $0x60] sm:$0xff] }
0x23b4   : > { %v3938_v15 = vadd.f32 %v3930_v63, %v8347_v42  ;;  %v6646_v12 = vpack.c.bf16 %v5674_v30, %v5673_v49  ;;  %v5696_v30 = vld [vmem:[%s8840_s15 + $0x90] sm:$0xff] }
0x23b5   : > { %v3947_v20 = vsel %vm746_vm2, %v3939_v1, 0.0 }
0x23b6   : > { %v3944_v38 = vsel %vm746_vm2, %v3938_v15, 0.0  ;;  %6647 = vmatprep.subr.bf16.mxu1 %v6646_v12 }
0x23b7   : > { %3945 = vadd.xlane.f32.xlu1 %v3944_v38  ;;  %6649 = vmatpush3.bf16.msra.mxu1 %v6646_v12  ;;  %v5697_v12 = vld [vmem:[%s8840_s15 + $0x98] sm:$0xff] }
0x23b8   : > { %6651 = vmatprep.subr.bf16.mxu1 %v6650_v16  ;;  %v6674_v37 = vpack.c.bf16 %v5697_v12, %v5696_v30 }
0x23bb   : > { %3948 = vadd.xlane.f32.xlu1 %v3947_v20  ;;  %6653 = vmatpush3.bf16.msra.mxu1 %v6650_v16 }
0x2444   : > { %v3946_v2 = vpop.xlane.xlu1 %3945 }
0x2445   : > { %v3950_v3 = vmul.f32 0.03125, %v3946_v2 }
0x2447   : > { %v3952_v4 = vsub.f32 %v3938_v15, %v3950_v3 }
0x2448   : > { %v3949_v5 = vpop.xlane.xlu1 %3948 }
0x2449   : > { %v3951_v6 = vmul.f32 0.03125, %v3949_v5  ;;  %v3954_v8 = vmul.f32 %v3952_v4, %v3952_v4 }
0x244b   : > { %v3953_v9 = vsub.f32 %v3939_v1, %v3951_v6  ;;  %v3956_v31 = vsel %vm746_vm2, %v3954_v8, 0.0 }
0x244c   : > { %3957 = vadd.xlane.f32.xlu1 %v3956_v31 }
0x244d   : > { %v3955_v10 = vmul.f32 %v3953_v9, %v3953_v9 }
0x244f   : > { %v3959_v42 = vsel %vm746_vm2, %v3955_v10, 0.0  ;;  %v5694_v10 = vld [vmem:[%s8840_s15 + $0x80] sm:$0xff] }
0x2450   : > { %3960 = vadd.xlane.f32.xlu1 %v3959_v42  ;;  %v5695_v42 = vld [vmem:[%s8840_s15 + $0x88] sm:$0xff] }
0x2451   : > { %v6670_v49 = vpack.c.bf16 %v5695_v42, %v5694_v10 }
0x2453   : > { %6671 = vmatprep.subr.bf16.mxu1 %v6670_v49 }
0x24d9   : > { %v3958_v26 = vpop.xlane.xlu1 %3957 }
0x24da   : > { %v3962_v27 = vmul.f32 0.03125, %v3958_v26 }
0x24dc   : > { %v3964_v29 = vadd.f32 1e-05, %v3962_v27 }
0x24dd   : > { %v3961_v32 = vpop.xlane.xlu1 %3960 }
0x24de   : > { %7066 = vrsqrt.f32 %v3964_v29  ;;  %v3963_v33 = vmul.f32 0.03125, %v3961_v32 }
0x24e0   : > { %v3965_v62 = vadd.f32 1e-05, %v3963_v33 }
0x24e2   : > { %7068 = vrsqrt.f32 %v3965_v62  ;;  %v5698_v62 = vld [vmem:[#allocation2 + $0x4] ss:$0 sm:$0xff] }
0x24e8   : > { %v7067_v34 = vpop.eup %7066 }
0x24e9   : > { %v3968_v56 = vmul.f32 %v7067_v34, %v3952_v4 }
0x24eb   : > { %v3976_v7 = vmul.f32 %v5671_v54, %v3968_v56 }
0x24ec   : > { %v7069_v39 = vpop.eup %7068 }
0x24ed   : > { %v3969_v43 = vmul.f32 %v7069_v39, %v3953_v9  ;;  %v3984_v44 = vadd.f32 %v5672_v36, %v3976_v7 }
0x24ef   : > { %v3977_v47 = vmul.f32 %v5671_v54, %v3969_v43  ;;  %6334 = vmatprep.mubr.msk.f32.mxu1 %vm746_vm2, %v3984_v44 }
0x24f1   : > { %v3985_v28 = vadd.f32 %v5672_v36, %v3977_v47 }
0x24f3   : > { %6335 = vmatmul.mubr.msk.f32.vlgmr.msra.gmra.mrb[46].mxu1 %vm746_vm2, %v3985_v28 }
0x24f4   : > { %6673 = vmatpush3.bf16.msra.mxu1 %v6670_v49 }
0x24f5   : > { %6675 = vmatprep.subr.bf16.mxu1 %v6674_v37 }
0x24f8   : > { %6677 = vmatpush3.bf16.msra.mxu1 %v6674_v37 }
0x25c6   : > { %v6336_v52 = vpop.f32.mrb[46].mxu1 }
0x25c7   : > { %v4077_v14 = vadd.f32 %v6336_v52, %v5677_v11  ;;  %v4071_v53 = vpop.f32.mrb[47].mxu1 }
0x25c8   : > { %v4072_v55 = vadd.f32 %v5677_v11, %v4071_v53 }
0x25c9   : > { %v4081_v58 = vmax.f32 %v4077_v14, 0.0  ;;  %v8545_v14 = vld [vmem:[%s8841_s2 + $0x20] sm:$0xff] }
0x25ca   : > { %v4080_v57 = vmax.f32 %v4072_v55, 0.0  ;;  %v8553_v55 = vld [vmem:[%s8841_s2 + $0x28] sm:$0xff] }
0x25cc   : > { %6353 = vmatprep.mubr.msk.f32.mxu0 %vm1490_vm5, %v4080_v57 }
0x25cd   : > { %6354 = vmatmul.mubr.msk.f32.vlgmr.msra.gmra.mrb[46].mxu0 %vm1490_vm5, %v4081_v58  ;;  %v8559_v58 = vld [vmem:[%s8841_s2 + $0x30] sm:$0xff] }
0x26a0   : > { %v6355_v0 = vpop.f32.mrb[46].mxu0 }
0x26a1   : > { %v4171_v13 = vpop.f32.mrb[47].mxu0  ;;  %v4177_v59 = vadd.f32 %v6355_v0, %v5688_v61  ;;  %v8567_v0 = vld [vmem:[%s8841_s2 + $0x38] sm:$0xff] }
0x26a2   : > { %v4172_v17 = vadd.f32 %v5688_v61, %v4171_v13 }
0x26a3   : > { %v4181_v63 = vadd.f32 %v4177_v59, %v3985_v28 }
0x26a4   : > { %v4180_v60 = vadd.f32 %v4172_v17, %v3984_v44 }
0x26a5   : > { %v4189_v1 = vsel %vm746_vm2, %v4181_v63, 0.0 }
0x26a6   : > { %v4186_v15 = vsel %vm746_vm2, %v4180_v60, 0.0 }
0x26a7   : > { %4187 = vadd.xlane.f32.xlu1 %v4186_v15 }
0x26ab   : > { %4190 = vadd.xlane.f32.xlu1 %v4189_v1 }
0x2734   : > { %v4188_v38 = vpop.xlane.xlu1 %4187 }
0x2735   : > { %v4192_v20 = vmul.f32 0.03125, %v4188_v38 }
0x2737   : > { %v4194_v2 = vsub.f32 %v4180_v60, %v4192_v20 }
0x2738   : > { %v4191_v3 = vpop.xlane.xlu1 %4190 }
0x2739   : > { %v4193_v4 = vmul.f32 0.03125, %v4191_v3  ;;  %v4196_v5 = vmul.f32 %v4194_v2, %v4194_v2 }
0x273b   : > { %v4195_v6 = vsub.f32 %v4181_v63, %v4193_v4  ;;  %v4198_v8 = vsel %vm746_vm2, %v4196_v5, 0.0 }
0x273c   : > { %4199 = vadd.xlane.f32.xlu0 %v4198_v8 }
0x273d   : > { %v4197_v9 = vmul.f32 %v4195_v6, %v4195_v6 }
0x273f   : > { %v4201_v31 = vsel %vm746_vm2, %v4197_v9, 0.0 }
0x2740   : > { %4202 = vadd.xlane.f32.xlu1 %v4201_v31 }
0x27c9   : > { %v4200_v41 = vpop.xlane.xlu0 %4199 }
0x27ca   : > { %v4204_v16 = vmul.f32 0.03125, %v4200_v41 }
0x27cc   : > { %v4206_v18 = vadd.f32 1e-05, %v4204_v16 }
0x27cd   : > { %v4203_v23 = vpop.xlane.xlu1 %4202 }
0x27ce   : > { %7070 = vrsqrt.f32 %v4206_v18  ;;  %v4205_v19 = vmul.f32 0.03125, %v4203_v23 }
0x27d0   : > { %v4207_v45 = vadd.f32 1e-05, %v4205_v19 }
0x27d2   : > { %7072 = vrsqrt.f32 %v4207_v45 }
0x27d8   : > { %v7071_v21 = vpop.eup %7070 }
0x27d9   : > { %v4210_v24 = vmul.f32 %v7071_v21, %v4194_v2 }
0x27db   : > { %v4218_v25 = vmul.f32 %v5692_v22, %v4210_v24 }
0x27dc   : > { %v7073_v26 = vpop.eup %7072 }
0x27dd   : > { %v4211_v27 = vmul.f32 %v7073_v26, %v4195_v6  ;;  %v8504_v29 = vadd.f32 %v5693_v46, %v4218_v25 }
0x27df   : > { %v4219_v32 = vmul.f32 %v5692_v22, %v4211_v27  ;;  %6364 = vmatprep.mubr.msk.f32.mxu1 %vm746_vm2, %v8504_v29 }
0x27e1   : > { %v8508_v33 = vadd.f32 %v5693_v46, %v4219_v32 }
0x27e3   : > { %6365 = vmatmul.mubr.msk.f32.vlgmr.msra.gmra.mrb[48].mxu1 %vm746_vm2, %v8508_v33 }
0x28b6   : > { %v6366_v34 = vpop.f32.mrb[48].mxu1 }
0x28b7   : > { %v4319_v54 = vadd.f32 %v6366_v34, %v5698_v62  ;;  %v4313_v56 = vpop.f32.mrb[49].mxu1 }
0x28b8   : > { %v4314_v36 = vadd.f32 %v5698_v62, %v4313_v56 }
0x28b9   : > { %v4323_v50 = vmul.f32 %v8525_v48, %v4319_v54  ;;  %v4325_v52 = vmul.f32 %v8539_v35, %v4319_v54  ;;  %v4327_v57 = vmul.f32 %v8553_v55, %v4319_v54  ;;  %v4329_v13 = vmul.f32 %v8567_v0, %v4319_v54 }
0x28ba   : > { %v8512_v7 = vpack.i.bf16 %v4319_v54, %v4314_v36  ;;  %v4322_v39 = vmul.f32 %v8426_v40, %v4314_v36  ;;  %v4324_v11 = vmul.f32 %v8531_v51, %v4314_v36  ;;  %v4326_v53 = vmul.f32 %v8545_v14, %v4314_v36 }
0x28bb   : > { %v4328_v61 = vmul.f32 %v8559_v58, %v4314_v36 }
0x28bc   : > { %6905 = vrot.lane.b32.xlu1 %v8512_v7, %s7419_s19  ;;  %6371 = vmatprep.mubr.msk.f32.mxu1 %vm746_vm2, %v4322_v39 }
0x292e   : > { %v6906_v43 = vpop.permute.xlu1 %6905 }
0x292f   : > { %v6908_v44 = vunpack.i.h.bf16 %v6906_v43  ;;  %v6907_v47 = vunpack.i.l.bf16 %v6906_v43 }
0x2931   : > { %v6678_v28 = vpack.c.bf16 %v6908_v44, %v6907_v47 }
0x2933   : > { %6680 = vmatprep.subr.msk.bf16.mxu1 %vm7830_vm3, %v6678_v28 }
0x2934   : > { %6683 = vmatpush3.bf16.xpose.msk.msra.mxu1 %vm7830_vm3, %v6678_v28 }
0x293b   : > { %6372 = vmatmul.mubr.msk.f32.vlgmr.msra.gmra.mrb[50].mxu1 %vm746_vm2, %v4323_v50 }
0x293c   : > { %6374 = vmatprep.mubr.msk.f32.mxu1 %vm746_vm2, %v4324_v11 }
0x293f   : > { %6375 = vmatmul.mubr.msk.f32.gmra.mrb[52].mxu1 %vm746_vm2, %v4325_v52 }
0x2940   : > { %6377 = vmatprep.mubr.msk.f32.mxu1 %vm746_vm2, %v4326_v53 }
0x2943   : > { %6378 = vmatmul.mubr.msk.f32.gmra.mrb[54].mxu1 %vm746_vm2, %v4327_v57 }
0x2944   : > { %6380 = vmatprep.mubr.msk.f32.mxu1 %vm746_vm2, %v4328_v61 }
0x2947   : > { %6381 = vmatmul.mubr.msk.f32.gmra.mrb[56].mxu1 %vm746_vm2, %v4329_v13 }
0x2a0e   : > { %v6373_v59 = vpop.f32.mrb[50].mxu1 }
0x2a0f   : > { %v4470_v17 = vmul.f32 0.35355338, %v6373_v59  ;;  %v4430_v60 = vpop.f32.mrb[51].mxu1 }
0x2a10   : > { %v4469_v63 = vmul.f32 0.35355338, %v4430_v60 }
0x2a11   : > { %v4480_v15 = vsel %vm1004_vm4, %v4470_v17, -inf }
0x2a12   : > { %4481 = vmax.xlane.f32.xlu0 %v4480_v15  ;;  %v6376_v1 = vpop.f32.mrb[52].mxu1  ;;  %v4477_v38 = vsel %vm1004_vm4, %v4469_v63, -inf }
0x2a13   : > { %v4472_v20 = vmul.f32 0.35355338, %v6376_v1  ;;  %4478 = vmax.xlane.f32.xlu1 %v4477_v38  ;;  %v4440_v2 = vpop.f32.mrb[53].mxu1 }
0x2a14   : > { %v4471_v3 = vmul.f32 0.35355338, %v4440_v2 }
0x2a15   : > { %v4486_v4 = vsel %vm1004_vm4, %v4472_v20, -inf }
0x2a16   : > { %4487 = vmax.xlane.f32.xlu0 %v4486_v4  ;;  %v6379_v5 = vpop.f32.mrb[54].mxu1  ;;  %v4483_v9 = vsel %vm1004_vm4, %v4471_v3, -inf }
0x2a17   : > { %v4450_v6 = vpop.f32.mrb[55].mxu1  ;;  %v4474_v8 = vmul.f32 0.35355338, %v6379_v5 }
0x2a18   : > { %v4473_v42 = vmul.f32 0.35355338, %v4450_v6 }
0x2a19   : > { %v4492_v49 = vsel %vm1004_vm4, %v4474_v8, -inf }
0x2a1a   : > { %4484 = vmax.xlane.f32.xlu0 %v4483_v9  ;;  %v6382_v31 = vpop.f32.mrb[56].mxu1  ;;  %v4489_v12 = vsel %vm1004_vm4, %v4473_v42, -inf }
0x2a1b   : > { %v4460_v10 = vpop.f32.mrb[57].mxu1  ;;  %v4476_v37 = vmul.f32 0.35355338, %v6382_v31 }
0x2a1c   : > { %v4475_v30 = vmul.f32 0.35355338, %v4460_v10 }
0x2a1d   : > { %v4498_v16 = vsel %vm1004_vm4, %v4476_v37, -inf }
0x2a1e   : > { %4493 = vmax.xlane.f32.xlu0 %v4492_v49  ;;  %v4495_v41 = vsel %vm1004_vm4, %v4475_v30, -inf }
0x2a22   : > { %4490 = vmax.xlane.f32.xlu0 %v4489_v12 }
0x2a26   : > { %4496 = vmax.xlane.f32.xlu0 %v4495_v41 }
0x2a2a   : > { %4499 = vmax.xlane.f32.xlu0 %v4498_v16 }
0x2a9f   : > { %v4482_v18 = vpop.xlane.xlu0 %4481 }
0x2aa0   : > { %v4502_v23 = vsub.f32 %v4470_v17, %v4482_v18  ;;  %v4479_v19 = vpop.xlane.xlu1 %4478 }
0x2aa1   : > { %v4501_v45 = vsub.f32 %v4469_v63, %v4479_v19 }
0x2aa2   : > { %v4511_v21 = vmul.f32 1.442695, %v4502_v23 }
0x2aa3   : > { %v4509_v22 = vmul.f32 1.442695, %v4501_v45  ;;  %v4488_v24 = vpop.xlane.xlu0 %4487 }
0x2aa4   : > { %7074 = vpow2.f32 %v4511_v21  ;;  %v4504_v46 = vsub.f32 %v4472_v20, %v4488_v24 }
0x2aa5   : > { %7076 = vpow2.f32 %v4509_v22 }
0x2aa6   : > { %v4515_v25 = vmul.f32 1.442695, %v4504_v46 }
0x2aa7   : > { %v4485_v26 = vpop.xlane.xlu0 %4484 }
0x2aa8   : > { %7078 = vpow2.f32 %v4515_v25  ;;  %v4503_v27 = vsub.f32 %v4471_v3, %v4485_v26 }
0x2aaa   : > { %v4513_v32 = vmul.f32 1.442695, %v4503_v27 }
0x2aab   : > { %v4494_v62 = vpop.xlane.xlu0 %4493 }
0x2aac   : > { %7080 = vpow2.f32 %v4513_v32  ;;  %v4506_v34 = vsub.f32 %v4474_v8, %v4494_v62 }
0x2aae   : > { %v8579_v54 = vpop.eup %7074  ;;  %v4519_v56 = vmul.f32 1.442695, %v4506_v34 }
0x2aaf   : > { %v7077_v36 = vpop.eup %7076  ;;  %v4491_v39 = vpop.xlane.xlu0 %4490  ;;  %v4528_v43 = vsel %vm1004_vm4, %v8579_v54, 0.0 }
0x2ab0   : > { %7082 = vpow2.f32 %v4519_v56  ;;  %v4505_v44 = vsub.f32 %v4473_v42, %v4491_v39  ;;  %4529 = vadd.xlane.f32.xlu1 %v4528_v43  ;;  %v4525_v47 = vsel %vm1004_vm4, %v7077_v36, 0.0  ;;  %v5720_v56 = vld [vmem:[%s8774_s4 + $0x88] sm:$0xff]  ;;  %v5721_v39 = vld [vmem:[%s8774_s4 + $0x90] sm:$0xff]  ;;  %v5722_v43 = vld [vmem:[%s8774_s4 + $0x98] sm:$0xff] }
0x2ab1   : > { %4526 = vadd.xlane.f32.xlu0 %v4525_v47 }
0x2ab2   : > { %v7079_v28 = vpop.eup %7078  ;;  %v4517_v50 = vmul.f32 1.442695, %v4505_v44  ;;  %v6692_v44 = vpack.c.bf16 %v5722_v43, %v5721_v39 }
0x2ab3   : > { %v4497_v11 = vpop.xlane.xlu0 %4496  ;;  %v4534_v52 = vsel %vm1004_vm4, %v7079_v28, 0.0 }
0x2ab4   : > { %7084 = vpow2.f32 %v4517_v50  ;;  %v4507_v53 = vsub.f32 %v4475_v30, %v4497_v11  ;;  %4535 = vadd.xlane.f32.xlu1 %v4534_v52 }
0x2ab6   : > { %v7081_v57 = vpop.eup %7080  ;;  %v4521_v61 = vmul.f32 1.442695, %v4507_v53 }
0x2ab7   : > { %v4500_v13 = vpop.xlane.xlu0 %4499  ;;  %v4531_v59 = vsel %vm1004_vm4, %v7081_v57, 0.0 }
0x2ab8   : > { %7086 = vpow2.f32 %v4521_v61  ;;  %v4508_v17 = vsub.f32 %v4476_v37, %v4500_v13  ;;  %4532 = vadd.xlane.f32.xlu0 %v4531_v59 }
0x2aba   : > { %v7083_v60 = vpop.eup %7082  ;;  %v4523_v63 = vmul.f32 1.442695, %v4508_v17 }
0x2abb   : > { %v4540_v15 = vsel %vm1004_vm4, %v7083_v60, 0.0 }
0x2abc   : > { %7088 = vpow2.f32 %v4523_v63  ;;  %4541 = vadd.xlane.f32.xlu1 %v4540_v15 }
0x2abe   : > { %v7085_v1 = vpop.eup %7084 }
0x2abf   : > { %v4537_v38 = vsel %vm1004_vm4, %v7085_v1, 0.0 }
0x2ac0   : > { %4538 = vadd.xlane.f32.xlu0 %v4537_v38 }
0x2ac2   : > { %v7087_v20 = vpop.eup %7086 }
0x2ac3   : > { %v4543_v2 = vsel %vm1004_vm4, %v7087_v20, 0.0 }
0x2ac4   : > { %4544 = vadd.xlane.f32.xlu0 %v4543_v2 }
0x2ac6   : > { %v7089_v3 = vpop.eup %7088 }
0x2ac7   : > { %v4546_v4 = vsel %vm1004_vm4, %v7089_v3, 0.0 }
0x2ac8   : > { %4547 = vadd.xlane.f32.xlu1 %v4546_v4 }
0x2ada   : > { %6910 = vrot.lane.b32.xlu0 %v8512_v7, %s7420_s3  ;;  %s8846_s3 = sld [smem:[#allocation36_spill]] }
0x2ae0   : > { %s8717_s23 = scalar_lea.hbm %s8846_s3, %s5763_s22 }
0x2b3d   : > { %v4530_v9 = vpop.xlane.xlu1 %4529 }
0x2b3e   : > { %v4527_v5 = vpop.xlane.xlu0 %4526 }
0x2b3f   : > { %7090 = vrcp.f32 %v4527_v5 }
0x2b40   : > { %7092 = vrcp.f32 %v4530_v9 }
0x2b41   : > { %v4536_v42 = vpop.xlane.xlu1 %4535 }
0x2b45   : > { %v4533_v8 = vpop.xlane.xlu0 %4532 }
0x2b46   : > { %7094 = vrcp.f32 %v4533_v8 }
0x2b47   : > { %7096 = vrcp.f32 %v4536_v42 }
0x2b49   : > { %v7091_v6 = vpop.eup %7090  ;;  %v4542_v30 = vpop.xlane.xlu1 %4541 }
0x2b4a   : > { %v4550_v31 = vmul.f32 %v7091_v6, %v7077_v36  ;;  %v7093_v18 = vpop.eup %7092 }
0x2b4b   : > { %v4552_v19 = vmul.f32 %v7093_v18, %v8579_v54  ;;  %v5719_v54 = vld [vmem:[%s8774_s4 + $0x80] sm:$0xff]  ;;  %v5731_v18 = vld [vmem:[%s8776_s6 + $0x90] sm:$0xff] }
0x2b4c   : > { %6387 = vmatprep.mubr.msk.f32.mxu0 %vm1004_vm4, %v4550_v31  ;;  %v6688_v36 = vpack.c.bf16 %v5720_v56, %v5719_v54 }
0x2b4d   : > { %v4539_v10 = vpop.xlane.xlu0 %4538 }
0x2b4e   : > { %7098 = vrcp.f32 %v4539_v10  ;;  %6689 = vmatprep.subr.bf16.mxu1 %v6688_v36 }
0x2b4f   : > { %7100 = vrcp.f32 %v4542_v30  ;;  %6691 = vmatpush3.bf16.msra.mxu1 %v6688_v36 }
0x2b50   : > { %v7095_v23 = vpop.eup %7094  ;;  %6693 = vmatprep.subr.bf16.mxu1 %v6692_v44 }
0x2b51   : > { %v4545_v49 = vpop.xlane.xlu0 %4544  ;;  %v7097_v45 = vpop.eup %7096  ;;  %v4554_v21 = vmul.f32 %v7095_v23, %v7081_v57  ;;  %v5732_v23 = vld [vmem:[%s8776_s6 + $0x98] sm:$0xff] }
0x2b52   : > { %7102 = vrcp.f32 %v4545_v49  ;;  %v4556_v24 = vmul.f32 %v7097_v45, %v7079_v28  ;;  %v5736_v45 = vld [vmem:[%s8778_s8 + $0x100] sm:$0xff] }
0x2b53   : > { %6695 = vmatpush3.bf16.msra.mxu1 %v6692_v44  ;;  %v5727_v44 = vld [vmem:[%s8780_s10 + $0x4] ss:$0 sm:$0xff] }
0x2b55   : > { %v6911_v12 = vpop.permute.xlu0 %6910  ;;  %v4548_v7 = vpop.xlane.xlu1 %4547 }
0x2b56   : > { %v6913_v37 = vunpack.i.h.bf16 %v6911_v12  ;;  %v6912_v41 = vunpack.i.l.bf16 %v6911_v12  ;;  %7104 = vrcp.f32 %v4548_v7  ;;  %v5730_v7 = vld [vmem:[%s8776_s6 + $0x88] sm:$0xff] }
0x2b58   : > { %v6684_v16 = vpack.c.bf16 %v6913_v37, %v6912_v41  ;;  %v7099_v22 = vpop.eup %7098 }
0x2b59   : > { %v7101_v46 = vpop.eup %7100  ;;  %v4558_v25 = vmul.f32 %v7099_v22, %v7085_v1  ;;  %v5738_v22 = vld [vmem:[%s8778_s8 + $0x110] sm:$0xff] }
0x2b5a   : > { %6685 = vmatprep.subr.bf16.mxu0 %v6684_v16  ;;  %v4560_v27 = vmul.f32 %v7101_v46, %v7083_v60  ;;  %v5739_v46 = vld [vmem:[%s8778_s8 + $0x118] sm:$0xff] }
0x2b5b   : > { %6687 = vmatpush3.bf16.msra.mxu0 %v6684_v16 }
0x2b5c   : > { %v7103_v26 = vpop.eup %7102 }
0x2b5d   : > { %v4562_v62 = vmul.f32 %v7103_v26, %v7087_v20  ;;  %v5740_v26 = vld [vmem:[%s8778_s8 + $0x120] sm:$0xff] }
0x2b5e   : > { %6388 = vmatmul.mubr.msk.f32.vlgmr.msra.gmra.mrb[48].mxu0 %vm1004_vm4, %v4552_v19  ;;  %v6700_v19 = vpack.c.bf16 %v5732_v23, %v5731_v18  ;;  %v5193_v18 = vld [vmem:[%s8786_s16 + $0x8] sm:$0xff] }
0x2b5f   : > { %6390 = vmatprep.mubr.msk.f32.mxu0 %vm1004_vm4, %v4554_v21  ;;  %v5737_v21 = vld [vmem:[%s8778_s8 + $0x108] sm:$0xff] }
0x2b60   : > { %v7105_v32 = vpop.eup %7104 }
0x2b61   : > { %v4564_v34 = vmul.f32 %v7105_v32, %v7089_v3 }
0x2b62   : > { %6391 = vmatmul.mubr.msk.f32.gmra.mrb[50].mxu0 %vm1004_vm4, %v4556_v24  ;;  %v6704_v24 = vpack.c.bf16 %v5737_v21, %v5736_v45 }
0x2b63   : > { %6393 = vmatprep.mubr.msk.f32.mxu0 %vm1004_vm4, %v4558_v25  ;;  %v6708_v25 = vpack.c.bf16 %v5739_v46, %v5738_v22 }
0x2b64   : > { %6705 = vmatprep.subr.bf16.mxu1 %v6704_v24 }
0x2b66   : > { %6394 = vmatmul.mubr.msk.f32.gmra.mrb[52].mxu0 %vm1004_vm4, %v4560_v27  ;;  %v5741_v27 = vld [vmem:[%s8778_s8 + $0x128] sm:$0xff] }
0x2b67   : > { %6396 = vmatprep.mubr.msk.f32.mxu0 %vm1004_vm4, %v4562_v62  ;;  %v6712_v32 = vpack.c.bf16 %v5741_v27, %v5740_v26  ;;  %v5748_v26 = vld [vmem:[%s8782_s12 + $0x4] ss:$0 sm:$0xff] }
0x2b6a   : > { %6397 = vmatmul.mubr.msk.f32.gmra.mrb[54].mxu0 %vm1004_vm4, %v4564_v34 }
0x2c31   : > { %v6389_v47 = vpop.f32.mrb[48].mxu0 }
0x2c32   : > { %v4661_v28 = vpop.f32.mrb[49].mxu0  ;;  %v4701_v11 = vmul.f32 %v8525_v48, %v6389_v47 }
0x2c33   : > { %v4700_v57 = vmul.f32 %v8426_v40, %v4661_v28  ;;  %v5728_v28 = vld [vmem:[#allocation10 + $0x4] ss:$0 sm:$0xff] }
0x2c35   : > { %v6392_v50 = vpop.f32.mrb[50].mxu0 }
0x2c36   : > { %v4703_v52 = vmul.f32 %v8539_v35, %v6392_v50  ;;  %v4671_v53 = vpop.f32.mrb[51].mxu0 }
0x2c37   : > { %v4702_v61 = vmul.f32 %v8531_v51, %v4671_v53  ;;  %v5723_v51 = vld [vmem:[#allocation5 + $0x4] ss:$0 sm:$0xff] }
0x2c38   : > { %v4709_v13 = vadd.f32 %v4703_v52, %v4701_v11 }
0x2c39   : > { %v4708_v59 = vadd.f32 %v4702_v61, %v4700_v57  ;;  %v6395_v17 = vpop.f32.mrb[52].mxu0 }
0x2c3a   : > { %v4705_v60 = vmul.f32 %v8553_v55, %v6395_v17  ;;  %v4681_v63 = vpop.f32.mrb[53].mxu0 }
0x2c3b   : > { %v4704_v15 = vmul.f32 %v8545_v14, %v4681_v63 }
0x2c3c   : > { %v4711_v1 = vadd.f32 %v4709_v13, %v4705_v60  ;;  %v5742_v13 = vld [vmem:[%s8778_s8 + $0x130] sm:$0xff] }
0x2c3d   : > { %v4710_v38 = vadd.f32 %v4708_v59, %v4704_v15  ;;  %v6398_v20 = vpop.f32.mrb[54].mxu0  ;;  %v5743_v59 = vld [vmem:[%s8778_s8 + $0x138] sm:$0xff]  ;;  %v5733_v60 = vld [vmem:[#allocation7 + $0x4] ss:$0 sm:$0xff] }
0x2c3e   : > { %v4707_v48 = vmul.f32 %v8567_v0, %v6398_v20  ;;  %v4691_v2 = vpop.f32.mrb[55].mxu0  ;;  %v6716_v17 = vpack.c.bf16 %v5743_v59, %v5742_v13 }
0x2c3f   : > { %v4706_v35 = vmul.f32 %v8559_v58, %v4691_v2  ;;  %v5744_v2 = vld [vmem:[#allocation8 + $0x4] ss:$0 sm:$0xff] }
0x2c40   : > { %v4713_v3 = vadd.f32 %v4711_v1, %v4707_v48 }
0x2c41   : > { %v4712_v40 = vadd.f32 %v4710_v38, %v4706_v35 }
0x2c43   : > { %6407 = vmatprep.mubr.msk.f32.mxu1 %vm746_vm2, %v4712_v40 }
0x2c44   : > { %6408 = vmatmul.mubr.msk.f32.vlgmr.msra.gmra.mrb[58].mxu1 %vm746_vm2, %v4713_v3 }
0x2c45   : > { %6707 = vmatpush3.bf16.msra.mxu1 %v6704_v24 }
0x2c46   : > { %6709 = vmatprep.subr.bf16.mxu1 %v6708_v25 }
0x2c49   : > { %6711 = vmatpush3.bf16.msra.mxu1 %v6708_v25 }
0x2c4a   : > { %6713 = vmatprep.subr.bf16.mxu1 %v6712_v32 }
0x2c4d   : > { %6715 = vmatpush3.bf16.msra.mxu1 %v6712_v32  ;;  %v5749_v32 = vld [vmem:[#allocation11 + $0x4] ss:$0 sm:$0xff] }
0x2c4e   : > { %6717 = vmatprep.subr.bf16.mxu1 %v6716_v17 }
0x2c51   : > { %6719 = vmatpush3.bf16.msra.mxu1 %v6716_v17 }
0x2d17   : > { %v6409_v4 = vpop.f32.mrb[58].mxu1 }
0x2d18   : > { %v4799_v55 = vpop.f32.mrb[59].mxu1  ;;  %v4805_v5 = vadd.f32 %v6409_v4, %v5723_v51 }
0x2d19   : > { %v4800_v6 = vadd.f32 %v5723_v51, %v4799_v55 }
0x2d1a   : > { %v4809_v8 = vadd.f32 %v4805_v5, %v8508_v33  ;;  %v5729_v33 = vld [vmem:[%s8776_s6 + $0x80] sm:$0xff] }
0x2d1b   : > { %v4808_v14 = vadd.f32 %v4800_v6, %v8504_v29  ;;  %v6696_v16 = vpack.c.bf16 %v5730_v7, %v5729_v33  ;;  %v5101_v33 = vld [vmem:[#allocation13 + $0x18] sm:$0xff] }
0x2d1c   : > { %v4817_v58 = vsel %vm746_vm2, %v4809_v8, 0.0 }
0x2d1d   : > { %v4814_v0 = vsel %vm746_vm2, %v4808_v14, 0.0  ;;  %6697 = vmatprep.subr.bf16.mxu0 %v6696_v16 }
0x2d1e   : > { %4815 = vadd.xlane.f32.xlu1 %v4814_v0  ;;  %6699 = vmatpush3.bf16.msra.mxu0 %v6696_v16  ;;  %v5192_v16 = vld [vmem:[%s8786_s16] sm:$0xff] }
0x2d1f   : > { %6701 = vmatprep.subr.bf16.mxu0 %v6700_v19  ;;  %v6728_v23 = vpack.c.bf16 %v5193_v18, %v5192_v16 }
0x2d22   : > { %4818 = vadd.xlane.f32.xlu1 %v4817_v58  ;;  %6703 = vmatpush3.bf16.msra.mxu0 %v6700_v19 }
0x2dab   : > { %v4816_v9 = vpop.xlane.xlu1 %4815 }
0x2dac   : > { %v4820_v31 = vmul.f32 0.03125, %v4816_v9 }
0x2dae   : > { %v4822_v10 = vsub.f32 %v4808_v14, %v4820_v31 }
0x2daf   : > { %v4819_v42 = vpop.xlane.xlu1 %4818 }
0x2db0   : > { %v4821_v49 = vmul.f32 0.03125, %v4819_v42  ;;  %v4824_v30 = vmul.f32 %v4822_v10, %v4822_v10 }
0x2db2   : > { %v4823_v12 = vsub.f32 %v4809_v8, %v4821_v49  ;;  %v4826_v37 = vsel %vm746_vm2, %v4824_v30, 0.0 }
0x2db3   : > { %4827 = vadd.xlane.f32.xlu1 %v4826_v37  ;;  %v5099_v37 = vld [vmem:[#allocation13 + $0x8] sm:$0xff] }
0x2db4   : > { %v4825_v41 = vmul.f32 %v4823_v12, %v4823_v12 }
0x2db6   : > { %v4829_v29 = vsel %vm746_vm2, %v4825_v41, 0.0 }
0x2db7   : > { %4830 = vadd.xlane.f32.xlu1 %v4829_v29  ;;  %v5100_v29 = vld [vmem:[#allocation13 + $0x10] sm:$0xff] }
0x2db8   : > { %v6724_v7 = vpack.c.bf16 %v5101_v33, %v5100_v29 }
0x2e40   : > { %v4828_v62 = vpop.xlane.xlu1 %4827 }
0x2e41   : > { %v4832_v34 = vmul.f32 0.03125, %v4828_v62 }
0x2e43   : > { %v4834_v54 = vadd.f32 1e-05, %v4832_v34 }
0x2e44   : > { %v4831_v56 = vpop.xlane.xlu1 %4830 }
0x2e45   : > { %7106 = vrsqrt.f32 %v4834_v54  ;;  %v4833_v36 = vmul.f32 0.03125, %v4831_v56 }
0x2e47   : > { %v4835_v39 = vadd.f32 1e-05, %v4833_v36  ;;  %v5194_v36 = vld [vmem:[%s8786_s16 + $0x10] sm:$0xff] }
0x2e49   : > { %7108 = vrsqrt.f32 %v4835_v39  ;;  %v5195_v39 = vld [vmem:[%s8786_s16 + $0x18] sm:$0xff] }
0x2e4f   : > { %v7107_v43 = vpop.eup %7106 }
0x2e50   : > { %v4838_v47 = vmul.f32 %v7107_v43, %v4822_v10 }
0x2e52   : > { %v4846_v50 = vmul.f32 %v5727_v44, %v4838_v47  ;;  %v6732_v47 = vpack.c.bf16 %v5195_v39, %v5194_v36 }
0x2e53   : > { %v7109_v11 = vpop.eup %7108 }
0x2e54   : > { %v4839_v52 = vmul.f32 %v7109_v11, %v4823_v12  ;;  %v4854_v53 = vadd.f32 %v5728_v28, %v4846_v50  ;;  %v5098_v12 = vld [vmem:[#allocation13] sm:$0xff] }
0x2e55   : > { %v6720_v41 = vpack.c.bf16 %v5099_v37, %v5098_v12  ;;  %v5197_v50 = vld [vmem:[%s8786_s16 + $0x28] sm:$0xff] }
0x2e56   : > { %v4847_v57 = vmul.f32 %v5727_v44, %v4839_v52  ;;  %6418 = vmatprep.mubr.msk.f32.mxu0 %vm746_vm2, %v4854_v53  ;;  %v5198_v52 = vld [vmem:[%s8786_s16 + $0x30] sm:$0xff] }
0x2e57   : > { %6721 = vmatprep.subr.bf16.mxu0 %v6720_v41 }
0x2e58   : > { %v4855_v61 = vadd.f32 %v5728_v28, %v4847_v57  ;;  %v5196_v28 = vld [vmem:[%s8786_s16 + $0x20] sm:$0xff] }
0x2e59   : > { %v6736_v11 = vpack.c.bf16 %v5197_v50, %v5196_v28 }
0x2e5a   : > { %6419 = vmatmul.mubr.msk.f32.vlgmr.msra.gmra.mrb[56].mxu0 %vm746_vm2, %v4855_v61 }
0x2e5b   : > { %6723 = vmatpush3.bf16.msra.mxu0 %v6720_v41 }
0x2e5c   : > { %6725 = vmatprep.subr.bf16.mxu0 %v6724_v7 }
0x2e5f   : > { %6727 = vmatpush3.bf16.msra.mxu0 %v6724_v7 }
0x2e60   : > { %6729 = vmatprep.subr.bf16.mxu0 %v6728_v23 }
0x2f2d   : > { %v6420_v63 = vpop.f32.mrb[56].mxu0 }
0x2f2e   : > { %v4947_v15 = vadd.f32 %v6420_v63, %v5733_v60  ;;  %v4941_v1 = vpop.f32.mrb[57].mxu0 }
0x2f2f   : > { %v4942_v38 = vadd.f32 %v5733_v60, %v4941_v1 }
0x2f30   : > { %v4951_v48 = vmax.f32 %v4947_v15, 0.0 }
0x2f31   : > { %v4950_v20 = vmax.f32 %v4942_v38, 0.0 }
0x2f33   : > { %6437 = vmatprep.mubr.msk.f32.mxu1 %vm1490_vm5, %v4950_v20 }
0x2f34   : > { %6438 = vmatmul.mubr.msk.f32.vlgmr.msra.gmra.mrb[60].mxu1 %vm1490_vm5, %v4951_v48 }
0x3007   : > { %v6439_v35 = vpop.f32.mrb[60].mxu1 }
0x3008   : > { %v5041_v3 = vpop.f32.mrb[61].mxu1  ;;  %v5047_v40 = vadd.f32 %v6439_v35, %v5744_v2 }
0x3009   : > { %v5042_v51 = vadd.f32 %v5744_v2, %v5041_v3 }
0x300a   : > { %v5051_v55 = vadd.f32 %v5047_v40, %v4855_v61  ;;  %v5750_v61 = vld [vmem:[%s8844_s0] ss:$0 sm:$0xff] }
0x300b   : > { %v5050_v4 = vadd.f32 %v5042_v51, %v4854_v53  ;;  %v5199_v53 = vld [vmem:[%s8786_s16 + $0x38] sm:$0xff] }
0x300c   : > { %v5059_v6 = vsel %vm746_vm2, %v5051_v55, 0.0  ;;  %v6740_v57 = vpack.c.bf16 %v5199_v53, %v5198_v52 }
0x300d   : > { %v5056_v5 = vsel %vm746_vm2, %v5050_v4, 0.0 }
0x300e   : > { %5057 = vadd.xlane.f32.xlu1 %v5056_v5 }
0x3012   : > { %5060 = vadd.xlane.f32.xlu1 %v5059_v6 }
0x309b   : > { %v5058_v14 = vpop.xlane.xlu1 %5057 }
0x309c   : > { %v5062_v8 = vmul.f32 0.03125, %v5058_v14 }
0x309e   : > { %v5064_v0 = vsub.f32 %v5050_v4, %v5062_v8 }
0x309f   : > { %v5061_v58 = vpop.xlane.xlu1 %5060 }
0x30a0   : > { %v5063_v9 = vmul.f32 0.03125, %v5061_v58  ;;  %v5066_v31 = vmul.f32 %v5064_v0, %v5064_v0 }
0x30a2   : > { %v5065_v10 = vsub.f32 %v5051_v55, %v5063_v9  ;;  %v5068_v42 = vsel %vm746_vm2, %v5066_v31, 0.0 }
0x30a3   : > { %5069 = vadd.xlane.f32.xlu0 %v5068_v42 }
0x30a4   : > { %v5067_v49 = vmul.f32 %v5065_v10, %v5065_v10 }
0x30a6   : > { %v5071_v30 = vsel %vm746_vm2, %v5067_v49, 0.0 }
0x30a7   : > { %5072 = vadd.xlane.f32.xlu1 %v5071_v30 }
0x3130   : > { %v5070_v19 = vpop.xlane.xlu0 %5069 }
0x3131   : > { %v5074_v45 = vmul.f32 0.03125, %v5070_v19 }
0x3133   : > { %v5076_v21 = vadd.f32 1e-05, %v5074_v45 }
0x3134   : > { %v5073_v22 = vpop.xlane.xlu1 %5072 }
0x3135   : > { %7110 = vrsqrt.f32 %v5076_v21  ;;  %v5075_v24 = vmul.f32 0.03125, %v5073_v22 }
0x3137   : > { %v5077_v46 = vadd.f32 1e-05, %v5075_v24 }
0x3139   : > { %7112 = vrsqrt.f32 %v5077_v46 }
0x313f   : > { %v7111_v25 = vpop.eup %7110 }
0x3140   : > { %v5080_v27 = vmul.f32 %v7111_v25, %v5064_v0 }
0x3142   : > { %v5088_v62 = vmul.f32 %v5748_v26, %v5080_v27 }
0x3143   : > { %v7113_v34 = vpop.eup %7112 }
0x3144   : > { %v5081_v54 = vmul.f32 %v7113_v34, %v5065_v10  ;;  %v5096_v56 = vadd.f32 %v5749_v32, %v5088_v62 }
0x3146   : > { %v5089_v43 = vmul.f32 %v5748_v26, %v5081_v54  ;;  %6448 = vmatprep.mubr.msk.f32.mxu0 %vm746_vm2, %v5096_v56 }
0x3148   : > { %v5097_v44 = vadd.f32 %v5749_v32, %v5089_v43 }
0x314a   : > { %6449 = vmatmul.mubr.msk.f32.vlgmr.msra.gmra.mrb[58].mxu0 %vm746_vm2, %v5097_v44 }
0x314b   : > { %6731 = vmatpush3.bf16.msra.mxu0 %v6728_v23 }
0x314c   : > { %6733 = vmatprep.subr.bf16.mxu0 %v6732_v47 }
0x314f   : > { %6735 = vmatpush3.bf16.msra.mxu0 %v6732_v47 }
0x3150   : > { %6737 = vmatprep.subr.bf16.mxu0 %v6736_v11 }
0x3153   : > { %6739 = vmatpush3.bf16.msra.mxu0 %v6736_v11 }
0x3154   : > { %6741 = vmatprep.subr.bf16.mxu0 %v6740_v57 }
0x3157   : > { %6743 = vmatpush3.bf16.msra.mxu0 %v6740_v57 }
0x321d   : > { %v6450_v13 = vpop.f32.mrb[58].mxu0 }
0x321e   : > { %v5187_v59 = vadd.f32 %v6450_v13, %v5750_v61  ;;  %v5181_v17 = vpop.f32.mrb[59].mxu0 }
0x321f   : > { %v5182_v60 = vadd.f32 %v5750_v61, %v5181_v17 }
0x3220   : > { %v5191_v15 = vmax.f32 %v5187_v59, 0.0 }
0x3221   : > { %v5190_v63 = vmax.f32 %v5182_v60, 0.0 }
0x3223   : > { %6467 = vmatprep.mubr.msk.f32.mxu0 %vm1490_vm5, %v5190_v63 }
0x3224   : > { %6468 = vmatmul.mubr.msk.f32.vlgmr.msra.gmra.mrb[60].mxu0 %vm1490_vm5, %v5191_v15 }
0x3225   : > { %7339 = shalt.err (!%p7336_p2)
}
0x3226   : > { %s7340_s1 = scalar_lea.hbm %s8717_s23, 256  ;;  %s7344_s22 = scalar_lea.hbm %s8846_s3, 512 }
0x3227   : > { %p7341_p3 = scmp.ne.s32.totalorder %s8717_s23, %s7340_s1  ;;  %p7345_p7 = scmp.lt.u32.totalorder %s8717_s23, %s8846_s3 }
0x3228   : > { %p7346_p8 = scmp.lt.u32.totalorder %s7344_s22, %s7340_s1  ;;  %p7348_p13 = scmp.lt.u32.totalorder %s7340_s1, %s8717_s23 }
0x3229   : > { %p7342_p4 = pnand %p7341_p3, %p8847_p1 }
0x322a   : > { %p7347_p11 = por %p7346_p8, %p7345_p7 }
0x322b   : > { %p7343_p12 = pneg %p7342_p4 }
0x322c   : > { %p7349_p6 = por %p7348_p13, %p7347_p11 }
0x322e   : > { %p7350_p9 = pnand %p7349_p6, %p7343_p12 }
0x3230   : > { %7353 = shalt.err (!%p7350_p9)
}
0x3231   : > { %s7422_s20 = smov 128   ;;  %s7423_s21 = smov 8   ;;  %vm5288_vm6 = vcmask 64512  }
0x3232   : > { %6772 = dma.vmem_to_hbm [thread:$0]  (%p8847_p1), %s8711_s29, 256, %s8717_s23, %s8721_s24, %s7422_s20, %s7422_s20, %s7423_s21  }
0x3233   : > { %s8848_s5 = sld [smem:[#allocation34_spill]]  ;;  %s8849_s1 = sld [smem:[#allocation35_spill]] }
0x3239   : > { %v5753_v1 = vld [vmem:[%s8848_s5] ss:$0 sm:$0xff]  ;;  %s715_s9 = scalar_lea.vmem %s8849_s1, %s5761_s27 }
0x32f7   : > { %v6469_v38 = vpop.f32.mrb[60].mxu0 }
0x32f8   : > { %v5285_v20 = vadd.f32 %v6469_v38, %v5753_v1  ;;  %v5279_v48 = vpop.f32.mrb[61].mxu0 }
0x32f9   : > { %v5280_v2 = vadd.f32 %v5753_v1, %v5279_v48 }
0x32fa   : > { %5290 = vst.msk [vmem:[%s715_s9 + $0x8] sm:$0xff] %vm5288_vm6, %v5285_v20 }
0x32fb   : > { %5289 = vst.msk [vmem:[%s715_s9] sm:$0xff] %vm5288_vm6, %v5280_v2 }
0x32fc PF: > { %s8850_s19 = sld [smem:[#allocation22_spill]]  ;;  %s8851_s26 = sld [smem:[#allocation20_spill]] }
0x32fd   : > { %s8852_s29 = sld [smem:[#allocation26_spill]] }
0x3302   : > { %p6814_p1 = scmp.ge.s32.totalorder %s8850_s19, 2  ;;  %s5336_s23 = sand.u32 1, %s8851_s26  }
0x3303   : > { %p8853_p5 = scmp.ne.s32.totalorder %s8852_s29, 0  ;;  %s5337_s18 = scalar_lea.sflag [#allocation4], %s5336_s23 }
0x3305   : > { %p6797_p10 = pnand %p6814_p1, %p8853_p5 }
0x3307   : > { %7387 = dma.done.wait (!%p6797_p10), %s5337_s18, 256  }
0x3308   : > { %7389 = vsyncadd (!%p6797_p10), %s5337_s18, 4294967040  ;;  %s8854_s21 = sld [smem:[#allocation23_spill]]  ;;  %s8855_s27 = sld [smem:[#allocation21_spill]] }
0x3309   : > { %s8856_s20 = sld [smem:[#allocation24_spill]]  ;;  %s8857_s0 = smov %s7396_s30 }
0x330e   : > { %p34_p0 = scmp.ge.s32.totalorder %s8854_s21, 4   ;;  %s8858_s30 = smov %s8855_s27 }
0x3310   :  { %36 = sbr.rel (!%p34_p0) target bundleno = 18 (0x12), region = 216 }
0x3317   :  { %5342 = vsyncpa [#allocation3], 1 }
0x3318   :  { %5344 = vsyncpa [#allocation3 + $0x1], 1 }
0x3319   :  { %5345 = vsyncpa [#allocation6], 1 }
0x331a   :  { %5346 = vsyncpa [#allocation9], 1 }
0x331b   :  { %5347 = vsyncpa [#allocation12], 1 }
0x331c   :  { %5348 = vsyncpa [#allocation4], 1 }
0x331d   :  { %5350 = vsyncpa [#allocation4 + $0x1], 1 }

</bundles_post_ra>
